<compile_context>
chip_gen: v7x
topology: tpu7x:2x2x1
jax: 0.10.0
libtpu: 0.0.40
codegen_flags: <defaults>
</compile_context>

<pallas_src>
import functools

import jax
import jax.numpy as jnp
from jax.experimental import pallas as pl
from jax.experimental.pallas import tpu as pltpu


def _round_up(x, m):
    return ((x + m - 1) // m) * m


# ------------------------------ Pallas kernel -------------------------------

def _conv_block_kernel(x_ref, xh_ref, w1_ref, b1_ref, w2_ref, b2_ref,
                       w3_ref, b3_ref, wr_ref, br_ref, *rest,
                       W, h_blk, pad, res_conv, emit_x2):
    if emit_x2:
        out_ref, x2_ref, xpad_ref, stk_ref = rest
    else:
        out_ref, xpad_ref, stk_ref = rest
        x2_ref = None

    S_blk = h_blk * W
    c_p = w1_ref.shape[1]

    x = x_ref[0, :, :]                               # (S_blk, cin_p) bf16
    xh = xh_ref[0, 0, :, :]                          # (2*W, cin_p) bf16

    # conv1 (1x1) + folded bn1 + relu on the block's own rows.
    x1 = jnp.maximum(
        jnp.dot(x, w1_ref[...], preferred_element_type=jnp.float32) + b1_ref[...],
        0.0)                                         # (S_blk, c_p) f32

    # residual path: 1x1 conv + folded bn (or identity passthrough).
    if res_conv:
        res = jnp.dot(x, wr_ref[...],
                      preferred_element_type=jnp.float32) + br_ref[...]
    else:
        res = x.astype(jnp.float32)                  # requires Cin == Cout

    # conv1 on the two halo image rows (recomputed from the neighbouring
    # blocks' input rows; exact because conv1 is 1x1).  Zeroed at the image
    # boundary so conv2's zero-padding semantics hold.
    x1h = jnp.maximum(
        jnp.dot(xh, w1_ref[...], preferred_element_type=jnp.float32) + b1_ref[...],
        0.0)                                         # (2*W, c_p) f32
    b_idx = pl.program_id(1)
    top_ok = (b_idx > 0).astype(jnp.float32)
    bot_ok = (b_idx < pl.num_programs(1) - 1).astype(jnp.float32)

    # Stage x1 into the bf16 slab with a one-image-row vertical halo.
    n_extra = pad - W                                # 1..8 alignment rows/side
    xpad_ref[0:n_extra, :] = jnp.zeros((n_extra, c_p), jnp.bfloat16)
    xpad_ref[n_extra:pad, :] = (x1h[0:W] * top_ok).astype(jnp.bfloat16)
    xpad_ref[pad:pad + S_blk, :] = x1.astype(jnp.bfloat16)
    xpad_ref[pad + S_blk:pad + S_blk + W, :] = (
        x1h[W:2 * W] * bot_ok).astype(jnp.bfloat16)
    xpad_ref[pad + S_blk + W:S_blk + 2 * pad, :] = jnp.zeros(
        (n_extra, c_p), jnp.bfloat16)

    # In-kernel column masks killing the horizontal wrap-around of the
    # flattened taps (no HBM mask inputs).
    col = jax.lax.broadcasted_iota(jnp.int32, (S_blk, c_p), 0) % W
    not_first = col != 0                             # False where col == 0
    not_last = col != W - 1                          # False where col == W-1

    # conv2 (3x3, SAME, stride=1): stage the 9 shifted taps into the stacked
    # bf16 operand, then run ONE K = 9*c_p MXU contraction (accumulation stays
    # inside the MXU -- no f32 accumulator round-trips).
    for oy in (-1, 0, 1):
        for ox in (-1, 0, 1):
            tap = 3 * (oy + 1) + (ox + 1)
            start = pad + oy * W + ox
            h = xpad_ref[start:start + S_blk, :]     # (S_blk, c_p) bf16
            if ox == 1:
                h = jnp.where(not_last, h, jnp.zeros_like(h))
            elif ox == -1:
                h = jnp.where(not_first, h, jnp.zeros_like(h))
            stk_ref[:, tap * c_p:(tap + 1) * c_p] = h

    x2 = jnp.maximum(
        jnp.dot(stk_ref[...], w2_ref[...], preferred_element_type=jnp.float32)
        + b2_ref[...], 0.0)                          # (S_blk, c_p) f32
    if emit_x2:
        x2_ref[0, :, :] = x2.astype(x2_ref.dtype)

    # conv3 (1x1) + folded bn3 + residual add + relu.
    y = jnp.dot(x2.astype(jnp.bfloat16), w3_ref[...],
                preferred_element_type=jnp.float32) + b3_ref[...]
    out_ref[0, :, :] = jnp.maximum(y + res, 0.0).astype(out_ref.dtype)


# -------------------------------- wrapper -----------------------------------

def conv_block_forward(params, x_nchw, *, res_conv=True, eps=1e-6,
                       return_x_2=True, out_dtype=jnp.float32, h_block=None):
    N, Cin, H, W = x_nchw.shape
    S = H * W
    c = params["w1"].shape[0]          # bottleneck width = out_channels // 4
    cout = params["w3"].shape[0]
    if not res_conv:
        assert Cin == cout, "identity residual requires in_channels == out_channels"

    cin_p = _round_up(Cin, 128)
    c_p = _round_up(c, 128)
    cout_p = _round_up(cout, 128)
    pad = _round_up(W + 1, 8)
    out_bytes = jnp.dtype(out_dtype).itemsize
    emit_x2 = bool(return_x_2)

    # ---- row-block size: largest H-divisor whose working set fits VMEM ----
    def vmem_estimate(h_blk):
        s_blk = h_blk * W
        est = 2 * s_blk * cin_p * 2                         # x block (2 bufs)
        est += 2 * 2 * W * cin_p * 2                        # halo rows block
        est += 2 * s_blk * cout_p * out_bytes               # out block
        if emit_x2:
            est += 2 * s_blk * c_p * out_bytes              # x2 block
        est += 2 * 2 * (cin_p * c_p + 9 * c_p * c_p         # bf16 weights
                        + c_p * cout_p + cin_p * cout_p)
        est += 2 * 4 * 2 * (c_p + cout_p)                   # f32 biases
        est += (s_blk + 2 * pad) * c_p * 2                  # x1 halo slab
        est += s_blk * 9 * c_p * 2                          # stacked conv2 LHS
        return est

    try:
        vmem_cap = int(pltpu.get_tpu_info().vmem_capacity_bytes)
    except Exception:                       # conservative fallback (v7x-sized)
        vmem_cap = 64 * 1024 * 1024
    budget = min(int(0.80 * vmem_cap), 100 * 1024 * 1024)

    if h_block is None:
        cands = [h for h in range(H, 0, -1)
                 if H % h == 0 and ((h * W) % 8 == 0 or h == H)]
        h_blk = cands[-1]
        for h in cands:
            if vmem_estimate(h) <= budget:
                h_blk = h
                break
    else:
        h_blk = int(h_block)
        assert H % h_blk == 0, "h_block must divide H"
        assert (h_blk * W) % 8 == 0 or h_blk == H, \
            "h_block*W must be a multiple of 8 (or h_block == H)"
    n_blk = H // h_blk
    S_blk = h_blk * W
    vmem_limit = max(32 * 1024 * 1024,
                     min(budget, int(1.5 * vmem_estimate(h_blk)) + (4 << 20)))

    # NCHW -> flattened channels-last (N, H*W, Cin_pad), bf16 for the MXU.
    # TODO(synk): accept NHWC directly to avoid this transpose when chaining.
    x_flat = jnp.transpose(x_nchw, (0, 2, 3, 1)).reshape(N, S, Cin)
    x_in = jnp.pad(x_flat, ((0, 0), (0, 0), (0, cin_p - Cin))).astype(jnp.bfloat16)

    # Neighbour rows feeding each block's vertical halo (1 image row per side).
    x_img = x_in.reshape(N, H, W, cin_p)
    blk_start = jnp.arange(n_blk) * h_blk
    tops = jnp.take(x_img, blk_start - 1, axis=1, mode="clip")       # row above
    bots = jnp.take(x_img, blk_start + h_blk, axis=1, mode="clip")   # row below
    x_halo = jnp.stack([tops, bots], axis=2).reshape(N, n_blk, 2 * W, cin_p)

    # ----- fold eval-mode BatchNorm into the conv weights + bias vectors -----
    def fold(w_oi, pre):               # w_oi: (O, I); returns (I, O), (O,)
        scale = params[f"{pre}_gamma"] / jnp.sqrt(params[f"{pre}_var"] + eps)
        wf = (w_oi * scale[:, None]).T
        bf = params[f"{pre}_beta"] - params[f"{pre}_mean"] * scale
        return wf, bf

    def pad2(w, rows, cols):
        return jnp.pad(w, ((0, rows - w.shape[0]), (0, cols - w.shape[1])))

    w1, b1 = fold(params["w1"][:, :, 0, 0], "bn1")
    w1 = pad2(w1, cin_p, c_p).astype(jnp.bfloat16)
    b1 = jnp.pad(b1, (0, c_p - c))[None, :]

    scale2 = params["bn2_gamma"] / jnp.sqrt(params["bn2_var"] + eps)
    w2 = jnp.transpose(params["w2"], (2, 3, 1, 0)) * scale2[None, None, None, :]
    w2 = w2.reshape(9, c, c)
    w2 = jnp.pad(w2, ((0, 0), (0, c_p - c), (0, c_p - c)))
    w2 = w2.reshape(9 * c_p, c_p).astype(jnp.bfloat16)   # stacked-K layout
    b2 = params["bn2_beta"] - params["bn2_mean"] * scale2
    b2 = jnp.pad(b2, (0, c_p - c))[None, :]

    w3, b3 = fold(params["w3"][:, :, 0, 0], "bn3")
    w3 = pad2(w3, c_p, cout_p).astype(jnp.bfloat16)
    b3 = jnp.pad(b3, (0, cout_p - cout))[None, :]

    if res_conv:
        wr, br = fold(params["wr"][:, :, 0, 0], "bnr")
        wr = pad2(wr, cin_p, cout_p).astype(jnp.bfloat16)
        br = jnp.pad(br, (0, cout_p - cout))[None, :]
    else:
        wr = jnp.zeros((cin_p, cout_p), jnp.bfloat16)
        br = jnp.zeros((1, cout_p), jnp.float32)

    kernel = functools.partial(_conv_block_kernel, W=W, h_blk=h_blk, pad=pad,
                               res_conv=res_conv, emit_x2=emit_x2)

    const = lambda n, b: (0, 0)
    out_shapes = [jax.ShapeDtypeStruct((N, S, cout_p), out_dtype)]
    out_specs = [pl.BlockSpec((1, S_blk, cout_p), lambda n, b: (n, b, 0))]
    if emit_x2:
        out_shapes.append(jax.ShapeDtypeStruct((N, S, c_p), out_dtype))
        out_specs.append(pl.BlockSpec((1, S_blk, c_p), lambda n, b: (n, b, 0)))

    results = pl.pallas_call(
        kernel,
        out_shape=tuple(out_shapes),
        grid_spec=pltpu.PrefetchScalarGridSpec(
            num_scalar_prefetch=0,
            grid=(N, n_blk),
            in_specs=[
                pl.BlockSpec((1, S_blk, cin_p), lambda n, b: (n, b, 0)),       # x
                pl.BlockSpec((1, 1, 2 * W, cin_p), lambda n, b: (n, b, 0, 0)), # halo
                pl.BlockSpec((cin_p, c_p), const),                   # w1 (bn folded)
                pl.BlockSpec((1, c_p), const),                       # b1
                pl.BlockSpec((9 * c_p, c_p), const),                 # w2 stacked
                pl.BlockSpec((1, c_p), const),                       # b2
                pl.BlockSpec((c_p, cout_p), const),                  # w3 (bn folded)
                pl.BlockSpec((1, cout_p), const),                    # b3
                pl.BlockSpec((cin_p, cout_p), const),                # wr (bn folded)
                pl.BlockSpec((1, cout_p), const),                    # br
            ],
            out_specs=tuple(out_specs),
            scratch_shapes=[
                pltpu.VMEM((S_blk + 2 * pad, c_p), jnp.bfloat16),    # x1 + halo slab
                pltpu.VMEM((S_blk, 9 * c_p), jnp.bfloat16),          # stacked conv2 LHS
            ],
        ),
        compiler_params=pltpu.CompilerParams(
            dimension_semantics=("parallel", "parallel"),
            vmem_limit_bytes=vmem_limit),
    )(x_in, x_halo, w1, b1, w2, b2, w3, b3, wr, br)

    out_pad = results[0]
    out = jnp.transpose(out_pad[:, :, :cout].reshape(N, H, W, cout), (0, 3, 1, 2))
    if not emit_x2:
        return out
    x2 = jnp.transpose(results[1][:, :, :c].reshape(N, H, W, c), (0, 3, 1, 2))
    return out, x2


# --------------------------- pure-JAX reference ----------------------------

def conv_block_ref(params, x_nchw, *, res_conv=True, eps=1e-6):
    hp = jax.lax.Precision.HIGHEST

    def bn(y, g, b, m, v):
        g, b, m, v = (t[None, :, None, None] for t in (g, b, m, v))
        return (y - m) / jnp.sqrt(v + eps) * g + b

    def conv(y, w, padding):
        return jax.lax.conv_general_dilated(
            y, w, (1, 1), padding,
            dimension_numbers=("NCHW", "OIHW", "NCHW"), precision=hp)

    x = x_nchw
    residual = x
    h = conv(x, params["w1"], "VALID")
    h = jax.nn.relu(bn(h, params["bn1_gamma"], params["bn1_beta"],
                       params["bn1_mean"], params["bn1_var"]))
    h = conv(h, params["w2"], "SAME")
    x2 = jax.nn.relu(bn(h, params["bn2_gamma"], params["bn2_beta"],
                        params["bn2_mean"], params["bn2_var"]))
    h = conv(x2, params["w3"], "VALID")
    h = bn(h, params["bn3_gamma"], params["bn3_beta"],
           params["bn3_mean"], params["bn3_var"])
    if res_conv:
        residual = conv(residual, params["wr"], "VALID")
        residual = bn(residual, params["bnr_gamma"], params["bnr_beta"],
                      params["bnr_mean"], params["bnr_var"])
    out = jax.nn.relu(h + residual)
    return out, x2


# ------------------------------ param init ---------------------------------

def init_bn_params(key, ch):
    k1, k2, k3, k4 = jax.random.split(key, 4)
    gamma = jax.random.uniform(k1, (ch,), jnp.float32, 0.8, 1.2)
    beta = 0.1 * jax.random.normal(k2, (ch,), jnp.float32)
    mean = 0.1 * jax.random.normal(k3, (ch,), jnp.float32)
    var = jax.random.uniform(k4, (ch,), jnp.float32, 0.5, 1.5)
    return gamma, beta, mean, var


def init_params(key, in_channels, out_channels):
    c = out_channels // 4
    ks = jax.random.split(key, 8)
    p = {}
    p["w1"] = 0.2 * jax.random.normal(ks[0], (c, in_channels, 1, 1), jnp.float32)
    p["w2"] = 0.2 * jax.random.normal(ks[1], (c, c, 3, 3), jnp.float32)
    p["w3"] = 0.2 * jax.random.normal(ks[2], (out_channels, c, 1, 1), jnp.float32)
    p["wr"] = 0.2 * jax.random.normal(ks[3], (out_channels, in_channels, 1, 1),
                                      jnp.float32)
    for name, kk, ch in (("bn1", ks[4], c), ("bn2", ks[5], c),
                         ("bn3", ks[6], out_channels), ("bnr", ks[7], out_channels)):
        g, b, m, v = init_bn_params(kk, ch)
        p[f"{name}_gamma"], p[f"{name}_beta"] = g, b
        p[f"{name}_mean"], p[f"{name}_var"] = m, v
    return p


# --------------------------------- main -------------------------------------

if __name__ == "__main__":
    key = jax.random.PRNGKey(0)
    k_x, k_p, k_x3, k_p3 = jax.random.split(key, 4)

    N, Cin, H, W = 2, 16, 16, 16
    Cout = 32                      # bottleneck c = Cout // 4 = 8
    x = jax.random.normal(k_x, (N, Cin, H, W), jnp.float32)
    params = init_params(k_p, Cin, Cout)
    out_ref, x2_ref = conv_block_ref(params, x, res_conv=True)

    # 1) res_conv=True, explicit row-block tiling (2 blocks -> halo path used).
    out, x2 = conv_block_forward(params, x, res_conv=True, h_block=8)
    out, x2 = jax.block_until_ready((out, x2))
    assert out.shape == (N, Cout, H, W) and x2.shape == (N, Cout // 4, H, W)
    # bf16 MXU operands -> slightly looser tolerance vs the f32 reference.
    assert jnp.allclose(out, out_ref, rtol=5e-2, atol=5e-2), float(
        jnp.max(jnp.abs(out - out_ref)))
    assert jnp.allclose(x2, x2_ref, rtol=5e-2, atol=5e-2), float(
        jnp.max(jnp.abs(x2 - x2_ref)))

    # 2) auto row-blocking + bf16 outputs (halved HBM writeback).
    out_b, x2_b = conv_block_forward(params, x, res_conv=True,
                                     out_dtype=jnp.bfloat16)
    out_b, x2_b = jax.block_until_ready((out_b, x2_b))
    assert jnp.allclose(out_b.astype(jnp.float32), out_ref, rtol=5e-2, atol=6e-2)
    assert jnp.allclose(x2_b.astype(jnp.float32), x2_ref, rtol=5e-2, atol=6e-2)

    # 3) identity residual (Cin == Cout) and no x2 output.
    Cin3 = Cout3 = 32
    x3 = jax.random.normal(k_x3, (N, Cin3, H, W), jnp.float32)
    params3 = init_params(k_p3, Cin3, Cout3)
    out3 = conv_block_forward(params3, x3, res_conv=False, return_x_2=False,
                              h_block=8)
    out3 = jax.block_until_ready(out3)
    out3_ref, _ = conv_block_ref(params3, x3, res_conv=False)
    assert out3.shape == (N, Cout3, H, W)
    assert jnp.allclose(out3, out3_ref, rtol=5e-2, atol=5e-2), float(
        jnp.max(jnp.abs(out3 - out3_ref)))

    print("KERNEL_OK")
</pallas_src>

<mosaic_0001>
module attributes {stable_mosaic.version = 11 : i64} {
  func.func @_conv_block_kernel(%arg0: i32, %arg1: i32, %arg2: memref<1x128x128xbf16, #tpu.memory_space<vmem>>, %arg3: memref<1x1x32x128xbf16, #tpu.memory_space<vmem>>, %arg4: memref<128x128xbf16, #tpu.memory_space<vmem>>, %arg5: memref<1x128xf32, #tpu.memory_space<vmem>>, %arg6: memref<1152x128xbf16, #tpu.memory_space<vmem>>, %arg7: memref<1x128xf32, #tpu.memory_space<vmem>>, %arg8: memref<128x128xbf16, #tpu.memory_space<vmem>>, %arg9: memref<1x128xf32, #tpu.memory_space<vmem>>, %arg10: memref<128x128xbf16, #tpu.memory_space<vmem>>, %arg11: memref<1x128xf32, #tpu.memory_space<vmem>>, %arg12: memref<1x128x128xf32, #tpu.memory_space<vmem>>, %arg13: memref<1x128x128xf32, #tpu.memory_space<vmem>>, %arg14: memref<176x128xbf16, #tpu.memory_space<vmem>>, %arg15: memref<128x1152xbf16, #tpu.memory_space<vmem>>) attributes {dimension_semantics = [#tpu.dimension_semantics<parallel>, #tpu.dimension_semantics<parallel>], iteration_bounds = array<i64: 2, 2>, scalar_prefetch = 0 : i64, scratch_operands = 2 : i64, tpu.core_type = #tpu.core_type<tc>, window_params = [{transform_indices = @transform_0, window_bounds = array<i64: 1, 128, 128>}, {transform_indices = @transform_1, window_bounds = array<i64: 1, 1, 32, 128>}, {pipeline_mode = #tpu.pipeline_mode<synchronous>, transform_indices = @transform_2, window_bounds = array<i64: 128, 128>}, {pipeline_mode = #tpu.pipeline_mode<synchronous>, transform_indices = @transform_3, window_bounds = array<i64: 1, 128>}, {pipeline_mode = #tpu.pipeline_mode<synchronous>, transform_indices = @transform_4, window_bounds = array<i64: 1152, 128>}, {pipeline_mode = #tpu.pipeline_mode<synchronous>, transform_indices = @transform_5, window_bounds = array<i64: 1, 128>}, {pipeline_mode = #tpu.pipeline_mode<synchronous>, transform_indices = @transform_6, window_bounds = array<i64: 128, 128>}, {pipeline_mode = #tpu.pipeline_mode<synchronous>, transform_indices = @transform_7, window_bounds = array<i64: 1, 128>}, {pipeline_mode = #tpu.pipeline_mode<synchronous>, transform_indices = @transform_8, window_bounds = array<i64: 128, 128>}, {pipeline_mode = #tpu.pipeline_mode<synchronous>, transform_indices = @transform_9, window_bounds = array<i64: 1, 128>}, {transform_indices = @transform_10, window_bounds = array<i64: 1, 128, 128>}, {transform_indices = @transform_11, window_bounds = array<i64: 1, 128, 128>}]} {
    %c0 = arith.constant 0 : index
    %c0_0 = arith.constant 0 : index
    %c0_1 = arith.constant 0 : index
    %0 = vector.load %arg2[%c0, %c0_0, %c0_1] : memref<1x128x128xbf16, #tpu.memory_space<vmem>>, vector<1x128x128xbf16>
    %1 = vector.shape_cast %0 : vector<1x128x128xbf16> to vector<128x128xbf16>
    %c0_2 = arith.constant 0 : index
    %c0_3 = arith.constant 0 : index
    %c0_4 = arith.constant 0 : index
    %c0_5 = arith.constant 0 : index
    %2 = vector.load %arg3[%c0_2, %c0_3, %c0_4, %c0_5] : memref<1x1x32x128xbf16, #tpu.memory_space<vmem>>, vector<1x1x32x128xbf16>
    %3 = vector.shape_cast %2 : vector<1x1x32x128xbf16> to vector<32x128xbf16>
    %c0_6 = arith.constant 0 : index
    %c0_7 = arith.constant 0 : index
    %4 = vector.load %arg4[%c0_6, %c0_7] : memref<128x128xbf16, #tpu.memory_space<vmem>>, vector<128x128xbf16>
    %cst = arith.constant dense<0.000000e+00> : vector<128x128xf32>
    %5 = tpu.matmul %1, %4, %cst {dimension_numbers = #tpu.dot_dimension_numbers<[1], [0], [0], [1], [0, 0, 1, 1], [], []>} : vector<128x128xbf16>, vector<128x128xbf16>, vector<128x128xf32> -> vector<128x128xf32>
    %c0_8 = arith.constant 0 : index
    %c0_9 = arith.constant 0 : index
    %6 = vector.load %arg5[%c0_8, %c0_9] : memref<1x128xf32, #tpu.memory_space<vmem>>, vector<1x128xf32>
    %7 = vector.broadcast %6 : vector<1x128xf32> to vector<128x128xf32>
    %8 = arith.addf %5, %7 : vector<128x128xf32>
    %cst_10 = arith.constant 0.000000e+00 : f32
    %9 = vector.broadcast %cst_10 : f32 to vector<128x128xf32>
    %10 = arith.maximumf %8, %9 : vector<128x128xf32>
    %c0_11 = arith.constant 0 : index
    %c0_12 = arith.constant 0 : index
    %11 = vector.load %arg10[%c0_11, %c0_12] : memref<128x128xbf16, #tpu.memory_space<vmem>>, vector<128x128xbf16>
    %cst_13 = arith.constant dense<0.000000e+00> : vector<128x128xf32>
    %12 = tpu.matmul %1, %11, %cst_13 {dimension_numbers = #tpu.dot_dimension_numbers<[1], [0], [0], [1], [0, 0, 1, 1], [], []>} : vector<128x128xbf16>, vector<128x128xbf16>, vector<128x128xf32> -> vector<128x128xf32>
    %c0_14 = arith.constant 0 : index
    %c0_15 = arith.constant 0 : index
    %13 = vector.load %arg11[%c0_14, %c0_15] : memref<1x128xf32, #tpu.memory_space<vmem>>, vector<1x128xf32>
    %14 = vector.broadcast %13 : vector<1x128xf32> to vector<128x128xf32>
    %15 = arith.addf %12, %14 : vector<128x128xf32>
    %c0_16 = arith.constant 0 : index
    %c0_17 = arith.constant 0 : index
    %16 = vector.load %arg4[%c0_16, %c0_17] : memref<128x128xbf16, #tpu.memory_space<vmem>>, vector<128x128xbf16>
    %cst_18 = arith.constant dense<0.000000e+00> : vector<32x128xf32>
    %17 = tpu.matmul %3, %16, %cst_18 {dimension_numbers = #tpu.dot_dimension_numbers<[1], [0], [0], [1], [0, 0, 1, 1], [], []>} : vector<32x128xbf16>, vector<128x128xbf16>, vector<32x128xf32> -> vector<32x128xf32>
    %c0_19 = arith.constant 0 : index
    %c0_20 = arith.constant 0 : index
    %18 = vector.load %arg5[%c0_19, %c0_20] : memref<1x128xf32, #tpu.memory_space<vmem>>, vector<1x128xf32>
    %19 = vector.broadcast %18 : vector<1x128xf32> to vector<32x128xf32>
    %20 = arith.addf %17, %19 : vector<32x128xf32>
    %cst_21 = arith.constant 0.000000e+00 : f32
    %21 = vector.broadcast %cst_21 : f32 to vector<32x128xf32>
    %22 = arith.maximumf %20, %21 : vector<32x128xf32>
    %c0_i32 = arith.constant 0 : i32
    %23 = arith.cmpi sgt, %arg1, %c0_i32 : i32
    %24 = arith.extui %23 : i1 to i32
    %25 = arith.sitofp %24 : i32 to f32
    %c1_i32 = arith.constant 1 : i32
    %26 = arith.cmpi slt, %arg1, %c1_i32 : i32
    %27 = arith.extui %26 : i1 to i32
    %28 = arith.sitofp %27 : i32 to f32
    %cst_22 = arith.constant 0.000000e+00 : bf16
    %29 = vector.broadcast %cst_22 : bf16 to vector<8x128xbf16>
    %c0_23 = arith.constant 0 : index
    %c0_24 = arith.constant 0 : index
    %30 = vector.load %arg14[%c0_23, %c0_24] : memref<176x128xbf16, #tpu.memory_space<vmem>>, vector<8x128xbf16>
    tpu.vector_store %arg14[%c0_23, %c0_24], %29 {strides = array<i32>} : memref<176x128xbf16, #tpu.memory_space<vmem>>, vector<8x128xbf16>,
    %31 = vector.extract_strided_slice %22 {offsets = [0, 0], sizes = [16, 128], strides = [1, 1]} : vector<32x128xf32> to vector<16x128xf32>
    %32 = vector.broadcast %25 : f32 to vector<16x128xf32>
    %33 = arith.mulf %31, %32 : vector<16x128xf32>
    %34 = arith.truncf %33 : vector<16x128xf32> to vector<16x128xbf16>
    %c8 = arith.constant 8 : index
    %c0_25 = arith.constant 0 : index
    %35 = vector.load %arg14[%c8, %c0_25] : memref<176x128xbf16, #tpu.memory_space<vmem>>, vector<16x128xbf16>
    tpu.vector_store %arg14[%c8, %c0_25], %34 {strides = array<i32>} : memref<176x128xbf16, #tpu.memory_space<vmem>>, vector<16x128xbf16>,
    %36 = arith.truncf %10 : vector<128x128xf32> to vector<128x128xbf16>
    %c24 = arith.constant 24 : index
    %c0_26 = arith.constant 0 : index
    %37 = vector.load %arg14[%c24, %c0_26] : memref<176x128xbf16, #tpu.memory_space<vmem>>, vector<128x128xbf16>
    tpu.vector_store %arg14[%c24, %c0_26], %36 {strides = array<i32>} : memref<176x128xbf16, #tpu.memory_space<vmem>>, vector<128x128xbf16>,
    %38 = vector.extract_strided_slice %22 {offsets = [16, 0], sizes = [16, 128], strides = [1, 1]} : vector<32x128xf32> to vector<16x128xf32>
    %39 = vector.broadcast %28 : f32 to vector<16x128xf32>
    %40 = arith.mulf %38, %39 : vector<16x128xf32>
    %41 = arith.truncf %40 : vector<16x128xf32> to vector<16x128xbf16>
    %c152 = arith.constant 152 : index
    %c0_27 = arith.constant 0 : index
    %42 = vector.load %arg14[%c152, %c0_27] : memref<176x128xbf16, #tpu.memory_space<vmem>>, vector<16x128xbf16>
    tpu.vector_store %arg14[%c152, %c0_27], %41 {strides = array<i32>} : memref<176x128xbf16, #tpu.memory_space<vmem>>, vector<16x128xbf16>,
    %cst_28 = arith.constant 0.000000e+00 : bf16
    %43 = vector.broadcast %cst_28 : bf16 to vector<8x128xbf16>
    %c168 = arith.constant 168 : index
    %c0_29 = arith.constant 0 : index
    %44 = vector.load %arg14[%c168, %c0_29] : memref<176x128xbf16, #tpu.memory_space<vmem>>, vector<8x128xbf16>
    tpu.vector_store %arg14[%c168, %c0_29], %43 {strides = array<i32>} : memref<176x128xbf16, #tpu.memory_space<vmem>>, vector<8x128xbf16>,
    %45 = tpu.iota {dimensions = array<i32: 0>} : vector<128x128xi32>
    %c16_i32 = arith.constant 16 : i32
    %c0_i32_30 = arith.constant 0 : i32
    %46 = arith.cmpi eq, %c16_i32, %c0_i32_30 : i32
    %c1_i32_31 = arith.constant 1 : i32
    %47 = arith.select %46, %c1_i32_31, %c16_i32 : i32
    %48 = vector.broadcast %47 : i32 to vector<128x128xi32>
    %49 = arith.remsi %45, %48 : vector<128x128xi32>
    %c0_i32_32 = arith.constant 0 : i32
    %50 = vector.broadcast %c0_i32_32 : i32 to vector<128x128xi32>
    %51 = arith.cmpi ne, %49, %50 : vector<128x128xi32>
    %c0_i32_33 = arith.constant 0 : i32
    %52 = vector.broadcast %c0_i32_33 : i32 to vector<128x128xi32>
    %53 = arith.cmpi slt, %49, %52 : vector<128x128xi32>
    %c0_i32_34 = arith.constant 0 : i32
    %54 = arith.cmpi slt, %47, %c0_i32_34 : i32
    %55 = vector.broadcast %54 : i1 to vector<128x128xi1>
    %56 = vector.broadcast %55 : vector<128x128xi1> to vector<128x128xi1>
    %57 = arith.xori %53, %56 : vector<128x128xi1>
    %58 = arith.andi %57, %51 : vector<128x128xi1>
    %59 = vector.broadcast %47 : i32 to vector<128x128xi32>
    %60 = arith.addi %49, %59 : vector<128x128xi32>
    %61 = arith.select %58, %60, %49 : vector<128x128xi1>, vector<128x128xi32>
    %c0_i32_35 = arith.constant 0 : i32
    %62 = vector.broadcast %c0_i32_35 : i32 to vector<128x128xi32>
    %63 = arith.cmpi ne, %61, %62 : vector<128x128xi32>
    %c15_i32 = arith.constant 15 : i32
    %64 = vector.broadcast %c15_i32 : i32 to vector<128x128xi32>
    %65 = arith.cmpi ne, %61, %64 : vector<128x128xi32>
    %c7 = arith.constant 7 : index
    %c0_36 = arith.constant 0 : index
    %66 = vector.load %arg14[%c7, %c0_36] : memref<176x128xbf16, #tpu.memory_space<vmem>>, vector<128x128xbf16>
    %cst_37 = arith.constant 0.000000e+00 : bf16
    %67 = vector.broadcast %cst_37 : bf16 to vector<128x128xbf16>
    %68 = arith.select %63, %66, %67 : vector<128x128xi1>, vector<128x128xbf16>
    %c0_38 = arith.constant 0 : index
    %c0_39 = arith.constant 0 : index
    %69 = vector.load %arg15[%c0_38, %c0_39] : memref<128x1152xbf16, #tpu.memory_space<vmem>>, vector<128x128xbf16>
    tpu.vector_store %arg15[%c0_38, %c0_39], %68 {strides = array<i32>} : memref<128x1152xbf16, #tpu.memory_space<vmem>>, vector<128x128xbf16>,
    %c8_40 = arith.constant 8 : index
    %c0_41 = arith.constant 0 : index
    %70 = vector.load %arg14[%c8_40, %c0_41] : memref<176x128xbf16, #tpu.memory_space<vmem>>, vector<128x128xbf16>
    %c0_42 = arith.constant 0 : index
    %c128 = arith.constant 128 : index
    %71 = vector.load %arg15[%c0_42, %c128] : memref<128x1152xbf16, #tpu.memory_space<vmem>>, vector<128x128xbf16>
    tpu.vector_store %arg15[%c0_42, %c128], %70 {strides = array<i32>} : memref<128x1152xbf16, #tpu.memory_space<vmem>>, vector<128x128xbf16>,
    %c9 = arith.constant 9 : index
    %c0_43 = arith.constant 0 : index
    %72 = vector.load %arg14[%c9, %c0_43] : memref<176x128xbf16, #tpu.memory_space<vmem>>, vector<128x128xbf16>
    %cst_44 = arith.constant 0.000000e+00 : bf16
    %73 = vector.broadcast %cst_44 : bf16 to vector<128x128xbf16>
    %74 = arith.select %65, %72, %73 : vector<128x128xi1>, vector<128x128xbf16>
    %c0_45 = arith.constant 0 : index
    %c256 = arith.constant 256 : index
    %75 = vector.load %arg15[%c0_45, %c256] : memref<128x1152xbf16, #tpu.memory_space<vmem>>, vector<128x128xbf16>
    tpu.vector_store %arg15[%c0_45, %c256], %74 {strides = array<i32>} : memref<128x1152xbf16, #tpu.memory_space<vmem>>, vector<128x128xbf16>,
    %c23 = arith.constant 23 : index
    %c0_46 = arith.constant 0 : index
    %76 = vector.load %arg14[%c23, %c0_46] : memref<176x128xbf16, #tpu.memory_space<vmem>>, vector<128x128xbf16>
    %cst_47 = arith.constant 0.000000e+00 : bf16
    %77 = vector.broadcast %cst_47 : bf16 to vector<128x128xbf16>
    %78 = arith.select %63, %76, %77 : vector<128x128xi1>, vector<128x128xbf16>
    %c0_48 = arith.constant 0 : index
    %c384 = arith.constant 384 : index
    %79 = vector.load %arg15[%c0_48, %c384] : memref<128x1152xbf16, #tpu.memory_space<vmem>>, vector<128x128xbf16>
    tpu.vector_store %arg15[%c0_48, %c384], %78 {strides = array<i32>} : memref<128x1152xbf16, #tpu.memory_space<vmem>>, vector<128x128xbf16>,
    %c24_49 = arith.constant 24 : index
    %c0_50 = arith.constant 0 : index
    %80 = vector.load %arg14[%c24_49, %c0_50] : memref<176x128xbf16, #tpu.memory_space<vmem>>, vector<128x128xbf16>
    %c0_51 = arith.constant 0 : index
    %c512 = arith.constant 512 : index
    %81 = vector.load %arg15[%c0_51, %c512] : memref<128x1152xbf16, #tpu.memory_space<vmem>>, vector<128x128xbf16>
    tpu.vector_store %arg15[%c0_51, %c512], %80 {strides = array<i32>} : memref<128x1152xbf16, #tpu.memory_space<vmem>>, vector<128x128xbf16>,
    %c25 = arith.constant 25 : index
    %c0_52 = arith.constant 0 : index
    %82 = vector.load %arg14[%c25, %c0_52] : memref<176x128xbf16, #tpu.memory_space<vmem>>, vector<128x128xbf16>
    %cst_53 = arith.constant 0.000000e+00 : bf16
    %83 = vector.broadcast %cst_53 : bf16 to vector<128x128xbf16>
    %84 = arith.select %65, %82, %83 : vector<128x128xi1>, vector<128x128xbf16>
    %c0_54 = arith.constant 0 : index
    %c640 = arith.constant 640 : index
    %85 = vector.load %arg15[%c0_54, %c640] : memref<128x1152xbf16, #tpu.memory_space<vmem>>, vector<128x128xbf16>
    tpu.vector_store %arg15[%c0_54, %c640], %84 {strides = array<i32>} : memref<128x1152xbf16, #tpu.memory_space<vmem>>, vector<128x128xbf16>,
    %c39 = arith.constant 39 : index
    %c0_55 = arith.constant 0 : index
    %86 = vector.load %arg14[%c39, %c0_55] : memref<176x128xbf16, #tpu.memory_space<vmem>>, vector<128x128xbf16>
    %cst_56 = arith.constant 0.000000e+00 : bf16
    %87 = vector.broadcast %cst_56 : bf16 to vector<128x128xbf16>
    %88 = arith.select %63, %86, %87 : vector<128x128xi1>, vector<128x128xbf16>
    %c0_57 = arith.constant 0 : index
    %c768 = arith.constant 768 : index
    %89 = vector.load %arg15[%c0_57, %c768] : memref<128x1152xbf16, #tpu.memory_space<vmem>>, vector<128x128xbf16>
    tpu.vector_store %arg15[%c0_57, %c768], %88 {strides = array<i32>} : memref<128x1152xbf16, #tpu.memory_space<vmem>>, vector<128x128xbf16>,
    %c40 = arith.constant 40 : index
    %c0_58 = arith.constant 0 : index
    %90 = vector.load %arg14[%c40, %c0_58] : memref<176x128xbf16, #tpu.memory_space<vmem>>, vector<128x128xbf16>
    %c0_59 = arith.constant 0 : index
    %c896 = arith.constant 896 : index
    %91 = vector.load %arg15[%c0_59, %c896] : memref<128x1152xbf16, #tpu.memory_space<vmem>>, vector<128x128xbf16>
    tpu.vector_store %arg15[%c0_59, %c896], %90 {strides = array<i32>} : memref<128x1152xbf16, #tpu.memory_space<vmem>>, vector<128x128xbf16>,
    %c41 = arith.constant 41 : index
    %c0_60 = arith.constant 0 : index
    %92 = vector.load %arg14[%c41, %c0_60] : memref<176x128xbf16, #tpu.memory_space<vmem>>, vector<128x128xbf16>
    %cst_61 = arith.constant 0.000000e+00 : bf16
    %93 = vector.broadcast %cst_61 : bf16 to vector<128x128xbf16>
    %94 = arith.select %65, %92, %93 : vector<128x128xi1>, vector<128x128xbf16>
    %c0_62 = arith.constant 0 : index
    %c1024 = arith.constant 1024 : index
    %95 = vector.load %arg15[%c0_62, %c1024] : memref<128x1152xbf16, #tpu.memory_space<vmem>>, vector<128x128xbf16>
    tpu.vector_store %arg15[%c0_62, %c1024], %94 {strides = array<i32>} : memref<128x1152xbf16, #tpu.memory_space<vmem>>, vector<128x128xbf16>,
    %c0_63 = arith.constant 0 : index
    %c0_64 = arith.constant 0 : index
    %96 = vector.load %arg15[%c0_63, %c0_64] : memref<128x1152xbf16, #tpu.memory_space<vmem>>, vector<128x1152xbf16>
    %c0_65 = arith.constant 0 : index
    %c0_66 = arith.constant 0 : index
    %97 = vector.load %arg6[%c0_65, %c0_66] : memref<1152x128xbf16, #tpu.memory_space<vmem>>, vector<1152x128xbf16>
    %cst_67 = arith.constant dense<0.000000e+00> : vector<128x128xf32>
    %98 = tpu.matmul %96, %97, %cst_67 {dimension_numbers = #tpu.dot_dimension_numbers<[1], [0], [0], [1], [0, 0, 1, 1], [], []>} : vector<128x1152xbf16>, vector<1152x128xbf16>, vector<128x128xf32> -> vector<128x128xf32>
    %c0_68 = arith.constant 0 : index
    %c0_69 = arith.constant 0 : index
    %99 = vector.load %arg7[%c0_68, %c0_69] : memref<1x128xf32, #tpu.memory_space<vmem>>, vector<1x128xf32>
    %100 = vector.broadcast %99 : vector<1x128xf32> to vector<128x128xf32>
    %101 = arith.addf %98, %100 : vector<128x128xf32>
    %cst_70 = arith.constant 0.000000e+00 : f32
    %102 = vector.broadcast %cst_70 : f32 to vector<128x128xf32>
    %103 = arith.maximumf %101, %102 : vector<128x128xf32>
    %c0_71 = arith.constant 0 : index
    %c0_72 = arith.constant 0 : index
    %c0_73 = arith.constant 0 : index
    %104 = vector.load %arg13[%c0_71, %c0_72, %c0_73] : memref<1x128x128xf32, #tpu.memory_space<vmem>>, vector<1x128x128xf32>
    %105 = vector.shape_cast %104 : vector<1x128x128xf32> to vector<128x128xf32>
    %106 = vector.shape_cast %103 : vector<128x128xf32> to vector<1x128x128xf32>
    tpu.vector_store %arg13[%c0_71, %c0_72, %c0_73], %106 {strides = array<i32>} : memref<1x128x128xf32, #tpu.memory_space<vmem>>, vector<1x128x128xf32>,
    %107 = arith.truncf %103 : vector<128x128xf32> to vector<128x128xbf16>
    %c0_74 = arith.constant 0 : index
    %c0_75 = arith.constant 0 : index
    %108 = vector.load %arg8[%c0_74, %c0_75] : memref<128x128xbf16, #tpu.memory_space<vmem>>, vector<128x128xbf16>
    %cst_76 = arith.constant dense<0.000000e+00> : vector<128x128xf32>
    %109 = tpu.matmul %107, %108, %cst_76 {dimension_numbers = #tpu.dot_dimension_numbers<[1], [0], [0], [1], [0, 0, 1, 1], [], []>} : vector<128x128xbf16>, vector<128x128xbf16>, vector<128x128xf32> -> vector<128x128xf32>
    %c0_77 = arith.constant 0 : index
    %c0_78 = arith.constant 0 : index
    %110 = vector.load %arg9[%c0_77, %c0_78] : memref<1x128xf32, #tpu.memory_space<vmem>>, vector<1x128xf32>
    %111 = vector.broadcast %110 : vector<1x128xf32> to vector<128x128xf32>
    %112 = arith.addf %109, %111 : vector<128x128xf32>
    %113 = arith.addf %112, %15 : vector<128x128xf32>
    %cst_79 = arith.constant 0.000000e+00 : f32
    %114 = vector.broadcast %cst_79 : f32 to vector<128x128xf32>
    %115 = arith.maximumf %113, %114 : vector<128x128xf32>
    %c0_80 = arith.constant 0 : index
    %c0_81 = arith.constant 0 : index
    %c0_82 = arith.constant 0 : index
    %116 = vector.load %arg12[%c0_80, %c0_81, %c0_82] : memref<1x128x128xf32, #tpu.memory_space<vmem>>, vector<1x128x128xf32>
    %117 = vector.shape_cast %116 : vector<1x128x128xf32> to vector<128x128xf32>
    %118 = vector.shape_cast %115 : vector<128x128xf32> to vector<1x128x128xf32>
    tpu.vector_store %arg12[%c0_80, %c0_81, %c0_82], %118 {strides = array<i32>} : memref<1x128x128xf32, #tpu.memory_space<vmem>>, vector<1x128x128xf32>,
    return
  }
  func.func @transform_0(%arg0: i32, %arg1: i32) -> (i32, i32, i32) {
    %c0_i32 = arith.constant 0 : i32
    %c0_i32_0 = arith.constant 0 : i32
    return %arg0, %arg1, %c0_i32 : i32, i32, i32
  }
  func.func @transform_1(%arg0: i32, %arg1: i32) -> (i32, i32, i32, i32) {
    %c0_i32 = arith.constant 0 : i32
    %c0_i32_0 = arith.constant 0 : i32
    %c0_i32_1 = arith.constant 0 : i32
    return %arg0, %arg1, %c0_i32, %c0_i32_0 : i32, i32, i32, i32
  }
  func.func @transform_2(%arg0: i32, %arg1: i32) -> (i32, i32) {
    %c0_i32 = arith.constant 0 : i32
    %c0_i32_0 = arith.constant 0 : i32
    %c0_i32_1 = arith.constant 0 : i32
    return %c0_i32, %c0_i32_0 : i32, i32
  }
  func.func @transform_3(%arg0: i32, %arg1: i32) -> (i32, i32) {
    %c0_i32 = arith.constant 0 : i32
    %c0_i32_0 = arith.constant 0 : i32
    %c0_i32_1 = arith.constant 0 : i32
    return %c0_i32, %c0_i32_0 : i32, i32
  }
  func.func @transform_4(%arg0: i32, %arg1: i32) -> (i32, i32) {
    %c0_i32 = arith.constant 0 : i32
    %c0_i32_0 = arith.constant 0 : i32
    %c0_i32_1 = arith.constant 0 : i32
    return %c0_i32, %c0_i32_0 : i32, i32
  }
  func.func @transform_5(%arg0: i32, %arg1: i32) -> (i32, i32) {
    %c0_i32 = arith.constant 0 : i32
    %c0_i32_0 = arith.constant 0 : i32
    %c0_i32_1 = arith.constant 0 : i32
    return %c0_i32, %c0_i32_0 : i32, i32
  }
  func.func @transform_6(%arg0: i32, %arg1: i32) -> (i32, i32) {
    %c0_i32 = arith.constant 0 : i32
    %c0_i32_0 = arith.constant 0 : i32
    %c0_i32_1 = arith.constant 0 : i32
    return %c0_i32, %c0_i32_0 : i32, i32
  }
  func.func @transform_7(%arg0: i32, %arg1: i32) -> (i32, i32) {
    %c0_i32 = arith.constant 0 : i32
    %c0_i32_0 = arith.constant 0 : i32
    %c0_i32_1 = arith.constant 0 : i32
    return %c0_i32, %c0_i32_0 : i32, i32
  }
  func.func @transform_8(%arg0: i32, %arg1: i32) -> (i32, i32) {
    %c0_i32 = arith.constant 0 : i32
    %c0_i32_0 = arith.constant 0 : i32
    %c0_i32_1 = arith.constant 0 : i32
    return %c0_i32, %c0_i32_0 : i32, i32
  }
  func.func @transform_9(%arg0: i32, %arg1: i32) -> (i32, i32) {
    %c0_i32 = arith.constant 0 : i32
    %c0_i32_0 = arith.constant 0 : i32
    %c0_i32_1 = arith.constant 0 : i32
    return %c0_i32, %c0_i32_0 : i32, i32
  }
  func.func @transform_10(%arg0: i32, %arg1: i32) -> (i32, i32, i32) {
    %c0_i32 = arith.constant 0 : i32
    %c0_i32_0 = arith.constant 0 : i32
    return %arg0, %arg1, %c0_i32 : i32, i32, i32
  }
  func.func @transform_11(%arg0: i32, %arg1: i32) -> (i32, i32, i32) {
    %c0_i32 = arith.constant 0 : i32
    %c0_i32_0 = arith.constant 0 : i32
    return %arg0, %arg1, %c0_i32 : i32, i32, i32
  }
}

</mosaic_0001>

<bundles_post_ra>
// kernel: tpu_custom_call.1
= control target key start
LH: loop header
LB: loop body
LE: loop exit
PB: predicated region body
PF: predicated region fallthrough
CT: control target
= control target key end

     0   :  { %s6865_s0 = inlined_call_operand.hbm [shape: bf16[2,256,128], index: 0, kind: input, shape index: {}]   ;;  %s6866_s1 = inlined_call_operand.hbm [shape: bf16[2,2,32,128], index: 1, kind: input, shape index: {}]   ;;  %s6867_s2 = inlined_call_operand.hbm [shape: bf16[128,128], index: 2, kind: input, shape index: {}]   ;;  %s6868_s3 = inlined_call_operand.vmem [shape: f32[1,128], index: 3, kind: input, shape index: {}]   ;;  %s6869_s4 = inlined_call_operand.hbm [shape: bf16[1152,128], index: 4, kind: input, shape index: {}]   ;;  %s6870_s5 = inlined_call_operand.vmem [shape: f32[1,128], index: 5, kind: input, shape index: {}]   ;;  %s6871_s6 = inlined_call_operand.hbm [shape: bf16[128,128], index: 6, kind: input, shape index: {}]   ;;  %s6872_s7 = inlined_call_operand.vmem [shape: f32[1,128], index: 7, kind: input, shape index: {}]   ;;  %s6873_s8 = inlined_call_operand.hbm [shape: bf16[128,128], index: 8, kind: input, shape index: {}]   ;;  %s6874_s9 = inlined_call_operand.vmem [shape: f32[1,128], index: 9, kind: input, shape index: {}]   ;;  %s6875_s10 = inlined_call_operand.hbm [shape: f32[2,256,128], index: 10, kind: output, shape index: {0}]   ;;  %s6876_s11 = inlined_call_operand.hbm [shape: f32[2,256,128], index: 11, kind: output, shape index: {1}]  }
   0x1   :  { %6902 = sst [smem:[#allocation32_spill]] %s6865_s0 }
   0x2   :  { %6903 = sst [smem:[#allocation33_spill]] %s6867_s2 }
   0x3   :  { %6904 = sst [smem:[#allocation34_spill]] %s6868_s3 }
   0x4   :  { %6905 = sst [smem:[#allocation35_spill]] %s6869_s4 }
   0x5   :  { %6906 = sst [smem:[#allocation36_spill]] %s6870_s5 }
   0x6   :  { %6907 = sst [smem:[#allocation37_spill]] %s6871_s6 }
   0x7   :  { %6908 = sst [smem:[#allocation38_spill]] %s6872_s7 }
   0x8   :  { %6909 = sst [smem:[#allocation39_spill]] %s6873_s8 }
   0x9   :  { %6910 = sst [smem:[#allocation40_spill]] %s6874_s9 }
   0xa   :  { %6911 = sst [smem:[#allocation41_spill]] %s6875_s10 }
   0xb   :  { %6912 = sst [smem:[#allocation42_spill]] %s6876_s11 }
   0xc   :  { %17 = vsyncpa [#allocation5], 0 }
   0xd   :  { %19 = vsyncpa [#allocation5 + $0x1], 0 }
   0xe   :  { %20 = vsyncpa [#allocation8], 0 }
   0xf   :  { %22 = vsyncpa [#allocation8 + $0x1], 0 }
  0x10   :  { %23 = vsyncpa [#allocation11], 0 }
  0x11   :  { %24 = vsyncpa [#allocation14], 0 }
  0x12   :  { %25 = vsyncpa [#allocation6], 0 }
  0x13   :  { %27 = vsyncpa [#allocation6 + $0x1], 0 }
  0x14   :  { %28 = vsyncpa [#allocation17], 0 }
  0x15   :  { %30 = vsyncpa [#allocation17 + $0x1], 0  ;;  %s5419_s17 = smov 0   ;;  %s5421_s18 = smov 0  }
  0x16   :  { %s5423_s19 = smov 0   ;;  %s5425_s20 = smov 0  }
  0x17   :  { %s5427_s21 = smov 0   ;;  %s5429_s22 = smov 0  }
  0x18   :  { %s5431_s23 = smov 0   ;;  %s5433_s24 = smov 0  }
  0x19 LB: > { %6913 = sst [smem:[#allocation25_spill]] %s5315_s17  ;;  %s5460_s25 = sadd.s32 4294967295, %s5343_s24   ;;  %s5343_s24 = sphi %s5433_s24, %s36_s24   ;;  %s5339_s23 = sphi %s5431_s23, %s7011_s23   ;;  %s5335_s22 = sphi %s5429_s22, %s7010_s22   ;;  %s5331_s21 = sphi %s5427_s21, %s7009_s21   ;;  %s5327_s20 = sphi %s5425_s20, %s7008_s20   ;;  %s5323_s19 = sphi %s5423_s19, %s7007_s19   ;;  %s5319_s18 = sphi %s5421_s18, %s7006_s18   ;;  %s5315_s17 = sphi %s5419_s17, %s7005_s17  }
  0x1a   : > { %6914 = sst [smem:[#allocation26_spill]] %s5331_s21  ;;  %s4082_s26 = sadd.s32 4294967294, %s5343_s24  }
  0x1b   : > { %p70_p0 = scmp.ne.s32.totalorder %s5319_s18, %s5315_s17  ;;  %p6880_p1 = scmp.eq.s32.totalorder %s5460_s25, 0 }
  0x1c   : > { %p298_p3 = scmp.eq.s32.totalorder %s4082_s26, 3  ;;  %p4083_p5 = scmp.ge.s32.totalorder %s5343_s24, 1 }
  0x1d   : > { %p5469_p4 = por %p6880_p1, %p70_p0  ;;  %p333_p7 = scmp.lt.s32.totalorder %s5343_s24, 5 }
  0x1e   : > { %p5474_p6 = por %p298_p3, %p70_p0  ;;  %s5345_s30 = smov [#allocation9]  }
  0x1f   : > { %s6915_s27 = scalar_select %p5469_p4, 1, 0 }
  0x20   : > { %s6916_s28 = scalar_select %p5474_p6, 1, 0 }
  0x21   : > { %p5479_p8 = pnand %p4083_p5, %p333_p7  ;;  %s345_s12 = sshll.u32 %s5345_s30, 4  ;;  %s5483_s12 = int_to_ptr.vmem [resolvable:$true] %s345_s12 }
  0x22   : > { %6917 = sst [smem:[#allocation27_spill]] %s6916_s28  ;;  %s5346_s14 = smov [#allocation10]  }
  0x23   : > { %s6918_s29 = scalar_select %p5479_p8, 1, 0 }
  0x24   : > { %p4808_p9 = pneg %p5479_p8  ;;  %s361_s15 = sshll.u32 %s5346_s14, 4  ;;  %s5493_s15 = int_to_ptr.vmem [resolvable:$true] %s361_s15 }
  0x25   : > { %s5347_s16 = smov [#allocation12]   ;;  %s6920_s2 = sld [smem:[#allocation33_spill]] }
  0x26   : > { %p5489_p10 = pnand %p4808_p9, %p6880_p1  ;;  %s5495_s26 = sshll.u32 %s5347_s16, 4  ;;  %s378_s26 = int_to_ptr.vmem [resolvable:$true] %s5495_s26 }
  0x28   : > { %p5505_p12 = pneg %p5489_p10 }
  0x2b   : > { %s5025_s30 = scalar_lea.hbm %s6920_s2, 1024 }
  0x2c   : > { %p5026_p11 = scmp.ne.s32.totalorder %s6920_s2, %s5025_s30  ;;  %p5032_p3 = scmp.lt.u32.totalorder %s5025_s30, %s6920_s2 }
  0x2e   : > { %p5028_p13 = pnand %p5505_p12, %p5026_p11 }
  0x30   : > { %p5029_p0 = pneg %p5028_p13 }
  0x32   : > { %p5034_p5 = pnand %p5032_p3, %p5029_p0 }
  0x34   : > { %5037 = shalt.err (!%p5034_p5)
}
  0x35   : > { %s5038_s7 = scalar_lea.vmem %s5483_s12, 1024  ;;  %p5046_p2 = scmp.lt.s32.totalorder %s5483_s12, %s5483_s12 }
  0x36   : > { %p5039_p7 = scmp.ne.s32.totalorder %s5483_s12, %s5038_s7  ;;  %p5047_p6 = scmp.lt.s32.totalorder %s5038_s7, %s5038_s7 }
  0x38   : > { %p5041_p9 = pnand %p5039_p7, %p5505_p12  ;;  %p5048_p11 = por %p5047_p6, %p5046_p2 }
  0x3a   : > { %p5042_p1 = pneg %p5041_p9 }
  0x3c   : > { %p5049_p13 = pnand %p5048_p11, %p5042_p1 }
  0x3e   : > { %5052 = shalt.err (!%p5049_p13)
}
  0x3f   : > { %s6884_s10 = smov 64   ;;  %s6886_s17 = smov 4  }
  0x40   : > { %4811 = dma.hbm_to_vmem [thread:$0]  (!%p5489_p10), %s6920_s2, 1024, %s5483_s12, [#allocation8], %s6884_s10, %s6884_s10, %s6886_s17  }
  0x41   : > { %s6922_s4 = sld [smem:[#allocation35_spill]] }
  0x47   : > { %s5053_s7 = scalar_lea.hbm %s6922_s4, 9216 }
  0x48   : > { %p5054_p1 = scmp.ne.s32.totalorder %s6922_s4, %s5053_s7  ;;  %p5060_p0 = scmp.lt.u32.totalorder %s5053_s7, %s6922_s4 }
  0x4a   : > { %p5056_p2 = pnand %p5054_p1, %p5505_p12 }
  0x4c   : > { %p5057_p6 = pneg %p5056_p2 }
  0x4e   : > { %p5062_p3 = pnand %p5060_p0, %p5057_p6 }
  0x50   : > { %5065 = shalt.err (!%p5062_p3)
}
  0x51   : > { %s5066_s12 = scalar_lea.vmem %s5493_s15, 9216  ;;  %p5074_p11 = scmp.lt.s32.totalorder %s5493_s15, %s5493_s15 }
  0x52   : > { %p5067_p5 = scmp.ne.s32.totalorder %s5493_s15, %s5066_s12  ;;  %p5075_p13 = scmp.lt.s32.totalorder %s5066_s12, %s5066_s12 }
  0x54   : > { %p5069_p7 = pnand %p5067_p5, %p5505_p12  ;;  %p5076_p1 = por %p5075_p13, %p5074_p11 }
  0x56   : > { %p5070_p9 = pneg %p5069_p7 }
  0x58   : > { %p5077_p2 = pnand %p5076_p1, %p5070_p9 }
  0x5a   : > { %5080 = shalt.err (!%p5077_p2)
}
  0x5b   : > { %4814 = dma.hbm_to_vmem [thread:$0]  (!%p5489_p10), %s6922_s4, 9216, %s5493_s15, [#allocation11], %s6884_s10, %s6884_s10, %s6886_s17  }
  0x5c   : > { %s6923_s6 = sld [smem:[#allocation37_spill]] }
  0x62   : > { %s5081_s28 = scalar_lea.hbm %s6923_s6, 1024 }
  0x63   : > { %p5082_p6 = scmp.ne.s32.totalorder %s6923_s6, %s5081_s28  ;;  %p5088_p5 = scmp.lt.u32.totalorder %s5081_s28, %s6923_s6 }
  0x65   : > { %p5084_p0 = pnand %p5082_p6, %p5505_p12 }
  0x67   : > { %p5085_p3 = pneg %p5084_p0 }
  0x69   : > { %p5090_p7 = pnand %p5088_p5, %p5085_p3 }
  0x6b   : > { %5093 = shalt.err (!%p5090_p7)
}
  0x6c   : > { %s5094_s12 = scalar_lea.vmem %s378_s26, 1024  ;;  %p5102_p1 = scmp.lt.s32.totalorder %s378_s26, %s378_s26 }
  0x6d   : > { %p5095_p9 = scmp.ne.s32.totalorder %s378_s26, %s5094_s12  ;;  %p5103_p2 = scmp.lt.s32.totalorder %s5094_s12, %s5094_s12 }
  0x6f   : > { %p5097_p11 = pnand %p5095_p9, %p5505_p12  ;;  %p5104_p4 = por %p5103_p2, %p5102_p1 }
  0x71   : > { %p5098_p13 = pneg %p5097_p11 }
  0x73   : > { %p5105_p8 = pnand %p5104_p4, %p5098_p13 }
  0x75   : > { %5108 = shalt.err (!%p5105_p8)
}
  0x76   : > { %4817 = dma.hbm_to_vmem [thread:$0]  (!%p5489_p10), %s6923_s6, 1024, %s378_s26, [#allocation11], %s6884_s10, %s6884_s10, %s6886_s17  }
  0x77   : > { %s5350_s5 = smov [#allocation13]   ;;  %s6924_s8 = sld [smem:[#allocation39_spill]] }
  0x78   : > { %s393_s11 = sshll.u32 %s5350_s5, 4  ;;  %s394_s11 = int_to_ptr.vmem [resolvable:$true] %s393_s11 }
  0x7d   : > { %s5109_s30 = scalar_lea.hbm %s6924_s8, 1024 }
  0x7e   : > { %p5110_p4 = scmp.ne.s32.totalorder %s6924_s8, %s5109_s30  ;;  %p5116_p0 = scmp.lt.u32.totalorder %s5109_s30, %s6924_s8 }
  0x80   : > { %p5112_p8 = pnand %p5110_p4, %p5505_p12 }
  0x82   : > { %p5113_p6 = pneg %p5112_p8 }
  0x84   : > { %p5118_p3 = pnand %p5116_p0, %p5113_p6 }
  0x86   : > { %5121 = shalt.err (!%p5118_p3)
}
  0x87   : > { %s5122_s26 = scalar_lea.vmem %s394_s11, 1024  ;;  %p5130_p11 = scmp.lt.s32.totalorder %s394_s11, %s394_s11 }
  0x88   : > { %p5123_p5 = scmp.ne.s32.totalorder %s394_s11, %s5122_s26  ;;  %p5131_p13 = scmp.lt.s32.totalorder %s5122_s26, %s5122_s26 }
  0x8a   : > { %p5125_p7 = pnand %p5123_p5, %p5505_p12  ;;  %p5132_p1 = por %p5131_p13, %p5130_p11 }
  0x8c   : > { %p5126_p9 = pneg %p5125_p7 }
  0x8e   : > { %p5133_p2 = pnand %p5132_p1, %p5126_p9 }
  0x90   : > { %5136 = shalt.err (!%p5133_p2)
}
  0x91   : > { %4820 = dma.hbm_to_vmem [thread:$0]  (!%p5489_p10), %s6924_s8, 1024, %s394_s11, [#allocation14], %s6884_s10, %s6884_s10, %s6886_s17  }
  0x92   : > { %s45_s9 = sadd.s32 1, %s5335_s22  ;;  %s48_s13 = sadd.s32 1, %s5339_s23 }
  0x93   : > { %p46_p12 = scmp.ge.s32.totalorder %s45_s9, 2  ;;  %s57_s5 = sadd.s32 1, %s5323_s19 }
  0x94   : > { %p64_p4 = scmp.ne.s32.totalorder %s5323_s19, %s5319_s18  ;;  %p65_p8 = scmp.eq.s32.totalorder %s5343_s24, 0 }
  0x95   : > { %s7013_s9 = smov (%p46_p12, %s45_s9), 0  ;;  %s7015_s13 = smov (!%p46_p12, %s48_s13), %s5339_s23 }
  0x96   : > { %s53_s21 = ssub.s32 %s5335_s22, %s7013_s9  ;;  %p5609_p6 = por %p65_p8, %p64_p4 }
  0x97   : > { %p50_p10 = scmp.ge.s32.totalorder %s7015_s13, 2  ;;  %p6926_p0 = scmp.eq.s32.totalorder %s5460_s25, 3 }
  0x98   : > { %p4839_p5 = scmp.lt.s32.totalorder %s5343_s24, 4  ;;  %s5621_s30 = sand.u32 1, %s5323_s19  }
  0x99   : > { %p5615_p3 = por %p6926_p0, %p64_p4  ;;  %s7017_s13 = smov (%p50_p10, %s7015_s13), 0 }
  0x9a   : > { %6928 = sst [smem:[#allocation28_spill]] %s7017_s13  ;;  %s4089_s14 = sshll.u32 %s5621_s30, 6 }
  0x9b   : > { %s52_s16 = ssub.s32 %s5339_s23, %s7017_s13  ;;  %s4090_s12 = sshll.u32 %s5335_s22, 4 }
  0x9c   : > { %s54_s7 = sor.u32 %s53_s21, %s52_s16  ;;  %s4091_s26 = sshll.u32 %s5339_s23, 5 }
  0x9d   : > { %p55_p7 = scmp.eq.s32.totalorder %s54_s7, 0  ;;  %s420_s15 = sadd.s32 %s4091_s26, %s4090_s12 }
  0x9e   : > { %s414_s3 = scalar_lea.vmem [#allocation4], %s4089_s14  ;;  %s4092_s2 = sshll.u32 %s420_s15, 6 }
  0x9f   : > { %s423_s10 = sshll.u32 %s414_s3, 4  ;;  %s6929_s0 = sld [smem:[#allocation32_spill]]  ;;  %s5633_s10 = int_to_ptr.vmem [resolvable:$true] %s423_s10 }
  0xa0   : > { %s5631_s17 = scalar_select %p55_p7, %s5323_s19, %s57_s5  }
  0xa1   : > { %p5644_p9 = pnand %p4839_p5, %p5609_p6  ;;  %s4093_s14 = sshll.u32 %s5621_s30, 4 }
  0xa2   : > { %s411_s16 = scalar_lea.sflag [#allocation5], %s5621_s30 }
  0xa3   : > { %p5139_p13 = pneg %p5644_p9 }
  0xa5   : > { %s5638_s8 = scalar_lea.hbm %s6929_s0, %s4092_s2  ;;  %s5142_s6 = scalar_lea.hbm %s6929_s0, 4096 }
  0xa6   : > { %s5137_s7 = scalar_lea.hbm %s5638_s8, 1024  ;;  %p5143_p12 = scmp.lt.u32.totalorder %s5638_s8, %s6929_s0 }
  0xa7   : > { %p5138_p11 = scmp.ne.s32.totalorder %s5638_s8, %s5137_s7  ;;  %p5144_p4 = scmp.lt.u32.totalorder %s5142_s6, %s5137_s7 }
  0xa8   : > { %p5146_p6 = scmp.lt.u32.totalorder %s5137_s7, %s5638_s8 }
  0xa9   : > { %p5140_p1 = pnand %p5139_p13, %p5138_p11  ;;  %p5145_p8 = por %p5144_p4, %p5143_p12 }
  0xab   : > { %p5141_p2 = pneg %p5140_p1  ;;  %p5147_p10 = por %p5146_p6, %p5145_p8 }
  0xad   : > { %p5148_p0 = pnand %p5147_p10, %p5141_p2 }
  0xaf   : > { %5151 = shalt.err (!%p5148_p0)
}
  0xb0   : > { %s5152_s26 = scalar_lea.vmem %s5633_s10, 1024  ;;  %s5351_s15 = smov [#allocation4]  }
  0xb1   : > { %p5153_p5 = scmp.ne.s32.totalorder %s5633_s10, %s5152_s26  ;;  %s5157_s3 = sshll.u32 %s5351_s15, 4  ;;  %s5158_s3 = int_to_ptr.vmem [resolvable:$false] %s5157_s3 }
  0xb2   : > { %s5159_s2 = scalar_lea.vmem %s5158_s3, 2048  ;;  %p5160_p1 = scmp.lt.s32.totalorder %s5633_s10, %s5158_s3 }
  0xb3   : > { %p5155_p7 = pnand %p5153_p5, %p5139_p13  ;;  %p5161_p12 = scmp.lt.s32.totalorder %s5159_s2, %s5152_s26 }
  0xb5   : > { %p5156_p11 = pneg %p5155_p7  ;;  %p5162_p4 = por %p5161_p12, %p5160_p1 }
  0xb7   : > { %p5163_p8 = pnand %p5162_p4, %p5156_p11 }
  0xb9   : > { %5166 = shalt.err (!%p5163_p8)
}
  0xba   : > { %s6931_s7 = smov 4   ;;  %s6932_s4 = smov 64  }
  0xbb   : > { %4824 = dma.hbm_to_vmem [thread:$0]  (!%p5644_p9), %s5638_s8, 1024, %s5633_s10, %s411_s16, %s6932_s4, %s6932_s4, %s6931_s7  }
  0xbc   : > { %s4094_s6 = sshll.u32 %s5335_s22, 2  ;;  %s4095_s28 = sshll.u32 %s5339_s23, 3 }
  0xbd   : > { %s437_s12 = scalar_lea.vmem [#allocation7], %s4093_s14  ;;  %s443_s15 = sadd.s32 %s4095_s28, %s4094_s6 }
  0xbe   : > { %s446_s26 = sshll.u32 %s437_s12, 4  ;;  %s4096_s3 = sshll.u32 %s443_s15, 6  ;;  %s5685_s26 = int_to_ptr.vmem [resolvable:$true] %s446_s26 }
  0xbf   : > { %s5690_s0 = scalar_lea.hbm %s6866_s1, %s4096_s3  ;;  %s6933_s13 = sand.u32 1, %s5343_s24  }
  0xc0   : > { %s5694_s8 = scalar_lea.sflag [#allocation8], %s6933_s13  ;;  %s5167_s10 = scalar_lea.hbm %s5690_s0, 256 }
  0xc1   : > { %p5168_p2 = scmp.ne.s32.totalorder %s5690_s0, %s5167_s10  ;;  %s5172_s16 = scalar_lea.hbm %s6866_s1, 1024 }
  0xc2   : > { %p5173_p0 = scmp.lt.u32.totalorder %s5690_s0, %s6866_s1  ;;  %p5174_p5 = scmp.lt.u32.totalorder %s5172_s16, %s5167_s10 }
  0xc3   : > { %p5170_p6 = pnand %p5168_p2, %p5139_p13  ;;  %p5176_p11 = scmp.lt.u32.totalorder %s5167_s10, %s5690_s0 }
  0xc4   : > { %p5175_p7 = por %p5174_p5, %p5173_p0 }
  0xc5   : > { %p5171_p10 = pneg %p5170_p6 }
  0xc6   : > { %p5177_p1 = por %p5176_p11, %p5175_p7 }
  0xc8   : > { %p5178_p12 = pnand %p5177_p1, %p5171_p10 }
  0xca   : > { %5181 = shalt.err (!%p5178_p12)
}
  0xcb   : > { %s5182_s13 = scalar_lea.vmem %s5685_s26, 256  ;;  %s5352_s28 = smov [#allocation7]  }
  0xcc   : > { %p5183_p4 = scmp.ne.s32.totalorder %s5685_s26, %s5182_s13  ;;  %s5187_s12 = sshll.u32 %s5352_s28, 4  ;;  %s5188_s12 = int_to_ptr.vmem [resolvable:$false] %s5187_s12 }
  0xcd   : > { %s5189_s15 = scalar_lea.vmem %s5188_s12, 512  ;;  %p5190_p6 = scmp.lt.s32.totalorder %s5685_s26, %s5188_s12 }
  0xce   : > { %p5185_p8 = pnand %p5183_p4, %p5139_p13  ;;  %p5191_p0 = scmp.lt.s32.totalorder %s5189_s15, %s5182_s13 }
  0xd0   : > { %p5186_p2 = pneg %p5185_p8  ;;  %p5192_p5 = por %p5191_p0, %p5190_p6 }
  0xd2   : > { %p5193_p7 = pnand %p5192_p5, %p5186_p2 }
  0xd4   : > { %5196 = shalt.err (!%p5193_p7)
}
  0xd5   : > { %4827 = dma.hbm_to_vmem [thread:$0]  (!%p5644_p9), %s5690_s0, 256, %s5685_s26, %s5694_s8, %s6932_s4, %s6932_s4, %s6931_s7  }
  0xd6   : > { %p6934_p13 = scmp.ne.s32.totalorder %s6918_s29, 0 }
  0xd8   : > { %458 = sbr.rel (%p6934_p13) target bundleno = 1153 (0x481), region = 60 }
  0xdf   : > { %s5726_s3 = sand.u32 1, %s5319_s18   ;;  %p6935_p10 = scmp.ne.s32.totalorder %s6915_s27, 0 }
  0xe0   : > { %s4098_s2 = sshll.u32 %s5726_s3, 6  ;;  %s461_s10 = scalar_lea.sflag [#allocation5], %s5726_s3 }
  0xe1   : > { %s5730_s30 = scalar_lea.vmem [#allocation4], %s4098_s2 }
  0xe2   : > { %5286 = dma.done.wait (%p6935_p10), %s461_s10, 1024  }
  0xe3   : > { %5288 = vsyncadd (%p6935_p10), %s461_s10, 4294966272  ;;  %s469_s0 = sand.u32 1, %s5460_s25   ;;  %s4099_s29 = sshll.u32 %s5726_s3, 4 }
  0xe4   : > { %s470_s21 = scalar_lea.sflag [#allocation8], %s469_s0  ;;  %s5738_s7 = scalar_lea.vmem [#allocation7], %s4099_s29 }
  0xe5   : > { %5290 = dma.done.wait (%p6935_p10), %s470_s21, 256  }
  0xe6   : > { %5292 = vsyncadd (%p6935_p10), %s470_s21, 4294967040  ;;  %p6936_p9 = scmp.eq.s32.totalorder %s5460_s25, 0 }
  0xe8   : > { %5294 = dma.done.wait (%p6936_p9), [#allocation8], 1024   ;;  %p6937_p11 = pmov %p6936_p9 }
  0xe9   : > { %p6938_p1 = pmov %p6936_p9 }
  0xea   : > { %5296 = vsyncadd (%p6937_p11), [#allocation8], 4294966272 }
  0xeb   : > { %5298 = dma.done.wait (%p6938_p1), [#allocation11], 10240   ;;  %p6939_p12 = pmov %p6938_p1 }
  0xec   : > { %p6940_p4 = pmov %p6938_p1 }
  0xed   : > { %5300 = vsyncadd (%p6939_p12), [#allocation11], 4294957056 }
  0xee   : > { %5302 = dma.done.wait (%p6940_p4), [#allocation14], 1024   ;;  %p6941_p8 = pmov %p6938_p1 }
  0xef   : > { %v4919_v0 = vld [vmem:[#allocation9] sm:$0xff]   ;;  %v4920_v1 = vld [vmem:[#allocation9 + $0x8] sm:$0xff]   ;;  %v4921_v2 = vld [vmem:[#allocation9 + $0x10] sm:$0xff]   ;;  %v6891_v21 = vmov 0   ;;  %v1105_v60 = vlaneseq  ;;  %vm5354_vm3 = vmmov 1   ;;  %p1032_p2 = scmp.lt.s32.totalorder %s5327_s20, 1 }
  0xf0   : > { %5304 = vsyncadd (%p6941_p8), [#allocation14], 4294966272  ;;  %4572 = vmatprep.subr.bf16.mxu0 %v4919_v0  ;;  %v4922_v3 = vld [vmem:[#allocation9 + $0x18] sm:$0xff]   ;;  %v4927_v4 = vld [vmem:[%s5730_s30] sm:$0xff]   ;;  %1035 = vst [vmem:[#allocation2] sm:$0xf] %v6891_v21 }
  0xf1   : > { %4573 = vmatpush3.bf16.msra.mxu0 %v4919_v0  ;;  %4588 = vmatprep.mubr.bf16.mxu0 %v4927_v4  ;;  %v4923_v5 = vld [vmem:[#allocation9 + $0x20] sm:$0xff]   ;;  %v4924_v6 = vld [vmem:[#allocation9 + $0x28] sm:$0xff]   ;;  %v4925_v7 = vld [vmem:[#allocation9 + $0x30] sm:$0xff]   ;;  %1104 = vst [vmem:[#allocation2 + $0x50] sm:$0xf0] %v6891_v21  ;;  %v5788_v61 = vshrl.u32 %v1105_v60, 7 }
  0xf2   : > { %4574 = vmatprep.subr.bf16.mxu0 %v4920_v1  ;;  %4620 = vmatprep.mubr.bf16.mxu1 %v4927_v4  ;;  %v4937_v8 = vld [vmem:[#allocation13] sm:$0xff]   ;;  %v4926_v9 = vld [vmem:[#allocation9 + $0x38] sm:$0xff]   ;;  %v4928_v10 = vld [vmem:[%s5730_s30 + $0x8] sm:$0xff]   ;;  %p1029_p6 = scmp.gt.s32.totalorder %s5327_s20, 0  ;;  %s6962_s4 = sld [smem:[#allocation34_spill]] }
  0xf3   : > { %4604 = vmatprep.subr.bf16.mxu1 %v4937_v8  ;;  %v4929_v11 = vld [vmem:[%s5730_s30 + $0x10] sm:$0xff]   ;;  %v5760_v12 = vld [vmem:[%s5730_s30 + $0x18] sm:$0xff]   ;;  %v5763_v13 = vld [vmem:[%s5730_s30 + $0x20] sm:$0xff]   ;;  %v1108_v62 = vadd.s32 16, %v5788_v61  ;;  %v1126_v63 = vand.u32 15, %v5788_v61  ;;  %v1111_v4 = vadd.s32 40, %v5788_v61 }
  0xf4   : > { %4605 = vmatpush3.bf16.msra.mxu1 %v4937_v8  ;;  %v5768_v14 = vld [vmem:[%s5730_s30 + $0x28] sm:$0xff]   ;;  %v5771_v15 = vld [vmem:[%s5730_s30 + $0x30] sm:$0xff]   ;;  %v5776_v16 = vld [vmem:[%s5730_s30 + $0x38] sm:$0xff]   ;;  %v1107_v8 = vadd.s32 8, %v5788_v61  ;;  %s5912_s26 = scalar_select %p1032_p2, 1, 0 }
  0xf5   : > { %4575 = vmatpush3.bf16.msra.mxu0 %v4920_v1  ;;  %v4935_v17 = vld [vmem:[%s5738_s7] sm:$0xff]   ;;  %v4936_v18 = vld [vmem:[%s5738_s7 + $0x8] sm:$0xff]   ;;  %vm1314_vm0 = vcmp.ne.s32.totalorder %v1126_v63, 0  ;;  %vm1356_vm4 = vmpackc.low %vm5354_vm3, %vm5354_vm3  ;;  %s5917_s8 = scalar_select %p1029_p6, 1, 0 }
  0xf6   : > { %4576 = vmatprep.subr.bf16.mxu0 %v4921_v2  ;;  %v4938_v19 = vld [vmem:[#allocation13 + $0x8] sm:$0xff]   ;;  %v4939_v20 = vld [vmem:[#allocation13 + $0x10] sm:$0xff]   ;;  %v4940_v22 = vld [vmem:[#allocation13 + $0x18] sm:$0xff]   ;;  %s1034_s14 = scvt.s32.f32 %s5912_s26  ;;  %s6994_s13 = sld [smem:[#allocation36_spill]] }
  0xf7   : > { %4606 = vmatprep.subr.bf16.mxu1 %v4938_v19  ;;  %v4941_v23 = vld [vmem:[#allocation13 + $0x20] sm:$0xff]   ;;  %v4942_v24 = vld [vmem:[#allocation13 + $0x28] sm:$0xff]   ;;  %v4943_v25 = vld [vmem:[#allocation13 + $0x30] sm:$0xff]   ;;  %s1031_s16 = scvt.s32.f32 %s5917_s8  ;;  %s4104_s28 = sshll.u32 %s5726_s3, 7 }
  0xf8   : > { %4607 = vmatpush3.bf16.msra.mxu1 %v4938_v19  ;;  %v4944_v26 = vld [vmem:[#allocation13 + $0x38] sm:$0xff]   ;;  %v4945_v27 = vld [vmem:[#allocation10 + $0x40] sm:$0xff]   ;;  %v4949_v31 = vld [vmem:[#allocation10 + $0x48] sm:$0xff]   ;;  %s6696_s12 = scalar_lea.vmem [#allocation16], %s4104_s28  ;;  %s6995_s15 = sld [smem:[#allocation26_spill]] }
  0xf9   : > { %4577 = vmatpush3.bf16.msra.mxu0 %v4921_v2  ;;  %4608 = vmatprep.subr.bf16.mxu1 %v4939_v20  ;;  %v4946_v28 = vld [vmem:[#allocation10] sm:$0xff]   ;;  %v4950_v32 = vld [vmem:[#allocation10 + $0x8] sm:$0xff]   ;;  %v4953_v35 = vld [vmem:[#allocation10 + $0x50] sm:$0xff]   ;;  %s4234_s2 = sshll.u32 %s5327_s20, 4  ;;  %s6996_s7 = sld [smem:[#allocation42_spill]] }
  0xfa   : > { %4578 = vmatprep.subr.bf16.mxu0 %v4922_v3  ;;  %v4947_v29 = vld [vmem:[#allocation10 + $0xc0] sm:$0xff]   ;;  %v4951_v33 = vld [vmem:[#allocation10 + $0xc8] sm:$0xff]   ;;  %v4954_v36 = vld [vmem:[#allocation10 + $0x10] sm:$0xff]   ;;  %s3892_s27 = sshll.u32 %s6696_s12, 4  ;;  %s5355_s26 = smov [#allocation16]   ;;  %s6737_s27 = int_to_ptr.vmem [resolvable:$true] %s3892_s27 }
  0xfb   : > { %v4948_v30 = vld [vmem:[#allocation10 + $0x80] sm:$0xff]   ;;  %v4952_v34 = vld [vmem:[#allocation10 + $0x88] sm:$0xff]   ;;  %v4955_v37 = vld [vmem:[#allocation10 + $0xd0] sm:$0xff]   ;;  %s5197_s20 = scalar_lea.vmem %s6737_s27, 2048  ;;  %s5201_s8 = sshll.u32 %s5355_s26, 4  ;;  %s5202_s8 = int_to_ptr.vmem [resolvable:$false] %s5201_s8 }
  0xfc   : > { %4609 = vmatpush3.bf16.msra.mxu1 %v4939_v20  ;;  %v4956_v38 = vld [vmem:[#allocation10 + $0x90] sm:$0xff]   ;;  %v4957_v39 = vld [vmem:[#allocation10 + $0x58] sm:$0xff]   ;;  %v4961_v43 = vld [vmem:[#allocation10 + $0x60] sm:$0xff]   ;;  %p5198_p0 = scmp.ne.s32.totalorder %s6737_s27, %s5197_s20  ;;  %p5204_p13 = scmp.lt.s32.totalorder %s6737_s27, %s5202_s8 }
  0xfd   : > { %4579 = vmatpush3.bf16.msra.mxu0 %v4922_v3  ;;  %4610 = vmatprep.subr.bf16.mxu1 %v4940_v22  ;;  %v4958_v40 = vld [vmem:[#allocation10 + $0x18] sm:$0xff]   ;;  %v4962_v44 = vld [vmem:[#allocation10 + $0x20] sm:$0xff]   ;;  %v4965_v47 = vld [vmem:[#allocation10 + $0x68] sm:$0xff]  }
  0xfe   : > { %4580 = vmatprep.subr.bf16.mxu0 %v4923_v5  ;;  %v4959_v41 = vld [vmem:[#allocation10 + $0xd8] sm:$0xff]   ;;  %v4963_v45 = vld [vmem:[#allocation10 + $0xe0] sm:$0xff]   ;;  %v4966_v48 = vld [vmem:[#allocation10 + $0x28] sm:$0xff]   ;;  %s4235_s10 = sshll.u32 %s6995_s15, 5  ;;  %p5199_p5 = pnand %p5198_p0, %p5615_p3 }
  0xff   : > { %v4960_v42 = vld [vmem:[#allocation10 + $0x98] sm:$0xff]   ;;  %v4964_v46 = vld [vmem:[#allocation10 + $0xa0] sm:$0xff]   ;;  %v4967_v49 = vld [vmem:[#allocation10 + $0xe8] sm:$0xff]   ;;  %s6726_s30 = sadd.s32 %s4235_s10, %s4234_s2 }
 0x100   : > { %4611 = vmatpush3.bf16.msra.mxu1 %v4940_v22  ;;  %v4968_v50 = vld [vmem:[#allocation10 + $0xa8] sm:$0xff]   ;;  %v4969_v51 = vld [vmem:[#allocation10 + $0x70] sm:$0xff]   ;;  %v4973_v55 = vld [vmem:[#allocation10 + $0x78] sm:$0xff]   ;;  %s4236_s0 = sshll.u32 %s6726_s30, 7  ;;  %p5200_p7 = pneg %p5199_p5 }
 0x101   : > { %4581 = vmatpush3.bf16.msra.mxu0 %v4923_v5  ;;  %4612 = vmatprep.subr.bf16.mxu1 %v4941_v23  ;;  %v4971_v52 = vld [vmem:[#allocation10 + $0xf0] sm:$0xff]   ;;  %v4974_v56 = vld [vmem:[#allocation10 + $0x38] sm:$0xff]   ;;  %v4977_v59 = vld [vmem:[#allocation10 + $0x140] sm:$0xff]   ;;  %s6734_s25 = scalar_lea.hbm %s6996_s7, %s4236_s0 }
 0x102   : > { %4582 = vmatprep.subr.bf16.mxu0 %v4924_v6  ;;  %v4970_v53 = vld [vmem:[#allocation10 + $0x30] sm:$0xff]   ;;  %v4975_v57 = vld [vmem:[#allocation10 + $0xf8] sm:$0xff]   ;;  %vm1355_vm2 = vmpackc.low %vm1314_vm0, %vm1314_vm0 }
 0x103   : > { %v4972_v54 = vld [vmem:[#allocation10 + $0xb0] sm:$0xff]   ;;  %v4976_v58 = vld [vmem:[#allocation10 + $0xb8] sm:$0xff]  }
 0x104   : > { %4613 = vmatpush3.bf16.msra.mxu1 %v4941_v23 }
 0x105   : > { %4583 = vmatpush3.bf16.msra.mxu0 %v4924_v6  ;;  %4614 = vmatprep.subr.bf16.mxu1 %v4942_v24 }
 0x106   : > { %4584 = vmatprep.subr.bf16.mxu0 %v4925_v7 }
 0x108   : > { %4615 = vmatpush3.bf16.msra.mxu1 %v4942_v24  ;;  %v1116_v24 = vadd.s32 80, %v5788_v61 }
 0x109   : > { %4585 = vmatpush3.bf16.msra.mxu0 %v4925_v7  ;;  %4616 = vmatprep.subr.bf16.mxu1 %v4943_v25 }
 0x10a   : > { %4586 = vmatprep.subr.bf16.mxu0 %v4926_v9 }
 0x10c   : > { %4617 = vmatpush3.bf16.msra.mxu1 %v4943_v25 }
 0x10d   : > { %4587 = vmatpush3.bf16.msra.mxu0 %v4926_v9  ;;  %4618 = vmatprep.subr.bf16.mxu1 %v4944_v26 }
 0x10e   : > { %4636 = vmatprep.subr.bf16.mxu0 %v4919_v0 }
 0x110   : > { %4589 = vmatmul.mubr.bf16.vlgmr.msra.gmra.mrb[0].mxu0 %v4928_v10  ;;  %4619 = vmatpush3.bf16.msra.mxu1 %v4944_v26 }
 0x111   : > { %4637 = vmatpush3.bf16.msra.mxu0 %v4919_v0  ;;  %4592 = vmatprep.mubr.bf16.mxu0 %v4929_v11  ;;  %v4985_v0 = vld [vmem:[#allocation10 + $0x1c0] sm:$0xff]  }
 0x112   : > { %4638 = vmatprep.subr.bf16.mxu0 %v4920_v1  ;;  %4284 = vmatprep.subr.bf16.mxu1 %v4945_v27 }
 0x113   : > { %4621 = vmatmul.mubr.bf16.vlgmr.msra.gmra.mrb[0].mxu1 %v4928_v10 }
 0x114   : > { %4624 = vmatprep.mubr.bf16.mxu1 %v4929_v11  ;;  %4285 = vmatpush3.bf16.msra.mxu1 %v4946_v28  ;;  %v1112_v11 = vadd.s32 48, %v5788_v61 }
 0x115   : > { %4639 = vmatpush3.bf16.msra.mxu0 %v4920_v1  ;;  %4286 = vmatprep.subr.bf16.mxu1 %v4949_v31  ;;  %v1109_v1 = vadd.s32 24, %v5788_v61 }
 0x116   : > { %4640 = vmatprep.subr.bf16.mxu0 %v4921_v2  ;;  %v1168_v22 = vand.u32 15, %v1112_v11 }
 0x118   : > { %4593 = vmatmul.mubr.bf16.gmra.mrb[4].mxu0 %v5760_v12  ;;  %4287 = vmatpush3.bf16.msra.mxu1 %v4950_v32  ;;  %vm5841_vm13 = vcmp.ne.s32.totalorder %v1168_v22, 0 }
 0x119   : > { %4641 = vmatpush3.bf16.msra.mxu0 %v4921_v2  ;;  %4596 = vmatprep.mubr.bf16.mxu0 %v5763_v13  ;;  %v1140_v2 = vand.u32 15, %v1108_v62 }
 0x11a   : > { %4642 = vmatprep.subr.bf16.mxu0 %v4922_v3  ;;  %4288 = vmatprep.subr.bf16.mxu1 %v4953_v35 }
 0x11b   : > { %4625 = vmatmul.mubr.bf16.gmra.mrb[4].mxu1 %v5760_v12  ;;  %vm5795_vm1 = vcmp.ne.s32.totalorder %v1140_v2, 0  ;;  %v1371_v12 = vsel %vm1355_vm2, 65537, %v6891_v21 }
 0x11c   : > { %4628 = vmatprep.mubr.bf16.mxu1 %v5763_v13  ;;  %4289 = vmatpush3.bf16.msra.mxu1 %v4954_v36  ;;  %vm1357_vm5 = vmpackc.low %vm5795_vm1, %vm5795_vm1  ;;  %v5810_v13 = vsel %vm1356_vm4, 65537, %v6891_v21  ;;  %v1196_v36 = vand.u32 15, %v1116_v24 }
 0x11d   : > { %4643 = vmatpush3.bf16.msra.mxu0 %v4922_v3  ;;  %4290 = vmatprep.subr.bf16.mxu1 %v4957_v39  ;;  %v1110_v3 = vadd.s32 32, %v5788_v61  ;;  %v4134_v20 = vcombine.low %v1371_v12, %v5810_v13  ;;  %vm1361_vm1 = vmpackc.low %vm5841_vm13, %vm5841_vm13  ;;  %v1117_v12 = vadd.s32 88, %v5788_v61 }
 0x11e   : > { %4644 = vmatprep.subr.bf16.mxu0 %v4923_v5  ;;  %vm5869_vm4 = vcmp.ne.s32.totalorder %v1196_v36, 0 }
 0x120   : > { %4597 = vmatmul.mubr.bf16.gmra.mrb[8].mxu0 %v5768_v14  ;;  %4291 = vmatpush3.bf16.msra.mxu1 %v4958_v40 }
 0x121   : > { %4645 = vmatpush3.bf16.msra.mxu0 %v4923_v5  ;;  %4600 = vmatprep.mubr.bf16.mxu0 %v5771_v15  ;;  %v1147_v5 = vand.u32 15, %v1109_v1 }
 0x122   : > { %4646 = vmatprep.subr.bf16.mxu0 %v4924_v6  ;;  %4292 = vmatprep.subr.bf16.mxu1 %v4961_v43 }
 0x123   : > { %4629 = vmatmul.mubr.bf16.gmra.mrb[8].mxu1 %v5768_v14  ;;  %vm5803_vm6 = vcmp.ne.s32.totalorder %v1147_v5, 15  ;;  %v1113_v14 = vadd.s32 56, %v5788_v61 }
 0x124   : > { %4632 = vmatprep.mubr.bf16.mxu1 %v5771_v15  ;;  %4293 = vmatpush3.bf16.msra.mxu1 %v4962_v44  ;;  %vm1661_vm8 = vmpackc.low %vm5803_vm6, %vm5803_vm6  ;;  %vm1411_vm6 = vsmask.f32 3328 }
 0x125   : > { %4647 = vmatpush3.bf16.msra.mxu0 %v4924_v6  ;;  %4294 = vmatprep.subr.bf16.mxu1 %v4965_v47  ;;  %v1175_v23 = vand.u32 15, %v1113_v14  ;;  %v1677_v26 = vsel %vm1661_vm8, 65537, %v6891_v21 }
 0x126   : > { %4648 = vmatprep.subr.bf16.mxu0 %v4925_v7 }
 0x127   : > { %vm5847_vm14 = vcmp.ne.s32.totalorder %v1175_v23, 15 }
 0x128   : > { %4601 = vmatmul.mubr.bf16.gmra.mrb[12].mxu0 %v5776_v16  ;;  %4295 = vmatpush3.bf16.msra.mxu1 %v4966_v48  ;;  %vm1665_vm2 = vmpackc.low %vm5847_vm14, %vm5847_vm14 }
 0x129   : > { %4649 = vmatpush3.bf16.msra.mxu0 %v4925_v7  ;;  %4652 = vmatprep.mubr.bf16.mxu0 %v4935_v17  ;;  %v1154_v7 = vand.u32 15, %v1110_v3  ;;  %v1373_v17 = vsel %vm1357_vm5, 65537, %v6891_v21  ;;  %vm1365_vm5 = vmpackc.low %vm5869_vm4, %vm5869_vm4 }
 0x12a   : > { %4650 = vmatprep.subr.bf16.mxu0 %v4926_v9  ;;  %4296 = vmatprep.subr.bf16.mxu1 %v4969_v51  ;;  %v4135_v25 = vcombine.low %v1373_v17, %v5810_v13 }
 0x12b   : > { %4633 = vmatmul.mubr.bf16.gmra.mrb[12].mxu1 %v5776_v16  ;;  %vm5813_vm7 = vcmp.ne.s32.totalorder %v1154_v7, 0  ;;  %v1114_v16 = vadd.s32 64, %v5788_v61 }
 0x12c   : > { %4297 = vmatpush3.bf16.msra.mxu1 %v4970_v53  ;;  %vm1359_vm10 = vmpackc.low %vm5813_vm7, %vm5813_vm7  ;;  %v1115_v53 = vadd.s32 72, %v5788_v61  ;;  %vm1501_vm7 = vsmask.f32 4352 }
 0x12d   : > { %4651 = vmatpush3.bf16.msra.mxu0 %v4926_v9  ;;  %4298 = vmatprep.subr.bf16.mxu1 %v4973_v55  ;;  %v1161_v9 = vand.u32 15, %v1111_v4  ;;  %v1182_v27 = vand.u32 15, %v1114_v16  ;;  %v1375_v31 = vsel %vm1359_vm10, 65537, %v6891_v21  ;;  %v1381_v4 = vsel %vm1365_vm5, 65537, %v6891_v21 }
 0x12e   : > { %4348 = vmatprep.subr.bf16.mxu0 %v4947_v29  ;;  %v1413_v29 = vshrl.u32 %v4134_v20, 16  ;;  %v4136_v40 = vcombine.low %v1375_v31, %v5810_v13  ;;  %v1189_v3 = vand.u32 15, %v1115_v53  ;;  %v4139_v16 = vcombine.low %v1381_v4, %v5810_v13 }
 0x12f   : > { %vm5822_vm9 = vcmp.ne.s32.totalorder %v1161_v9, 15  ;;  %vm5854_vm0 = vcmp.ne.s32.totalorder %v1182_v27, 0  ;;  %vm1061_vm10 = vcmask 1043456   ;;  %v5969_v4 = vadd.s32 104, %v5788_v61 }
 0x130   : > { %4653 = vmatmul.mubr.bf16.vlgmr.msra.gmra.mrb[16].mxu0 %v4936_v18  ;;  %4299 = vmatpush3.bf16.msra.mxu1 %v4974_v56  ;;  %v1133_v18 = vand.u32 15, %v1107_v8  ;;  %vm1663_vm11 = vmpackc.low %vm5822_vm9, %vm5822_vm9  ;;  %v1430_v51 = vshrl.u32 %v4136_v40, 16  ;;  %vm5891_vm8 = vcmp.ne.s32.totalorder %v1189_v3, 15 }
 0x131   : > { %4349 = vmatpush3.bf16.msra.mxu0 %v4948_v30  ;;  %4412 = vmatprep.subr.bf16.mxu1 %v4977_v59  ;;  %v1416_v30 = vshll.u32 %v4134_v20, 16  ;;  %vm1363_vm3 = vmpackc.low %vm5854_vm0, %vm5854_vm0 }
 0x132   : > { %4350 = vmatprep.subr.bf16.mxu0 %v4951_v33  ;;  %vm5836_vm12 = vcmp.ne.s32.totalorder %v1133_v18, 15  ;;  %v4143_v33 = vcombine.low %v5810_v13, %v1677_v26  ;;  %v1432_v5 = vrot.slane %v1430_v51, 4  ;;  %v5905_v26 = vld [vmem:[%s6962_s4] ss:$0 sm:$0xff]  ;;  %vm1667_vm9 = vmpackc.low %vm5891_vm8, %vm5891_vm8  ;;  %s3859_s4 = scalar_lea.sflag [#allocation17], %s5726_s3 }
 0x133   : > { %vm1659_vm15 = vmpackc.low %vm5836_vm12, %vm5836_vm12  ;;  %v1418_v43 = vrot.slane %v1416_v30, 5  ;;  %v1203_v30 = vand.u32 15, %v1117_v12 }
 0x134   : > { %v1723_v44 = vshrl.u32 %v4143_v33, 16  ;;  %v1675_v48 = vsel %vm1659_vm15, 65537, %v6891_v21 }
 0x135   : > { %4351 = vmatpush3.bf16.msra.mxu0 %v4952_v34  ;;  %v1679_v34 = vsel %vm1663_vm11, 65537, %v6891_v21  ;;  %vm5934_vm12 = vcmp.ne.s32.totalorder %v1203_v30, 15 }
 0x136   : > { %4352 = vmatprep.subr.bf16.mxu0 %v4955_v37  ;;  %v1421_v37 = vshrl.u32 %v4135_v25, 16  ;;  %v1725_v63 = vrot.slane %v1723_v44, 3  ;;  %vm1669_vm15 = vmpackc.low %vm5934_vm12, %vm5934_vm12 }
 0x139   : > { %4353 = vmatpush3.bf16.msra.mxu0 %v4956_v38  ;;  %v1424_v38 = vshll.u32 %v4135_v25, 16 }
 0x13a   : > { %4354 = vmatprep.subr.bf16.mxu0 %v4959_v41  ;;  %v4144_v41 = vcombine.low %v5810_v13, %v1679_v34  ;;  %v1460_v34 = vshll.u32 %v4139_v16, 16 }
 0x13b   : > { %v1426_v47 = vrot.slane %v1424_v38, 5 }
 0x13c   : > { %v1732_v55 = vshrl.u32 %v4144_v41, 16  ;;  %v1735_v56 = vshll.u32 %v4144_v41, 16 }
 0x13d   : > { %4355 = vmatpush3.bf16.msra.mxu0 %v4960_v42  ;;  %v1415_v42 = vrot.slane %v1413_v29, 4 }
 0x13e   : > { %4356 = vmatprep.subr.bf16.mxu0 %v4963_v45  ;;  %v1734_v7 = vrot.slane %v1732_v55, 3  ;;  %v1737_v8 = vrot.slane %v1735_v56, 4 }
 0x13f   : > { %v5883_v60 = vor.u32 %v1418_v43, %v1415_v42 }
 0x140   : > { %v1738_v25 = vor.u32 %v1737_v8, %v1734_v7  ;;  %v5971_v7 = vstv %s1034_s14  ;;  %s5203_s14 = scalar_lea.vmem %s5202_s8, 4096 }
 0x141   : > { %4357 = vmatpush3.bf16.msra.mxu0 %v4964_v46  ;;  %v1423_v46 = vrot.slane %v1421_v37, 4  ;;  %p5205_p10 = scmp.lt.s32.totalorder %s5203_s14, %s5197_s20 }
 0x142   : > { %4358 = vmatprep.subr.bf16.mxu0 %v4967_v49  ;;  %v1377_v49 = vsel %vm1361_vm1, 65537, %v6891_v21 }
 0x143   : > { %v4137_v59 = vcombine.low %v1377_v49, %v5810_v13  ;;  %v1427_v62 = vor.u32 %v1426_v47, %v1423_v46  ;;  %v1683_v46 = vsel %vm1667_vm9, 65537, %v6891_v21  ;;  %p5206_p9 = por %p5205_p10, %p5204_p13 }
 0x145   : > { %4359 = vmatpush3.bf16.msra.mxu0 %v4968_v50  ;;  %v1726_v50 = vshll.u32 %v4143_v33, 16  ;;  %v1439_v10 = vshrl.u32 %v4137_v59, 16  ;;  %v1442_v11 = vshll.u32 %v4137_v59, 16  ;;  %v5898_v22 = vsel %vm1411_vm6, %v5883_v60, %v1427_v62  ;;  %p5207_p11 = pnand %p5206_p9, %p5200_p7 }
 0x146   : > { %4360 = vmatprep.subr.bf16.mxu0 %v4971_v52  ;;  %v1681_v52 = vsel %vm1665_vm2, 65537, %v6891_v21  ;;  %v1457_v33 = vshrl.u32 %v4139_v16, 16  ;;  %vm1484_vm11 = vcmp.ne.s16.totalorder %v5898_v22, 0 }
 0x147   : > { %v1728_v1 = vrot.slane %v1726_v50, 4  ;;  %v1441_v28 = vrot.slane %v1439_v10, 4  ;;  %v1444_v29 = vrot.slane %v1442_v11, 5 }
 0x148   : > { %v1459_v51 = vrot.slane %v1457_v33, 4  ;;  %v6000_v33 = vadd.s32 112, %v5788_v61 }
 0x149   : > { %4361 = vmatpush3.bf16.msra.mxu0 %v4972_v54  ;;  %v1433_v54 = vshll.u32 %v4136_v40, 16  ;;  %v5900_v23 = vor.u32 %v1728_v1, %v1725_v63  ;;  %v1445_v45 = vor.u32 %v1444_v29, %v1441_v28  ;;  %v1217_v29 = vand.u32 15, %v5969_v4 }
 0x14a   : > { %4362 = vmatprep.subr.bf16.mxu0 %v4975_v57  ;;  %v1379_v57 = vsel %vm1363_vm3, 65537, %v6891_v21 }
 0x14b   : > { %v4138_v2 = vcombine.low %v1379_v57, %v5810_v13  ;;  %v1435_v6 = vrot.slane %v1433_v54, 5  ;;  %v5924_v42 = vsel %vm1501_vm7, %v5900_v23, %v1738_v25  ;;  %vm6081_vm4 = vcmp.ne.s32.totalorder %v1217_v29, 15 }
 0x14c   : > { %vm1787_vm14 = vcmp.ne.s16.totalorder %v5924_v42, 0  ;;  %vm1671_vm9 = vmpackc.low %vm6081_vm4, %vm6081_vm4 }
 0x14d   : > { %4363 = vmatpush3.bf16.msra.mxu0 %v4976_v58  ;;  %v4142_v58 = vcombine.low %v5810_v13, %v1675_v48  ;;  %v1448_v18 = vshrl.u32 %v4138_v2, 16  ;;  %v1451_v19 = vshll.u32 %v4138_v2, 16  ;;  %v1436_v24 = vor.u32 %v1435_v6, %v1432_v5 }
 0x14e   : > { %4476 = vmatprep.subr.bf16.mxu0 %v4985_v0  ;;  %v4145_v0 = vcombine.low %v5810_v13, %v1681_v52  ;;  %v1462_v52 = vrot.slane %v1460_v34, 5 }
 0x14f   : > { %v1715_v9 = vshrl.u32 %v4142_v58, 16  ;;  %v1718_v17 = vshll.u32 %v4142_v58, 16  ;;  %v1450_v37 = vrot.slane %v1448_v18, 4  ;;  %v1453_v38 = vrot.slane %v1451_v19, 5 }
 0x150   : > { %v1741_v14 = vshrl.u32 %v4145_v0, 16  ;;  %v1744_v15 = vshll.u32 %v4145_v0, 16  ;;  %v5920_v41 = vsel %vm1411_vm6, %v1427_v62, %v1436_v24  ;;  %v5949_v58 = vcombine.low %v5810_v13, %v1683_v46 }
 0x151   : > { %v1717_v27 = vrot.slane %v1715_v9, 3  ;;  %v1720_v36 = vrot.slane %v1718_v17, 4  ;;  %6963 = vst [vmem:[#allocation29_spill] sm:$0xff] %v5920_v41  ;;  %vm6899_vm13 = vcmp.ne.s16.totalorder %v5920_v41, 0  ;;  %v1454_v55 = vor.u32 %v1453_v38, %v1450_v37 }
 0x152   : > { %v1743_v31 = vrot.slane %v1741_v14, 3  ;;  %v1746_v32 = vrot.slane %v1744_v15, 4  ;;  %v5955_v63 = vsel %vm1411_vm6, %v1436_v24, %v1445_v45  ;;  %v5958_v0 = vadd.s32 96, %v5788_v61 }
 0x153   : > { %v5943_v54 = vor.u32 %v1720_v36, %v1717_v27  ;;  %6966 = vst [vmem:[#allocation30_spill] sm:$0xff] %v5955_v63  ;;  %v5966_v3 = vor.u32 %v1462_v52, %v1459_v51  ;;  %v5974_v8 = vsel %vm1411_vm6, %v1445_v45, %v1454_v55  ;;  %v1685_v9 = vsel %vm1669_vm15, 65537, %v6891_v21 }
 0x154   : > { %v5939_v50 = vor.u32 %v1746_v32, %v1743_v31  ;;  %v5979_v14 = vstv %s1031_s16  ;;  %v1750_v15 = vshrl.u32 %v5949_v58, 16  ;;  %v1753_v19 = vshll.u32 %v5949_v58, 16 }
 0x155   : > { %v1210_v20 = vand.u32 15, %v5958_v0  ;;  %vm6896_vm0 = vcmp.ne.s16.totalorder %v5955_v63, 0  ;;  %v5989_v27 = vsel %vm1411_vm6, %v1454_v55, %v5966_v3  ;;  %v5992_v28 = vcombine.low %v5810_v13, %v1685_v9 }
 0x156   : > { %v5964_v2 = vsel %vm1501_vm7, %v1738_v25, %v5939_v50  ;;  %vm1487_vm2 = vcmp.ne.s16.totalorder %v5974_v8, 0  ;;  %vm1488_vm5 = vcmp.ne.s16.totalorder %v5989_v27, 0  ;;  %vm1483_vm15 = vcmp.ne.s16.totalorder %v5883_v60, 0 }
 0x157   : > { %6967 = vst [vmem:[#allocation31_spill] sm:$0xff] %v5964_v2  ;;  %vm1788_vm1 = vcmp.ne.s16.totalorder %v5964_v2, 0  ;;  %vm6064_vm3 = vcmp.ne.s32.totalorder %v1210_v20, 0  ;;  %v1762_v58 = vshll.u32 %v5992_v28, 16 }
 0x158   : > { %vm1367_vm8 = vmpackc.low %vm6064_vm3, %vm6064_vm3  ;;  %vm1785_vm3 = vcmp.ne.s16.totalorder %v5943_v54, 0 }
 0x1e3   : > { %v4590_v35 = vpop.f32.mrb[0].mxu0 }
 0x1e4   : > { %v726_v39 = vadd.f32 %v4590_v35, %v5905_v26  ;;  %v717_v40 = vpop.f32.mrb[1].mxu0 }
 0x1e5   : > { %v718_v43 = vadd.f32 %v5905_v26, %v717_v40  ;;  %v4591_v44 = vpop.f32.mrb[2].mxu0 }
 0x1e6   : > { %v729_v48 = vadd.f32 %v4591_v44, %v5905_v26  ;;  %v720_v49 = vpop.f32.mrb[3].mxu0  ;;  %v782_v56 = vmax.f32 %v726_v39, 0.0 }
 0x1e7   : > { %v721_v53 = vadd.f32 %v5905_v26, %v720_v49  ;;  %v780_v59 = vmax.f32 %v718_v43, 0.0 }
 0x1e8   : > { %v783_v57 = vmax.f32 %v729_v48, 0.0 }
 0x1e9   : > { %v781_v62 = vmax.f32 %v721_v53, 0.0 }
 0x1ea   : > { %v5960_v1 = vpack.c.bf16 %v783_v57, %v782_v56 }
 0x1eb   : > { %v1045_v5 = vpack.c.bf16 %v781_v62, %v780_v59  ;;  %v4594_v6 = vpop.f32.mrb[4].mxu0 }
 0x1ec   : > { %v1063_v10 = vrot.slane %v5960_v1, 4  ;;  %v742_v11 = vadd.f32 %v4594_v6, %v5905_v26  ;;  %v733_v12 = vpop.f32.mrb[5].mxu0 }
 0x1ed   : > { %v1062_v16 = vrot.slane %v1045_v5, 4  ;;  %v734_v17 = vadd.f32 %v5905_v26, %v733_v12  ;;  %v4595_v18 = vpop.f32.mrb[6].mxu0 }
 0x1ee   : > { %v745_v24 = vadd.f32 %v4595_v18, %v5905_v26  ;;  %v736_v25 = vpop.f32.mrb[7].mxu0  ;;  %v786_v31 = vmax.f32 %v742_v11, 0.0 }
 0x1ef   : > { %v5996_v30 = vsel %vm1061_vm10, %v1062_v16, %v1063_v10  ;;  %1086 = vst [vmem:[#allocation2 + $0x8] sm:$0xf0] %v1062_v16  ;;  %v737_v32 = vadd.f32 %v5905_v26, %v736_v25  ;;  %v784_v34 = vmax.f32 %v734_v17, 0.0 }
 0x1f0   : > { %1087 = vst [vmem:[#allocation2 + $0x10] sm:$0xff] %v5996_v30  ;;  %v787_v35 = vmax.f32 %v745_v24, 0.0  ;;  %v1909_v36 = vsel %vm1484_vm11, %v5996_v30, 0  ;;  %v1494_v37 = vsel %vm6899_vm13, %v5996_v30, 0  ;;  %v6890_v45 = vrot.slane %v5996_v30, 4 }
 0x1f1   : > { %v785_v38 = vmax.f32 %v737_v32, 0.0  ;;  %v1926_v39 = vshrl.u32 %v1909_v36, 16  ;;  %v1929_v40 = vshll.u32 %v1909_v36, 16  ;;  %v1520_v43 = vshrl.u32 %v1494_v37, 16 }
 0x1f2   : > { %v6009_v44 = vpack.c.bf16 %v787_v35, %v786_v31  ;;  %v1523_v46 = vshll.u32 %v1494_v37, 16  ;;  %v1796_v47 = vsel %vm1787_vm14, %v5996_v30, 0  ;;  %v6977_v2 = vrot.slane %v5996_v30, 4 }
 0x1f3   : > { %v1047_v48 = vpack.c.bf16 %v785_v38, %v784_v34  ;;  %v4598_v49 = vpop.f32.mrb[8].mxu0  ;;  %v1928_v51 = vrot.slane %v1926_v39, 3  ;;  %v1931_v52 = vrot.slane %v1929_v40, 4  ;;  %v1522_v53 = vrot.slane %v1520_v43, 3 }
 0x1f4   : > { %v1067_v55 = vrot.slane %v6009_v44, 4  ;;  %v758_v56 = vadd.f32 %v4598_v49, %v5905_v26  ;;  %v749_v57 = vpop.f32.mrb[9].mxu0  ;;  %v1525_v59 = vrot.slane %v1523_v46, 4  ;;  %v1821_v62 = vshrl.u32 %v1796_v47, 16 }
 0x1f5   : > { %v1065_v1 = vrot.slane %v1047_v48, 4  ;;  %v750_v5 = vadd.f32 %v5905_v26, %v749_v57  ;;  %v4599_v6 = vpop.f32.mrb[10].mxu0  ;;  %v6018_v9 = vor.u32 %v1931_v52, %v1928_v51  ;;  %v1824_v11 = vshll.u32 %v1796_v47, 16 }
 0x1f6   : > { %v790_v12 = vmax.f32 %v758_v56, 0.0  ;;  %v761_v16 = vadd.f32 %v4599_v6, %v5905_v26  ;;  %v752_v17 = vpop.f32.mrb[11].mxu0  ;;  %v6021_v18 = vor.u32 %v1525_v59, %v1522_v53  ;;  %v1823_v24 = vrot.slane %v1821_v62, 4 }
 0x1f7   : > { %v6025_v25 = vsel %vm1061_vm10, %v1063_v10, %v1065_v1  ;;  %v6028_v31 = vsel %vm1061_vm10, %v1065_v1, %v1067_v55  ;;  %v788_v32 = vmax.f32 %v750_v5, 0.0  ;;  %v753_v34 = vadd.f32 %v5905_v26, %v752_v17 }
 0x1f8   : > { %1088 = vst [vmem:[#allocation2 + $0x18] sm:$0xff] %v6025_v25  ;;  %1089 = vst [vmem:[#allocation2 + $0x20] sm:$0xff] %v6028_v31  ;;  %v791_v35 = vmax.f32 %v761_v16, 0.0  ;;  %v1910_v36 = vsel %vm6899_vm13, %v6025_v25, 0  ;;  %v1621_v37 = vrot.slane %v6025_v25, 4  ;;  %v1826_v38 = vrot.slane %v1824_v11, 5 }
 0x1f9   : > { %v789_v10 = vmax.f32 %v753_v34, 0.0  ;;  %v1935_v39 = vshrl.u32 %v1910_v36, 16  ;;  %v1938_v40 = vshll.u32 %v1910_v36, 16  ;;  %v1911_v43 = vsel %vm6896_vm0, %v6028_v31, 0 }
 0x1fa   : > { %v6040_v44 = vpack.c.bf16 %v791_v35, %v790_v12  ;;  %v6045_v46 = vsel %vm1061_vm10, %v6890_v45, %v1621_v37  ;;  %v6047_v47 = vor.u32 %v1826_v38, %v1823_v24  ;;  %v1944_v48 = vshrl.u32 %v1911_v43, 16 }
 0x1fb   : > { %v1049_v49 = vpack.c.bf16 %v789_v10, %v788_v32  ;;  %v4602_v51 = vpop.f32.mrb[12].mxu0  ;;  %v1937_v52 = vrot.slane %v1935_v39, 3  ;;  %v1940_v53 = vrot.slane %v1938_v40, 4  ;;  %v1947_v56 = vshll.u32 %v1911_v43, 16 }
 0x1fc   : > { %v1071_v57 = vrot.slane %v6040_v44, 4  ;;  %v774_v59 = vadd.f32 %v4602_v51, %v5905_v26  ;;  %v765_v62 = vpop.f32.mrb[13].mxu0  ;;  %v1946_v1 = vrot.slane %v1944_v48, 3  ;;  %v1495_v5 = vsel %vm6896_vm0, %v6025_v25, 0 }
 0x1fd   : > { %v1069_v6 = vrot.slane %v1049_v49, 4  ;;  %v766_v11 = vadd.f32 %v5905_v26, %v765_v62  ;;  %v4603_v12 = vpop.f32.mrb[14].mxu0  ;;  %v1941_v16 = vor.u32 %v1940_v53, %v1937_v52  ;;  %v1949_v17 = vrot.slane %v1947_v56, 4 }
 0x1fe   : > { %v794_v24 = vmax.f32 %v774_v59, 0.0  ;;  %v777_v32 = vadd.f32 %v4603_v12, %v5905_v26  ;;  %v768_v34 = vpop.f32.mrb[15].mxu0  ;;  %v1529_v35 = vshrl.u32 %v1495_v5, 16  ;;  %v1532_v36 = vshll.u32 %v1495_v5, 16 }
 0x1ff   : > { %v6058_v38 = vsel %vm1061_vm10, %v1067_v55, %v1069_v6  ;;  %v1072_v10 = vsel %vm1061_vm10, %v1069_v6, %v1071_v57  ;;  %v792_v39 = vmax.f32 %v766_v11, 0.0  ;;  %v769_v40 = vadd.f32 %v5905_v26, %v768_v34 }
 0x200   : > { %1090 = vst [vmem:[#allocation2 + $0x28] sm:$0xff] %v6058_v38  ;;  %1091 = vst [vmem:[#allocation2 + $0x30] sm:$0xff] %v1072_v10  ;;  %v795_v44 = vmax.f32 %v777_v32, 0.0  ;;  %v6071_v48 = vsel %vm1501_vm7, %v6018_v9, %v1941_v16  ;;  %v6073_v55 = vor.u32 %v1949_v17, %v1946_v1  ;;  %v1531_v49 = vrot.slane %v1529_v35, 3 }
 0x201   : > { %v793_v51 = vmax.f32 %v769_v40, 0.0  ;;  %v1534_v52 = vrot.slane %v1532_v36, 4  ;;  %v1623_v53 = vrot.slane %v6028_v31, 4  ;;  %v1797_v0 = vsel %vm1788_vm1, %v6025_v25, 0 }
 0x202   : > { %v1052_v56 = vpack.c.bf16 %v795_v44, %v794_v24  ;;  %v6087_v59 = vsel %vm1501_vm7, %v1941_v16, %v6073_v55  ;;  %v1830_v62 = vshrl.u32 %v1797_v0, 16  ;;  %v1833_v1 = vshll.u32 %v1797_v0, 16 }
 0x203   : > { %v1051_v5 = vpack.c.bf16 %v793_v51, %v792_v39  ;;  %v4654_v6 = vpop.f32.mrb[16].mxu0  ;;  %v6089_v11 = vor.u32 %v1534_v52, %v1531_v49  ;;  %v6092_v12 = vsel %vm1061_vm10, %v1621_v37, %v1623_v53  ;;  %v1912_v4 = vsel %vm1487_vm2, %v6058_v38, 0 }
 0x204   : > { %v1075_v29 = vrot.slane %v1052_v56, 4  ;;  %v1019_v25 = vadd.f32 %v4654_v6, %v5905_v26  ;;  %v1010_v17 = vpop.f32.mrb[17].mxu0  ;;  %v1832_v24 = vrot.slane %v1830_v62, 4  ;;  %v1835_v16 = vrot.slane %v1833_v1, 5 }
 0x205   : > { %v1073_v32 = vrot.slane %v1051_v5, 4  ;;  %v1011_v34 = vadd.f32 %v5905_v26, %v1010_v17  ;;  %v4655_v35 = vpop.f32.mrb[18].mxu0  ;;  %v6102_v36 = vsel %vm1501_vm7, %v6021_v18, %v6089_v11  ;;  %v1953_v37 = vshrl.u32 %v1912_v4, 16 }
 0x206   : > { %1094 = vst [vmem:[#allocation2 + $0x48] sm:$0xf] %v1075_v29  ;;  %v1027_v10 = vmax.f32 %v1019_v25, 0.0  ;;  %v1022_v39 = vadd.f32 %v4655_v35, %v5905_v26  ;;  %v1013_v40 = vpop.f32.mrb[19].mxu0  ;;  %v6105_v44 = vor.u32 %v1835_v16, %v1832_v24  ;;  %v1956_v49 = vshll.u32 %v1912_v4, 16 }
 0x207   : > { %v1074_v51 = vsel %vm1061_vm10, %v1071_v57, %v1073_v32  ;;  %v1076_v52 = vsel %vm1061_vm10, %v1073_v32, %v1075_v29  ;;  %v1025_v0 = vmax.f32 %v1011_v34, 0.0  ;;  %v1014_v56 = vadd.f32 %v5905_v26, %v1013_v40  ;;  %v6116_v6 = vld [vmem:[#allocation2 + $0x30] sm:$0xff]  ;;  %v6137_v43 = vld [vmem:[#allocation2 + $0x28] sm:$0xff] }
 0x208   : > { %1092 = vst [vmem:[#allocation2 + $0x38] sm:$0xff] %v1074_v51  ;;  %1093 = vst [vmem:[#allocation2 + $0x40] sm:$0xff] %v1076_v52  ;;  %v1028_v62 = vmax.f32 %v1022_v39, 0.0  ;;  %v6113_v1 = vsel %vm1411_vm6, %v6047_v47, %v6105_v44  ;;  %v1955_v5 = vrot.slane %v1953_v37, 3  ;;  %v1096_v57 = vmul.f32 %v5971_v7, %v1027_v10 }
 0x209   : > { %v1026_v4 = vmax.f32 %v1014_v56, 0.0  ;;  %v1958_v29 = vrot.slane %v1956_v49, 4  ;;  %v1496_v26 = vsel %vm1487_vm2, %v6028_v31, 0  ;;  %v6889_v16 = vrot.slane %v6058_v38, 4 }
 0x20a   : > { %v1097_v25 = vmul.f32 %v5971_v7, %v1028_v62  ;;  %v1538_v17 = vshrl.u32 %v1496_v26, 16  ;;  %v1541_v24 = vshll.u32 %v1496_v26, 16  ;;  %v1037_v32 = vmul.f32 %v5979_v14, %v1025_v0 }
 0x20b   : > { %v1038_v34 = vmul.f32 %v5979_v14, %v1026_v4  ;;  %v1959_v35 = vor.u32 %v1958_v29, %v1955_v5  ;;  %v1913_v37 = vsel %vm1488_vm5, %v6116_v6, 0  ;;  %v6135_v39 = vsel %vm1061_vm10, %v1623_v53, %v6889_v16 }
 0x20c   : > { %v1098_v31 = vpack.c.bf16 %v1097_v25, %v1096_v57  ;;  %v1540_v10 = vrot.slane %v1538_v17, 3  ;;  %v1543_v7 = vrot.slane %v1541_v24, 4  ;;  %v1383_v49 = vsel %vm1367_vm8, 65537, %v6891_v21 }
 0x20d   : > { %v1039_v14 = vpack.c.bf16 %v1038_v34, %v1037_v32  ;;  %v6144_v40 = vsel %vm1501_vm7, %v6073_v55, %v1959_v35  ;;  %v1224_v51 = vand.u32 15, %v6000_v33  ;;  %v1962_v56 = vshrl.u32 %v1913_v37, 16 }
 0x20e   : > { %v1100_v52 = vrot.slane %v1098_v31, 4  ;;  %v1544_v0 = vor.u32 %v1543_v7, %v1540_v10  ;;  %v1965_v53 = vshll.u32 %v1913_v37, 16  ;;  %v1497_v20 = vsel %vm1488_vm5, %v6137_v43, 0 }
 0x20f   : > { %v1041_v62 = vrot.slane %v1039_v14, 4  ;;  %v1687_v5 = vsel %vm1671_vm9, 65537, %v6891_v21  ;;  %v1121_v57 = vadd.s32 120, %v5788_v61  ;;  %v1964_v4 = vrot.slane %v1962_v56, 3 }
 0x210   : > { %1102 = vst [vmem:[#allocation2 + $0x50] ss:$-4 sps:$4 sm:$0xff] %v1100_v52   ;;  %v6155_v55 = vsel %vm1501_vm7, %v6089_v11, %v1544_v0  ;;  %v1967_v33 = vrot.slane %v1965_v53, 4  ;;  %v1547_v29 = vshrl.u32 %v1497_v20, 16  ;;  %v1550_v26 = vshll.u32 %v1497_v20, 16 }
 0x211   : > { %1043 = vst [vmem:[#allocation2 + $0x8] ss:$-4 sps:$4 sm:$0xff] %v1041_v62   ;;  %v6158_v25 = vcombine.low %v1383_v49, %v5810_v13  ;;  %v1759_v32 = vshrl.u32 %v5992_v28, 16  ;;  %vm6163_vm12 = vcmp.ne.s32.totalorder %v1224_v51, 0  ;;  %v6170_v11 = vsel %vm1501_vm7, %v5943_v54, %v5900_v23 }
 0x212   : > { %v6160_v17 = vor.u32 %v1967_v33, %v1964_v4  ;;  %v1549_v24 = vrot.slane %v1547_v29, 3  ;;  %v1552_v34 = vrot.slane %v1550_v26, 4  ;;  %v6173_v37 = vcombine.low %v5810_v13, %v1687_v5  ;;  %vm1369_vm4 = vmpackc.low %vm6163_vm12, %vm6163_vm12 }
 0x213   : > { %v1231_v31 = vand.u32 15, %v1121_v57  ;;  %v1752_v10 = vrot.slane %v1750_v15, 3  ;;  %v1755_v7 = vrot.slane %v1753_v19, 4  ;;  %vm1786_vm8 = vcmp.ne.s16.totalorder %v6170_v11, 0 }
 0x214   : > { %v6181_v14 = vsel %vm1501_vm7, %v1959_v35, %v6160_v17  ;;  %v6185_v23 = vor.u32 %v1552_v34, %v1549_v24  ;;  %v6191_v15 = vrot.slane %v1759_v32, 3  ;;  %v1385_v28 = vsel %vm1369_vm4, 65537, %v6891_v21 }
 0x215   : > { %vm6201_vm9 = vcmp.ne.s32.totalorder %v1231_v31, 15  ;;  %v6205_v20 = vor.u32 %v1755_v7, %v1752_v10  ;;  %v4141_v7 = vcombine.low %v1385_v28, %v5810_v13  ;;  %v4978_v28 = vld [vmem:[#allocation10 + $0x100] sm:$0xff]  }
 0x216   : > { %v6197_v35 = vsel %vm1501_vm7, %v1544_v0, %v6185_v23  ;;  %vm1673_vm12 = vmpackc.low %vm6201_vm9, %vm6201_vm9 }
 0x218   : > { %v1598_v56 = vld [vmem:[#allocation2] sm:$0xf0]  ;;  %v1599_v53 = vld [vmem:[#allocation2 + $0x8] sm:$0xff] }
 0x219   : > { %v1346_v62 = vld [vmem:[#allocation2] sm:$0xf8]  ;;  %v1616_v5 = vrot.slane %v1598_v56, 4  ;;  %v1617_v57 = vrot.slane %v1599_v53, 4  ;;  %v1493_v4 = vsel %vm1484_vm11, %v1599_v53, 0 }
 0x21a   : > { %v1492_v0 = vsel %vm1483_vm15, %v1346_v62, 0  ;;  %v1899_v33 = vld [vmem:[#allocation2 + $0x8] sm:$0xf8]  ;;  %v1511_v24 = vshrl.u32 %v1493_v4, 16  ;;  %v1514_v32 = vshll.u32 %v1493_v4, 16  ;;  %v1795_v4 = vsel %vm1786_vm8, %v1599_v53, 0 }
 0x21b   : > { %v1503_v29 = vshrl.u32 %v1492_v0, 16  ;;  %v1506_v26 = vshll.u32 %v1492_v0, 16  ;;  %v1649_v61 = vld [vmem:[#allocation2] sm:$0xf0]  ;;  %v1618_v34 = vsel %vm1061_vm10, %v1616_v5, %v1617_v57  ;;  %v1908_v31 = vsel %vm1483_vm15, %v1899_v33, 0 }
 0x21c   : > { %v1794_v10 = vsel %vm1785_vm3, %v1649_v61, 0  ;;  %3144 = vmatprep.mubr.bf16.mxu1 %v1618_v34  ;;  %v1513_v16 = vrot.slane %v1511_v24, 3  ;;  %v1516_v51 = vrot.slane %v1514_v32, 4  ;;  %v1918_v49 = vshrl.u32 %v1908_v31, 16  ;;  %v4979_v32 = vld [vmem:[#allocation10 + $0x148] sm:$0xff]  }
 0x21d   : > { %v1505_v56 = vrot.slane %v1503_v29, 3  ;;  %v1508_v62 = vrot.slane %v1506_v26, 4  ;;  %v1921_v0 = vshll.u32 %v1908_v31, 16  ;;  %v1804_v19 = vshrl.u32 %v1794_v10, 16 }
 0x21e   : > { %v1517_v33 = vor.u32 %v1516_v51, %v1513_v16  ;;  %v1807_v61 = vshll.u32 %v1794_v10, 16  ;;  %v1812_v45 = vshrl.u32 %v1795_v4, 16  ;;  %v1920_v34 = vrot.slane %v1918_v49, 3 }
 0x21f   : > { %v1509_v5 = vor.u32 %v1508_v62, %v1505_v56  ;;  %v1923_v29 = vrot.slane %v1921_v0, 4  ;;  %v1806_v26 = vrot.slane %v1804_v19, 4  ;;  %v1815_v24 = vshll.u32 %v1795_v4, 16  ;;  %v4980_v19 = vld [vmem:[#allocation10 + $0x108] sm:$0xff]  }
 0x220   : > { %v1809_v21 = vrot.slane %v1807_v61, 5  ;;  %v1814_v63 = vrot.slane %v1812_v45, 4  ;;  %v6976_v53 = vmov 0   ;;  %v1620_v16 = vsel %vm1061_vm10, %v1617_v57, %v6977_v2 }
 0x221   : > { %v1518_v31 = vsel %vm1501_vm7, %v1509_v5, %v1517_v33  ;;  %v1689_v41 = vsel %vm1673_vm12, 65537, %v6976_v53  ;;  %v1924_v52 = vor.u32 %v1923_v29, %v1920_v34  ;;  %v1817_v51 = vrot.slane %v1815_v24, 5  ;;  %v4981_v5 = vld [vmem:[#allocation10 + $0x150] sm:$0xff]   ;;  %v6250_v53 = vld [vmem:[#allocation2 + $0x20] sm:$0xff] }
 0x222   : > { %3145 = vmatmul.mubr.bf16.vlgmr.msra.gmra.mrb[16].mxu1 %v1518_v31  ;;  %v1771_v10 = vshll.u32 %v6173_v37, 16  ;;  %v1810_v49 = vor.u32 %v1809_v21, %v1806_v26  ;;  %v1764_v56 = vrot.slane %v1762_v58, 4  ;;  %v1475_v62 = vshrl.u32 %v4141_v7, 16  ;;  %v4986_v21 = vld [vmem:[#allocation10 + $0x180] sm:$0xff]  }
 0x223   : > { %3152 = vmatprep.mubr.bf16.mxu1 %v1620_v16  ;;  %4413 = vmatpush3.bf16.msra.mxu1 %v4978_v28  ;;  %v1478_v0 = vshll.u32 %v4141_v7, 16  ;;  %v1933_v45 = vsel %vm1501_vm7, %v1924_v52, %v6018_v9  ;;  %v1818_v4 = vor.u32 %v1817_v51, %v1814_v63  ;;  %v4149_v30 = vcombine.low %v5810_v13, %v1689_v41  ;;  %v4989_v28 = vld [vmem:[#allocation10 + $0x1c8] sm:$0xff]   ;;  %v4993_v16 = vld [vmem:[#allocation10 + $0x1d0] sm:$0xff]  }
 0x224   : > { %4414 = vmatprep.subr.bf16.mxu1 %v4979_v32  ;;  %3241 = vmatprep.mubr.bf16.mxu0 %v1933_v45  ;;  %v6235_v2 = vsel %vm1501_vm7, %v5939_v50, %v6205_v20  ;;  %v6978_v57 = vshrl.u32 %v6158_v25, 16  ;;  %v6979_v7 = vshll.u32 %v6158_v25, 16  ;;  %v6980_v13 = vshrl.u32 %v6173_v37, 16  ;;  %v4982_v50 = vld [vmem:[#allocation10 + $0x110] sm:$0xff]   ;;  %v4983_v25 = vld [vmem:[#allocation10 + $0x158] sm:$0xff]   ;;  %v4990_v52 = vld [vmem:[#allocation10 + $0x188] sm:$0xff]  }
 0x225   : > { %v1819_v9 = vsel %vm1411_vm6, %v1810_v49, %v1818_v4  ;;  %v1828_v63 = vsel %vm1411_vm6, %v1818_v4, %v6047_v47  ;;  %v1773_v34 = vrot.slane %v1771_v10, 4  ;;  %v1765_v29 = vor.u32 %v1764_v56, %v6191_v15  ;;  %v4987_v10 = vld [vmem:[#allocation10 + $0x160] sm:$0xff]  }
 0x226   : > { %v1468_v58 = vrot.slane %v6978_v57, 4  ;;  %v1471_v61 = vrot.slane %v6979_v7, 5  ;;  %v1770_v41 = vrot.slane %v6980_v13, 3  ;;  %3242 = vmatmul.mubr.bf16.vlgmr.msra.gmra.mrb[20].mxu0 %v1819_v9  ;;  %v1477_v26 = vrot.slane %v1475_v62, 4  ;;  %v4995_v62 = vld [vmem:[#allocation10 + $0x1d8] sm:$0xff]   ;;  %v4988_v4 = vld [vmem:[#allocation10 + $0x120] sm:$0xff]  }
 0x227   : > { %4415 = vmatpush3.bf16.msra.mxu1 %v4980_v19  ;;  %v1480_v24 = vrot.slane %v1478_v0, 5  ;;  %3249 = vmatprep.mubr.bf16.mxu0 %v6071_v48  ;;  %v1777_v32 = vshrl.u32 %v4149_v30, 16  ;;  %v1780_v31 = vshll.u32 %v4149_v30, 16  ;;  %v1527_v47 = vsel %vm1501_vm7, %v1517_v33, %v6021_v18  ;;  %v4984_v48 = vld [vmem:[#allocation10 + $0x118] sm:$0xff]   ;;  %v4991_v30 = vld [vmem:[#allocation10 + $0x168] sm:$0xff]  }
 0x228   : > { %4416 = vmatprep.subr.bf16.mxu1 %v4981_v5  ;;  %vm6897_vm4 = vcmp.ne.s16.totalorder %v6235_v2, 0  ;;  %4477 = vmatpush3.bf16.msra.mxu0 %v4986_v21  ;;  %v1472_v37 = vor.u32 %v1471_v61, %v1468_v58  ;;  %v1774_v15 = vor.u32 %v1773_v34, %v1770_v41  ;;  %v6256_v51 = vsel %vm1501_vm7, %v6205_v20, %v1765_v29  ;;  %v6271_v5 = vld [vmem:[#allocation2 + $0x38] sm:$0xff]  ;;  %v4996_v58 = vld [vmem:[#allocation10 + $0x198] sm:$0xff]   ;;  %v6290_v7 = vld [vmem:[#allocation2 + $0x40] sm:$0xff] }
 0x229   : > { %4478 = vmatprep.subr.bf16.mxu0 %v4989_v28  ;;  %v6258_v18 = vor.u32 %v1480_v24, %v1477_v26  ;;  %v1798_v33 = vsel %vm6897_vm4, %v6250_v53, 0  ;;  %v1779_v49 = vrot.slane %v1777_v32, 3  ;;  %v1782_v19 = vrot.slane %v1780_v31, 4  ;;  %v4999_v61 = vld [vmem:[#allocation10 + $0x1e0] sm:$0xff]  }
 0x22a   : > { %3153 = vmatmul.mubr.bf16.gmra.mrb[20].mxu1 %v1527_v47  ;;  %v6265_v56 = vsel %vm1411_vm6, %v5966_v3, %v1472_v37  ;;  %vm6898_vm9 = vcmp.ne.s16.totalorder %v6256_v51, 0  ;;  %v6269_v20 = vsel %vm1501_vm7, %v1765_v29, %v1774_v15  ;;  %v1839_v0 = vshrl.u32 %v1798_v33, 16 }
 0x22b   : > { %3160 = vmatprep.mubr.bf16.mxu1 %v6045_v46  ;;  %4417 = vmatpush3.bf16.msra.mxu1 %v4982_v50  ;;  %v4994_v46 = vld [vmem:[#allocation10 + $0x190] sm:$0xff]   ;;  %v1842_v45 = vshll.u32 %v1798_v33, 16  ;;  %v6275_v3 = vsel %vm1411_vm6, %v1472_v37, %v6258_v18  ;;  %vm1489_vm12 = vcmp.ne.s16.totalorder %v6265_v56, 0  ;;  %v6279_v21 = vor.u32 %v1782_v19, %v1779_v49  ;;  %v5001_v37 = vld [vmem:[#allocation10 + $0x1e8] sm:$0xff]  }
 0x22c   : > { %4418 = vmatprep.subr.bf16.mxu1 %v4983_v25  ;;  %4479 = vmatpush3.bf16.msra.mxu0 %v4990_v52  ;;  %v1799_v57 = vsel %vm6898_vm9, %v6137_v43, 0  ;;  %vm1791_vm0 = vcmp.ne.s16.totalorder %v6269_v20, 0  ;;  %vm1490_vm4 = vcmp.ne.s16.totalorder %v6275_v3, 0  ;;  %v1841_v9 = vrot.slane %v1839_v0, 4  ;;  %v4997_v50 = vld [vmem:[#allocation10 + $0x170] sm:$0xff]   ;;  %v5000_v25 = vld [vmem:[#allocation10 + $0x1a0] sm:$0xff]  }
 0x22d   : > { %4480 = vmatprep.subr.bf16.mxu0 %v4993_v16  ;;  %v1498_v28 = vsel %vm1489_vm12, %v6116_v6, 0  ;;  %v1848_v13 = vshrl.u32 %v1799_v57, 16  ;;  %v1851_v41 = vshll.u32 %v1799_v57, 16  ;;  %v1800_v34 = vsel %vm1791_vm0, %v6116_v6, 0 }
 0x22e   : > { %3250 = vmatmul.mubr.bf16.gmra.mrb[24].mxu0 %v1828_v63  ;;  %v1844_v63 = vrot.slane %v1842_v45, 5  ;;  %v6301_v29 = vsel %vm1501_vm7, %v1774_v15, %v6279_v21  ;;  %v1915_v24 = vsel %vm1490_vm4, %v6290_v7, 0  ;;  %v1556_v32 = vshrl.u32 %v1498_v28, 16 }
 0x22f   : > { %4419 = vmatpush3.bf16.msra.mxu1 %v4984_v48  ;;  %3257 = vmatprep.mubr.bf16.mxu0 %v6087_v59  ;;  %v1914_v59 = vsel %vm1489_vm12, %v6271_v5, 0  ;;  %v1559_v31 = vshll.u32 %v1498_v28, 16  ;;  %v1499_v47 = vsel %vm1490_vm4, %v6271_v5, 0  ;;  %vm1491_vm9 = vcmp.ne.s16.totalorder %v6258_v18, 0  ;;  %v4998_v48 = vld [vmem:[#allocation10 + $0x130] sm:$0xff]  }
 0x230   : > { %4420 = vmatprep.subr.bf16.mxu1 %v4987_v10  ;;  %4481 = vmatpush3.bf16.msra.mxu0 %v4994_v46  ;;  %v1974_v26 = vshll.u32 %v1914_v59, 16  ;;  %v1845_v52 = vor.u32 %v1844_v63, %v1841_v9  ;;  %v1857_v15 = vshrl.u32 %v1800_v34, 16  ;;  %v1860_v16 = vshll.u32 %v1800_v34, 16  ;;  %v5003_v46 = vld [vmem:[#allocation10 + $0x178] sm:$0xff]   ;;  %v1606_v28 = vld [vmem:[#allocation2 + $0x40] sm:$0xf] }
 0x231   : > { %4482 = vmatprep.subr.bf16.mxu0 %v4995_v62  ;;  %vm6900_vm13 = vcmp.ne.s16.totalorder %v6301_v29, 0  ;;  %v1850_v33 = vrot.slane %v1848_v13, 4  ;;  %v1853_v10 = vrot.slane %v1851_v41, 5  ;;  %v1980_v49 = vshrl.u32 %v1915_v24, 16 }
 0x232   : > { %3161 = vmatmul.mubr.bf16.gmra.mrb[24].mxu1 %v6102_v36  ;;  %v4992_v36 = vld [vmem:[#allocation10 + $0x128] sm:$0xff]   ;;  %v1983_v19 = vshll.u32 %v1915_v24, 16  ;;  %v1976_v0 = vrot.slane %v1974_v26, 4  ;;  %v1565_v45 = vshrl.u32 %v1499_v47, 16  ;;  %v1561_v57 = vrot.slane %v1559_v31, 4 }
 0x233   : > { %3168 = vmatprep.mubr.bf16.mxu1 %v6092_v12  ;;  %4421 = vmatpush3.bf16.msra.mxu1 %v4988_v4  ;;  %v1971_v12 = vshrl.u32 %v1914_v59, 16  ;;  %v1568_v4 = vshll.u32 %v1499_v47, 16  ;;  %v5004_v59 = vld [vmem:[#allocation10 + $0x138] sm:$0xff]   ;;  %v1859_v9 = vrot.slane %v1857_v15, 4  ;;  %v1862_v63 = vrot.slane %v1860_v16, 5 }
 0x234   : > { %4422 = vmatprep.subr.bf16.mxu1 %v4991_v30  ;;  %4483 = vmatpush3.bf16.msra.mxu0 %v4996_v58  ;;  %v1558_v30 = vrot.slane %v1556_v32, 3  ;;  %v1907_v58 = vld [vmem:[#allocation2 + $0x48] sm:$0xf]  ;;  %v6322_v13 = vrot.slane %v6271_v5, 4  ;;  %v1982_v41 = vrot.slane %v1980_v49, 3  ;;  %v1985_v34 = vrot.slane %v1983_v19, 4 }
 0x235   : > { %4484 = vmatprep.subr.bf16.mxu0 %v4999_v61  ;;  %v1973_v62 = vrot.slane %v1971_v12, 3  ;;  %v6316_v61 = vrot.slane %v6116_v6, 4  ;;  %v1846_v12 = vsel %vm1411_vm6, %v6105_v44, %v1845_v52  ;;  %v1567_v24 = vrot.slane %v1565_v45, 3  ;;  %v5006_v32 = vld [vmem:[#allocation10 + $0x1b0] sm:$0xff]   ;;  %v5007_v16 = vld [vmem:[#allocation10 + $0x1f8] sm:$0xff]  }
 0x236   : > { %3258 = vmatmul.mubr.bf16.gmra.mrb[28].mxu0 %v6113_v1  ;;  %v5002_v1 = vld [vmem:[#allocation10 + $0x1a8] sm:$0xff]   ;;  %v1562_v31 = vor.u32 %v1561_v57, %v1558_v30  ;;  %v1916_v15 = vsel %vm1491_vm9, %v1907_v58, 0  ;;  %v1863_v44 = vor.u32 %v1862_v63, %v1859_v9  ;;  %v6359_v63 = vld [vmem:[#allocation2 + $0x10] sm:$0xff]  ;;  %v2193_v27 = vsel %vm1489_vm12, %v6290_v7, 0 }
 0x237   : > { %4423 = vmatpush3.bf16.msra.mxu1 %v4992_v36  ;;  %3265 = vmatprep.mubr.bf16.mxu0 %v6144_v40  ;;  %v5005_v40 = vld [vmem:[#allocation10 + $0x1f0] sm:$0xff]   ;;  %v1801_v36 = vsel %vm6900_vm13, %v6271_v5, 0  ;;  %v1977_v26 = vor.u32 %v1976_v0, %v1973_v62  ;;  %v6343_v62 = vor.u32 %v1985_v34, %v1982_v41  ;;  %vm1793_vm13 = vcmp.ne.s16.totalorder %v6279_v21, 0 }
 0x238   : > { %4424 = vmatprep.subr.bf16.mxu1 %v4997_v50  ;;  %4485 = vmatpush3.bf16.msra.mxu0 %v5000_v25  ;;  %v1354_v50 = vld [vmem:[#allocation2 + $0x40] sm:$0xf]  ;;  %v1570_v25 = vrot.slane %v1568_v4, 4  ;;  %v1866_v47 = vshrl.u32 %v1801_v36, 16  ;;  %v1992_v4 = vshll.u32 %v1916_v15, 16  ;;  %v1563_v30 = vsel %vm1501_vm7, %v6185_v23, %v1562_v31 }
 0x239   : > { %4486 = vmatprep.subr.bf16.mxu0 %v5001_v37  ;;  %v1869_v37 = vshll.u32 %v1801_v36, 16  ;;  %v1500_v49 = vsel %vm1491_vm9, %v1354_v50, 0  ;;  %v1978_v0 = vsel %vm1501_vm7, %v6160_v17, %v1977_v26  ;;  %v1987_v23 = vsel %vm1501_vm7, %v1977_v26, %v6343_v62 }
 0x23a   : > { %3169 = vmatmul.mubr.bf16.gmra.mrb[28].mxu1 %v6155_v55  ;;  %v1854_v55 = vor.u32 %v1853_v10, %v1850_v33  ;;  %v1631_v10 = vrot.slane %v1606_v28, 4  ;;  %v6349_v45 = vor.u32 %v1570_v25, %v1567_v24  ;;  %v1868_v57 = vrot.slane %v1866_v47, 4 }
 0x23b   : > { %3176 = vmatprep.mubr.bf16.mxu1 %v6135_v39  ;;  %4425 = vmatpush3.bf16.msra.mxu1 %v4998_v48  ;;  %v6324_v39 = vld [vmem:[#allocation10 + $0x200] sm:$0xff]   ;;  %v6981_v48 = vrot.slane %v6058_v38, 4  ;;  %v5008_v38 = vld [vmem:[#allocation10 + $0x1b8] sm:$0xff]   ;;  %v1871_v58 = vrot.slane %v1869_v37, 5  ;;  %v1577_v9 = vshll.u32 %v1500_v49, 16  ;;  %v1994_v50 = vrot.slane %v1992_v4, 4 }
 0x23c   : > { %4426 = vmatprep.subr.bf16.mxu1 %v5003_v46  ;;  %4487 = vmatpush3.bf16.msra.mxu0 %v5002_v1  ;;  %v1855_v19 = vsel %vm1411_vm6, %v1845_v52, %v1854_v55  ;;  %v6341_v46 = vsel %vm1061_vm10, %v6316_v61, %v6322_v13  ;;  %v1657_v52 = vld [vmem:[#allocation2 + $0x40] sm:$0x1f]  ;;  %v2064_v1 = vld [vmem:[#allocation2 + $0x8] sm:$0xf0]  ;;  %v6357_v17 = vsel %vm1061_vm10, %v6322_v13, %v1631_v10  ;;  %v2074_v26 = vsel %vm1786_vm8, %v6359_v63, 0 }
 0x23d   : > { %4488 = vmatprep.subr.bf16.mxu0 %v5005_v40  ;;  %v1628_v33 = vsel %vm1061_vm10, %v6981_v48, %v6316_v61  ;;  %v1864_v40 = vsel %vm1411_vm6, %v1854_v55, %v1863_v44  ;;  %v1802_v28 = vsel %vm1793_vm13, %v1657_v52, 0  ;;  %v2073_v36 = vsel %vm1785_vm3, %v2064_v1, 0 }
 0x23e   : > { %3266 = vmatmul.mubr.bf16.gmra.mrb[32].mxu0 %v1846_v12  ;;  %v6372_v41 = vsel %vm1501_vm7, %v1562_v31, %v6349_v45  ;;  %v6374_v8 = vor.u32 %v1871_v58, %v1868_v57  ;;  %v2192_v25 = vsel %vm1488_vm5, %v6271_v5, 0  ;;  %v1875_v47 = vshrl.u32 %v1802_v28, 16 }
 0x23f   : > { %4427 = vmatpush3.bf16.msra.mxu1 %v5004_v59  ;;  %3273 = vmatprep.mubr.bf16.mxu0 %v6181_v14  ;;  %v1989_v14 = vshrl.u32 %v1916_v15, 16  ;;  %v1574_v59 = vshrl.u32 %v1500_v49, 16  ;;  %v2083_v31 = vshrl.u32 %v2073_v36, 16  ;;  %v2086_v37 = vshll.u32 %v2073_v36, 16 }
 0x240   : > { %4656 = vmatprep.subr.bf16.mxu1 %v6324_v39  ;;  %4489 = vmatpush3.bf16.msra.mxu0 %v5006_v32  ;;  %v1579_v32 = vrot.slane %v1577_v9, 4  ;;  %v2241_v48 = vshrl.u32 %v2192_v25, 16  ;;  %v2091_v49 = vshrl.u32 %v2074_v26, 16  ;;  %v1878_v4 = vshll.u32 %v1802_v28, 16  ;;  %v6403_v28 = vld [vmem:[#allocation2 + $0x48] sm:$0xff] }
 0x241   : > { %4490 = vmatprep.subr.bf16.mxu0 %v5007_v16  ;;  %v1991_v34 = vrot.slane %v1989_v14, 3  ;;  %v1576_v24 = vrot.slane %v1574_v59, 3  ;;  %v6382_v14 = vld [vmem:[#allocation2 + $0x18] sm:$0xff]  ;;  %v6392_v57 = vrot.slane %v2083_v31, 4  ;;  %v2250_v58 = vshrl.u32 %v2193_v27, 16 }
 0x242   : > { %3177 = vmatmul.mubr.bf16.gmra.mrb[32].mxu1 %v6197_v35  ;;  %v2191_v35 = vsel %vm1487_vm2, %v6116_v6, 0  ;;  %v2253_v59 = vshll.u32 %v2193_v27, 16  ;;  %v6394_v9 = vrot.slane %v2086_v37, 5  ;;  %v2075_v56 = vsel %vm1787_vm14, %v6382_v14, 0 }
 0x243   : > { %3184 = vmatprep.mubr.bf16.mxu1 %v1628_v33  ;;  %v2232_v55 = vshrl.u32 %v2191_v35, 16  ;;  %v2235_v12 = vshll.u32 %v2191_v35, 16  ;;  %v2244_v33 = vshll.u32 %v2192_v25, 16  ;;  %v1995_v10 = vor.u32 %v1994_v50, %v1991_v34  ;;  %v6396_v35 = vld [vmem:[#allocation2 + $0x10] sm:$0xf0] }
 0x244   : > { %4491 = vmatpush3.bf16.msra.mxu0 %v5008_v38  ;;  %v2094_v38 = vshll.u32 %v2074_v26, 16  ;;  %v1580_v1 = vor.u32 %v1579_v32, %v1576_v24  ;;  %v2093_v36 = vrot.slane %v2091_v49, 4  ;;  %v2252_v34 = vrot.slane %v2250_v58, 3  ;;  %v2178_v25 = vld [vmem:[#allocation2 + $0x10] sm:$0xf8] }
 0x245   : > { %v2234_v15 = vrot.slane %v2232_v55, 3  ;;  %v2237_v16 = vrot.slane %v2235_v12, 4  ;;  %v2246_v52 = vrot.slane %v2244_v33, 4  ;;  %v2255_v50 = vrot.slane %v2253_v59, 4  ;;  %v2343_v49 = vld [vmem:[#allocation2 + $0x10] sm:$0xf0] }
 0x246   : > { %3274 = vmatmul.mubr.bf16.gmra.mrb[36].mxu0 %v1855_v19  ;;  %v6389_v19 = vsel %vm1411_vm6, %v1863_v44, %v6374_v8  ;;  %v2096_v55 = vrot.slane %v2094_v38, 5  ;;  %v1996_v12 = vsel %vm1501_vm7, %v6343_v62, %v1995_v10  ;;  %v6407_v24 = vrot.slane %v1875_v47, 4  ;;  %v2013_v59 = vld [vmem:[#allocation2 + $0x8] sm:$0xf0] }
 0x247   : > { %3281 = vmatprep.mubr.bf16.mxu0 %v1978_v0  ;;  %v2243_v0 = vrot.slane %v2241_v48, 3  ;;  %v6401_v44 = vor.u32 %v2237_v16, %v2234_v15  ;;  %v6409_v26 = vrot.slane %v1878_v4, 5  ;;  %v2310_v31 = vrot.slane %v6396_v35, 4  ;;  %v2186_v48 = vld [vmem:[#allocation2 + $0x50] sm:$0xf]  ;;  %v6983_v35 = vld [vmem:[#allocation29_spill] sm:$0xff] }
 0x248   : > { %v2100_v37 = vshrl.u32 %v2075_v56, 16  ;;  %v2256_v15 = vor.u32 %v2255_v50, %v2252_v34  ;;  %v2194_v16 = vsel %vm1490_vm4, %v6403_v28, 0  ;;  %v1581_v62 = vsel %vm1501_vm7, %v6349_v45, %v1580_v1 }
 0x249   : > { %v2103_v47 = vshll.u32 %v2075_v56, 16  ;;  %v2259_v33 = vshrl.u32 %v2194_v16, 16  ;;  %v2262_v10 = vshll.u32 %v2194_v16, 16  ;;  %v6423_v38 = vor.u32 %v2096_v55, %v2093_v36 }
 0x24a   : > { %3185 = vmatmul.mubr.bf16.gmra.mrb[36].mxu1 %v1563_v30  ;;  %v2247_v30 = vor.u32 %v2246_v52, %v2243_v0  ;;  %v6427_v27 = vsel %vm1483_vm15, %v2178_v25, 0  ;;  %v2188_v45 = vsel %vm1484_vm11, %v6382_v14, 0  ;;  %v2195_v0 = vsel %vm1491_vm9, %v2186_v48, 0  ;;  %v6438_v52 = vpop.f32.mrb[0].mxu1 }
 0x24b   : > { %3192 = vmatprep.mubr.bf16.mxu1 %v6341_v46  ;;  %v2264_v4 = vrot.slane %v2262_v10, 4  ;;  %v2102_v60 = vrot.slane %v2100_v37, 4  ;;  %v2268_v1 = vshrl.u32 %v2195_v0, 16  ;;  %v2352_v58 = vsel %vm1785_vm3, %v2343_v49, 0 }
 0x24c   : > { %v6413_v32 = vsel %vm1501_vm7, %v6401_v44, %v2247_v30  ;;  %v6430_v3 = vsel %vm1501_vm7, %v2247_v30, %v2256_v15  ;;  %v2105_v22 = vrot.slane %v2103_v47, 5  ;;  %v2353_v18 = vsel %vm1786_vm8, %v6382_v14, 0 }
 0x24d   : > { %v2362_v56 = vshrl.u32 %v2352_v58, 16  ;;  %v2270_v36 = vrot.slane %v2268_v1, 3  ;;  %v2365_v55 = vshll.u32 %v2352_v58, 16  ;;  %v2370_v34 = vshrl.u32 %v2353_v18, 16 }
 0x24e   : > { %3282 = vmatmul.mubr.bf16.gmra.mrb[40].mxu0 %v1864_v40  ;;  %v2089_v40 = vor.u32 %v6394_v9, %v6392_v57  ;;  %v2271_v57 = vshll.u32 %v2195_v0, 16  ;;  %v2205_v54 = vshrl.u32 %v2188_v45, 16  ;;  %v2373_v16 = vshll.u32 %v2353_v18, 16 }
 0x24f   : > { %3289 = vmatprep.mubr.bf16.mxu0 %v1987_v23  ;;  %v2261_v23 = vrot.slane %v2259_v33, 3  ;;  %v2364_v37 = vrot.slane %v2362_v56, 4  ;;  %v2208_v48 = vshll.u32 %v2188_v45, 16  ;;  %v2367_v47 = vrot.slane %v2365_v55, 5  ;;  %v2351_v55 = vld [vmem:[#allocation2 + $0x50] sm:$0x1f] }
 0x250   : > { %v2372_v33 = vrot.slane %v2370_v34, 4  ;;  %v1881_v10 = vor.u32 %v6409_v26, %v6407_v24  ;;  %v6459_v49 = vrot.slane %v6382_v14, 4  ;;  %v2197_v0 = vshrl.u32 %v6427_v27, 16 }
 0x251   : > { %v2265_v9 = vor.u32 %v2264_v4, %v2261_v23  ;;  %v2031_v23 = vrot.slane %v2013_v59, 4  ;;  %v2375_v4 = vrot.slane %v2373_v16, 5  ;;  %v2200_v1 = vshll.u32 %v6427_v27, 16 }
 0x252   : > { %3193 = vmatmul.mubr.bf16.gmra.mrb[40].mxu1 %v6372_v41  ;;  %v6443_v41 = vpop.f32.mrb[1].mxu1  ;;  %v2076_v14 = vsel %vm1788_vm1, %v6250_v53, 0  ;;  %v2368_v26 = vor.u32 %v2367_v47, %v2364_v37  ;;  %v2207_v58 = vrot.slane %v2205_v54, 3  ;;  %v2210_v59 = vrot.slane %v2208_v48, 4 }
 0x253   : > { %3200 = vmatprep.mubr.bf16.mxu1 %v6357_v17  ;;  %v6448_v30 = vpop.f32.mrb[2].mxu1  ;;  %v2273_v17 = vrot.slane %v2271_v57, 4  ;;  %v6453_v25 = vsel %vm1501_vm7, %v2256_v15, %v2265_v9  ;;  %v6901_v15 = vrot.slane %v6359_v63, 4  ;;  %v6472_v45 = vor.u32 %v2375_v4, %v2372_v33 }
 0x254   : > { %v6450_v50 = vpop.f32.mrb[3].mxu1  ;;  %v6474_v57 = vor.u32 %v2105_v22, %v2102_v60  ;;  %v2358_v27 = vsel %vm1791_vm0, %v6290_v7, 0  ;;  %v2109_v56 = vshrl.u32 %v2076_v14, 16  ;;  %v2199_v34 = vrot.slane %v2197_v0, 3 }
 0x255   : > { %v2274_v11 = vor.u32 %v2273_v17, %v2270_v36  ;;  %v6489_v60 = vsel %vm1411_vm6, %v2368_v26, %v6472_v45  ;;  %v2033_v18 = vsel %vm1061_vm10, %v2031_v23, %v6901_v15  ;;  %v2112_v36 = vshll.u32 %v2076_v14, 16 }
 0x256   : > { %3290 = vmatmul.mubr.bf16.gmra.mrb[44].mxu0 %v6389_v19  ;;  %v2415_v17 = vshrl.u32 %v2358_v27, 16  ;;  %vm6984_vm11 = vcmp.ne.s16.totalorder %v6983_v35, 0  ;;  %v2418_v54 = vshll.u32 %v2358_v27, 16  ;;  %vm6985_vm2 = vcmp.ne.s16.totalorder %v6301_v29, 0 }
 0x257   : > { %3297 = vmatprep.mubr.bf16.mxu0 %v1996_v12  ;;  %v6465_v19 = vsel %vm1501_vm7, %v2265_v9, %v2274_v11  ;;  %v2098_v12 = vsel %vm1411_vm6, %v2089_v40, %v6423_v38  ;;  %v1882_v40 = vsel %vm1411_vm6, %v6374_v8, %v1881_v10  ;;  %v2312_v9 = vsel %vm1061_vm10, %v2310_v31, %v6459_v49  ;;  %v5010_v10 = vld [vmem:[#allocation10 + $0x208] sm:$0xff]  }
 0x258   : > { %v2189_v31 = vsel %vm6984_vm11, %v6250_v53, 0  ;;  %v2359_v37 = vsel %vm6985_vm2, %v6403_v28, 0  ;;  %v2107_v48 = vsel %vm1411_vm6, %v6423_v38, %v6474_v57  ;;  %v2202_v11 = vrot.slane %v2200_v1, 4 }
 0x259   : > { %v2211_v47 = vor.u32 %v2210_v59, %v2207_v58  ;;  %vm6986_vm5 = vcmp.ne.s16.totalorder %v6235_v2, 0  ;;  %v2417_v23 = vrot.slane %v2415_v17, 4  ;;  %v2420_v4 = vrot.slane %v2418_v54, 5  ;;  %v5011_v54 = vld [vmem:[#allocation10 + $0x210] sm:$0xff]  }
 0x25a   : > { %3201 = vmatmul.mubr.bf16.gmra.mrb[44].mxu1 %v1581_v62  ;;  %v6479_v62 = vpop.f32.mrb[4].mxu1  ;;  %v2077_v33 = vsel %vm6986_vm5, %v6137_v43, 0  ;;  %v2424_v0 = vshrl.u32 %v2359_v37, 16  ;;  %v2111_v14 = vrot.slane %v2109_v56, 4  ;;  %v2114_v26 = vrot.slane %v2112_v36, 5 }
 0x25b   : > { %3338 = vmatprep.mubr.bf16.mxu1 %v2098_v12  ;;  %v6491_v22 = vpop.f32.mrb[5].mxu1  ;;  %v2427_v12 = vshll.u32 %v2359_v37, 16  ;;  %v2214_v27 = vshrl.u32 %v2189_v31, 16  ;;  %v2217_v38 = vshll.u32 %v2189_v31, 16  ;;  %v2203_v35 = vor.u32 %v2202_v11, %v2199_v34  ;;  %v6987_v34 = vld [vmem:[#allocation30_spill] sm:$0xff] }
 0x25c   : > { %v6496_v8 = vpop.f32.mrb[6].mxu1  ;;  %v2426_v1 = vrot.slane %v2424_v0, 4  ;;  %v2118_v56 = vshrl.u32 %v2077_v33, 16  ;;  %v6516_v36 = vor.u32 %v2420_v4, %v2417_v23  ;;  %v2121_v31 = vshll.u32 %v2077_v33, 16 }
 0x25d   : > { %v6504_v16 = vpop.f32.mrb[7].mxu1  ;;  %v2429_v58 = vrot.slane %v2427_v12, 5  ;;  %v2216_v12 = vrot.slane %v2214_v27, 3  ;;  %vm6988_vm15 = vcmp.ne.s16.totalorder %v6987_v34, 0  ;;  %v6989_v33 = vrot.slane %v6359_v63, 4 }
 0x25e   : > { %3298 = vmatmul.mubr.bf16.gmra.mrb[48].mxu0 %v1882_v40  ;;  %v2360_v40 = vsel %vm1793_vm13, %v2351_v55, 0  ;;  %v2115_v55 = vor.u32 %v2114_v26, %v2111_v14  ;;  %v5012_v14 = vld [vmem:[#allocation10 + $0x218] sm:$0xff]   ;;  %v2120_v26 = vrot.slane %v2118_v56, 4  ;;  %v2123_v27 = vrot.slane %v2121_v31, 5 }
 0x25f   : > { %3435 = vmatprep.mubr.bf16.mxu0 %v2312_v9  ;;  %v2433_v59 = vshrl.u32 %v2360_v40, 16  ;;  %v2313_v9 = vrot.slane %v6250_v53, 4  ;;  %v2436_v17 = vshll.u32 %v2360_v40, 16  ;;  %v2430_v37 = vor.u32 %v2429_v58, %v2426_v1 }
 0x260   : > { %v2035_v4 = vsel %vm1061_vm10, %v6989_v33, %v6459_v49  ;;  %v2116_v1 = vsel %vm1411_vm6, %v6474_v57, %v2115_v55  ;;  %v2315_v58 = vrot.slane %v6137_v43, 4  ;;  %vm6990_vm3 = vcmp.ne.s16.totalorder %v6256_v51, 0 }
 0x261   : > { %v2435_v15 = vrot.slane %v2433_v59, 4  ;;  %v2438_v0 = vrot.slane %v2436_v17, 5  ;;  %v6524_v53 = vsel %vm1411_vm6, %v6516_v36, %v2430_v37  ;;  %v2314_v11 = vsel %vm1061_vm10, %v6459_v49, %v2313_v9  ;;  %v5013_v49 = vld [vmem:[#allocation10 + $0x220] sm:$0xff]  }
 0x262   : > { %3339 = vmatmul.mubr.bf16.vlgmr.msra.gmra.mrb[48].mxu1 %v2033_v18  ;;  %v2212_v18 = vsel %vm1501_vm7, %v2203_v35, %v2211_v47  ;;  %v2078_v63 = vsel %vm6990_vm3, %v6116_v6, 0  ;;  %v2124_v59 = vor.u32 %v2123_v27, %v2120_v26  ;;  %v2316_v57 = vsel %vm1061_vm10, %v2313_v9, %v2315_v58  ;;  %v2072_v27 = vld [vmem:[#allocation2 + $0x48] sm:$0x1f] }
 0x263   : > { %3346 = vmatprep.mubr.bf16.mxu1 %v2107_v48  ;;  %4657 = vmatpush3.bf16.msra.mxu1 %v6324_v39  ;;  %v2219_v48 = vrot.slane %v2217_v38, 4  ;;  %v2190_v39 = vsel %vm6988_vm15, %v6137_v43, 0  ;;  %v2439_v23 = vor.u32 %v2438_v0, %v2435_v15  ;;  %v5014_v43 = vld [vmem:[#allocation10 + $0x228] sm:$0xff]   ;;  %v2321_v29 = vrot.slane %v6290_v7, 4 }
 0x264   : > { %4658 = vmatprep.subr.bf16.mxu1 %v5010_v10  ;;  %v2223_v40 = vshrl.u32 %v2190_v39, 16  ;;  %v2226_v15 = vshll.u32 %v2190_v39, 16 }
 0x265   : > { %v6533_v38 = vsel %vm1411_vm6, %v2430_v37, %v2439_v23  ;;  %v2127_v37 = vshrl.u32 %v2078_v63, 16 }
 0x266   : > { %3436 = vmatmul.mubr.bf16.vlgmr.msra.gmra.mrb[52].mxu0 %v2212_v18  ;;  %v2225_v35 = vrot.slane %v2223_v40, 3  ;;  %v2228_v56 = vrot.slane %v2226_v15, 4  ;;  %v2130_v18 = vshll.u32 %v2078_v63, 16  ;;  %v2081_v15 = vsel %vm1793_vm13, %v2072_v27, 0  ;;  %vm6993_vm13 = vmmov %vm6990_vm3 }
 0x267   : > { %4659 = vmatpush3.bf16.msra.mxu1 %v5010_v10  ;;  %3443 = vmatprep.mubr.bf16.mxu0 %v2314_v11  ;;  %v2220_v10 = vor.u32 %v2219_v48, %v2216_v12  ;;  %v2129_v31 = vrot.slane %v2127_v37, 4  ;;  %v5015_v12 = vld [vmem:[#allocation10 + $0x230] sm:$0xff]   ;;  %v2157_v63 = vshll.u32 %v2081_v15, 16  ;;  %v2345_v37 = vld [vmem:[#allocation2 + $0x20] sm:$0xff] }
 0x268   : > { %4660 = vmatprep.subr.bf16.mxu1 %v5011_v54  ;;  %v2229_v6 = vor.u32 %v2228_v56, %v2225_v35  ;;  %v2132_v0 = vrot.slane %v2130_v18, 5  ;;  %v2346_v18 = vld [vmem:[#allocation2 + $0x28] sm:$0xff] }
 0x269   : > { %v2221_v17 = vsel %vm1501_vm7, %v2211_v47, %v2220_v10  ;;  %v2079_v47 = vsel %vm1791_vm0, %v6271_v5, 0  ;;  %vm6991_vm0 = vmmov %vm6985_vm2 }
 0x26a   : > { %3347 = vmatmul.mubr.bf16.gmra.mrb[52].mxu1 %v2035_v4  ;;  %v2230_v9 = vsel %vm1501_vm7, %v2220_v10, %v2229_v6  ;;  %v2133_v48 = vor.u32 %v2132_v0, %v2129_v31  ;;  %v2136_v34 = vshrl.u32 %v2079_v47, 16  ;;  %v2139_v39 = vshll.u32 %v2079_v47, 16 }
 0x26b   : > { %3354 = vmatprep.mubr.bf16.mxu1 %v2116_v1  ;;  %4661 = vmatpush3.bf16.msra.mxu1 %v5011_v54  ;;  %v2125_v54 = vsel %vm1411_vm6, %v2115_v55, %v2124_v59  ;;  %v2318_v55 = vsel %vm1061_vm10, %v2315_v58, %v6316_v61  ;;  %v2080_v33 = vsel %vm6991_vm0, %v6290_v7, 0  ;;  %v2239_v4 = vsel %vm1501_vm7, %v2229_v6, %v6401_v44  ;;  %vm6992_vm7 = vmmov %vm6986_vm5 }
 0x26c   : > { %4662 = vmatprep.subr.bf16.mxu1 %v5012_v14  ;;  %v2134_v20 = vsel %vm1411_vm6, %v2124_v59, %v2133_v48  ;;  %v2138_v5 = vrot.slane %v2136_v34, 4  ;;  %v2141_v23 = vrot.slane %v2139_v39, 5  ;;  %v2148_v26 = vshll.u32 %v2080_v33, 16 }
 0x26d   : > { %v2154_v58 = vshrl.u32 %v2081_v15, 16  ;;  %v2323_v7 = vrot.slane %v6403_v28, 4  ;;  %v2355_v28 = vsel %vm1788_vm1, %v2346_v18, 0  ;;  %v5019_v15 = vld [vmem:[#allocation12 + $0x10] sm:$0xff]  }
 0x26e   : > { %3444 = vmatmul.mubr.bf16.gmra.mrb[56].mxu0 %v2221_v17  ;;  %v2142_v61 = vor.u32 %v2141_v23, %v2138_v5  ;;  %v2150_v10 = vrot.slane %v2148_v26, 5  ;;  %v2159_v17 = vrot.slane %v2157_v63, 5  ;;  %v2388_v6 = vshrl.u32 %v2355_v28, 16  ;;  %v6595_v63 = vld [vmem:[%s6994_s13] ss:$0 sm:$0xff] }
 0x26f   : > { %4663 = vmatpush3.bf16.msra.mxu1 %v5012_v14  ;;  %3451 = vmatprep.mubr.bf16.mxu0 %v2316_v57  ;;  %v2145_v14 = vshrl.u32 %v2080_v33, 16  ;;  %v2156_v35 = vrot.slane %v2154_v58, 4  ;;  %v2324_v56 = vsel %vm1061_vm10, %v2321_v29, %v2323_v7  ;;  %v2391_v31 = vshll.u32 %v2355_v28, 16  ;;  %v5022_v58 = vld [vmem:[#allocation12 + $0x28] sm:$0xff]   ;;  %v5024_v28 = vld [vmem:[#allocation12 + $0x38] sm:$0xff]  }
 0x270   : > { %4664 = vmatprep.subr.bf16.mxu1 %v5013_v49  ;;  %v2143_v40 = vsel %vm1411_vm6, %v2133_v48, %v2142_v61  ;;  %v2390_v24 = vrot.slane %v2388_v6, 4 }
 0x271   : > { %v2147_v1 = vrot.slane %v2145_v14, 4  ;;  %v2160_v21 = vor.u32 %v2159_v17, %v2156_v35  ;;  %v2393_v39 = vrot.slane %v2391_v31, 5 }
 0x272   : > { %3355 = vmatmul.mubr.bf16.gmra.mrb[56].mxu1 %v2314_v11  ;;  %v5016_v11 = vld [vmem:[#allocation10 + $0x238] sm:$0xff]  }
 0x273   : > { %3362 = vmatprep.mubr.bf16.mxu1 %v2125_v54  ;;  %4665 = vmatpush3.bf16.msra.mxu1 %v5013_v49  ;;  %v2151_v44 = vor.u32 %v2150_v10, %v2147_v1  ;;  %v2322_v49 = vsel %vm1061_vm10, %v6322_v13, %v2321_v29  ;;  %v2394_v23 = vor.u32 %v2393_v39, %v2390_v24 }
 0x274   : > { %4666 = vmatprep.subr.bf16.mxu1 %v5014_v43 }
 0x275   : > { %v2152_v59 = vsel %vm1411_vm6, %v2142_v61, %v2151_v44  ;;  %v2161_v13 = vsel %vm1411_vm6, %v2151_v44, %v2160_v21 }
 0x276   : > { %3452 = vmatmul.mubr.bf16.gmra.mrb[60].mxu0 %v2230_v9  ;;  %v2348_v9 = vld [vmem:[#allocation2 + $0x38] sm:$0xff] }
 0x277   : > { %4667 = vmatpush3.bf16.msra.mxu1 %v5014_v43  ;;  %3459 = vmatprep.mubr.bf16.mxu0 %v2318_v55  ;;  %v2021_v43 = vld [vmem:[#allocation2 + $0x48] sm:$0xf] }
 0x278   : > { %4668 = vmatprep.subr.bf16.mxu1 %v5015_v12  ;;  %v2046_v47 = vrot.slane %v2021_v43, 4 }
 0x27a   : > { %3363 = vmatmul.mubr.bf16.gmra.mrb[60].mxu1 %v2316_v57  ;;  %v2047_v42 = vsel %vm1061_vm10, %v2321_v29, %v2046_v47  ;;  %v5018_v29 = vld [vmem:[#allocation12 + $0x8] sm:$0xff]  }
 0x27b   : > { %3370 = vmatprep.mubr.bf16.mxu1 %v2134_v20  ;;  %4669 = vmatpush3.bf16.msra.mxu1 %v5015_v12  ;;  %v2347_v12 = vld [vmem:[#allocation2 + $0x30] sm:$0xff] }
 0x27c   : > { %4670 = vmatprep.subr.bf16.mxu1 %v5016_v11 }
 0x27e   : > { %3460 = vmatmul.mubr.bf16.gmra.mrb[64].mxu0 %v2239_v4 }
 0x27f   : > { %4671 = vmatpush3.bf16.msra.mxu1 %v5016_v11  ;;  %3467 = vmatprep.mubr.bf16.mxu0 %v6341_v46 }
 0x282   : > { %3371 = vmatmul.mubr.bf16.gmra.mrb[64].mxu1 %v2318_v55  ;;  %v2356_v55 = vsel %vm6992_vm7, %v2347_v12, 0 }
 0x283   : > { %3378 = vmatprep.mubr.bf16.mxu1 %v2143_v40  ;;  %v2397_v20 = vshrl.u32 %v2356_v55, 16  ;;  %v2400_v5 = vshll.u32 %v2356_v55, 16 }
 0x285   : > { %v2399_v14 = vrot.slane %v2397_v20, 4  ;;  %v2402_v26 = vrot.slane %v2400_v5, 5 }
 0x286   : > { %3468 = vmatmul.mubr.bf16.gmra.mrb[68].mxu0 %v6413_v32  ;;  %v2300_v32 = vld [vmem:[#allocation2 + $0x50] sm:$0xf] }
 0x287   : > { %3475 = vmatprep.mubr.bf16.mxu0 %v2322_v49  ;;  %v2325_v57 = vrot.slane %v2300_v32, 4  ;;  %v2403_v51 = vor.u32 %v2402_v26, %v2399_v14 }
 0x289   : > { %v2326_v0 = vsel %vm1061_vm10, %v2323_v7, %v2325_v57  ;;  %v2404_v1 = vsel %vm1411_vm6, %v2394_v23, %v2403_v51  ;;  %v5023_v57 = vld [vmem:[#allocation12 + $0x30] sm:$0xff]  }
 0x28a   : > { %3379 = vmatmul.mubr.bf16.gmra.mrb[68].mxu1 %v6341_v46  ;;  %v2354_v46 = vsel %vm1787_vm14, %v2345_v37, 0 }
 0x28b   : > { %3386 = vmatprep.mubr.bf16.mxu1 %v2152_v59  ;;  %v2379_v54 = vshrl.u32 %v2354_v46, 16 }
 0x28d   : > { %v2381_v48 = vrot.slane %v2379_v54, 4 }
 0x28e   : > { %3476 = vmatmul.mubr.bf16.gmra.mrb[72].mxu0 %v6430_v3  ;;  %v2382_v3 = vshll.u32 %v2354_v46, 16 }
 0x28f   : > { %3483 = vmatprep.mubr.bf16.mxu0 %v2324_v56 }
 0x290   : > { %v2384_v34 = vrot.slane %v2382_v3, 5 }
 0x292   : > { %3387 = vmatmul.mubr.bf16.gmra.mrb[72].mxu1 %v2322_v49  ;;  %v2385_v11 = vor.u32 %v2384_v34, %v2381_v48 }
 0x293   : > { %3394 = vmatprep.mubr.bf16.mxu1 %v2161_v13 }
 0x294   : > { %v2386_v61 = vsel %vm1411_vm6, %v6472_v45, %v2385_v11  ;;  %v2395_v2 = vsel %vm1411_vm6, %v2385_v11, %v2394_v23  ;;  %v5017_v45 = vld [vmem:[#allocation12] sm:$0xff]  }
 0x295   : > { %4688 = vmatprep.subr.bf16.mxu0 %v5017_v45  ;;  %4720 = vmatprep.subr.bf16.mxu1 %v5017_v45 }
 0x296   : > { %3484 = vmatmul.mubr.bf16.gmra.mrb[76].mxu0 %v6453_v25  ;;  %v2357_v25 = vsel %vm6993_vm13, %v2348_v9, 0 }
 0x297   : > { %3491 = vmatprep.mubr.bf16.mxu0 %v2326_v0  ;;  %v2406_v33 = vshrl.u32 %v2357_v25, 16  ;;  %v2409_v4 = vshll.u32 %v2357_v25, 16  ;;  %4689 = vmatpush3.bf16.msra.mxu0 %v5017_v45 }
 0x298   : > { %4690 = vmatprep.subr.bf16.mxu0 %v5018_v29 }
 0x299   : > { %v2411_v27 = vrot.slane %v2409_v4, 5 }
 0x29a   : > { %3395 = vmatmul.mubr.bf16.gmra.mrb[76].mxu1 %v2047_v42 }
 0x29b   : > { %4672 = vmatprep.mubr.bf16.mxu1 %v6489_v60  ;;  %v2408_v60 = vrot.slane %v2406_v33, 4  ;;  %4691 = vmatpush3.bf16.msra.mxu0 %v5018_v29 }
 0x29c   : > { %4692 = vmatprep.subr.bf16.mxu0 %v5019_v15 }
 0x29d   : > { %v2412_v40 = vor.u32 %v2411_v27, %v2408_v60 }
 0x29e   : > { %3492 = vmatmul.mubr.bf16.gmra.mrb[80].mxu0 %v6465_v19 }
 0x29f   : > { %v2413_v10 = vsel %vm1411_vm6, %v2403_v51, %v2412_v40  ;;  %v2422_v19 = vsel %vm1411_vm6, %v2412_v40, %v6516_v36  ;;  %4693 = vmatpush3.bf16.msra.mxu0 %v5019_v15  ;;  %v5020_v36 = vld [vmem:[#allocation12 + $0x18] sm:$0xff]  }
 0x2a0   : > { %4694 = vmatprep.subr.bf16.mxu0 %v5020_v36 }
 0x2a2   : > { %4673 = vmatmul.mubr.bf16.vlgmr.msra.gmra.mrb[80].mxu1 %v2386_v61 }
 0x2a3   : > { %4676 = vmatprep.mubr.bf16.mxu1 %v2395_v2  ;;  %4728 = vmatpush3.bf16.msra.mxu1 %v5017_v45 }
 0x2a4   : > { %4721 = vmatprep.subr.bf16.mxu1 %v5018_v29  ;;  %4695 = vmatpush3.bf16.msra.mxu0 %v5020_v36 }
 0x2a7   : > { %4729 = vmatpush3.bf16.msra.mxu1 %v5018_v29 }
 0x2a8   : > { %4722 = vmatprep.subr.bf16.mxu1 %v5019_v15 }
 0x2aa   : > { %4677 = vmatmul.mubr.bf16.gmra.mrb[84].mxu1 %v2404_v1 }
 0x2ab   : > { %4680 = vmatprep.mubr.bf16.mxu1 %v2413_v10  ;;  %4730 = vmatpush3.bf16.msra.mxu1 %v5019_v15 }
 0x2ac   : > { %4723 = vmatprep.subr.bf16.mxu1 %v5020_v36 }
 0x2af   : > { %4731 = vmatpush3.bf16.msra.mxu1 %v5020_v36 }
 0x2b2   : > { %4681 = vmatmul.mubr.bf16.gmra.mrb[88].mxu1 %v2422_v19 }
 0x2b3   : > { %4684 = vmatprep.mubr.bf16.mxu1 %v6524_v53  ;;  %v5021_v53 = vld [vmem:[#allocation12 + $0x20] sm:$0xff]  }
 0x2b4   : > { %4696 = vmatprep.subr.bf16.mxu0 %v5021_v53  ;;  %4724 = vmatprep.subr.bf16.mxu1 %v5021_v53 }
 0x2b5   : > { %4697 = vmatpush3.bf16.msra.mxu0 %v5021_v53  ;;  %4732 = vmatpush3.bf16.msra.mxu1 %v5021_v53 }
 0x2b6   : > { %4698 = vmatprep.subr.bf16.mxu0 %v5022_v58  ;;  %4725 = vmatprep.subr.bf16.mxu1 %v5022_v58 }
 0x2b9   : > { %4699 = vmatpush3.bf16.msra.mxu0 %v5022_v58  ;;  %4733 = vmatpush3.bf16.msra.mxu1 %v5022_v58 }
 0x2ba   : > { %4685 = vmatmul.mubr.bf16.gmra.mrb[92].mxu1 %v6533_v38  ;;  %4700 = vmatprep.subr.bf16.mxu0 %v5023_v57 }
 0x2bb   : > { %4726 = vmatprep.subr.bf16.mxu1 %v5023_v57 }
 0x2bd   : > { %4701 = vmatpush3.bf16.msra.mxu0 %v5023_v57  ;;  %4734 = vmatpush3.bf16.msra.mxu1 %v5023_v57 }
 0x2be   : > { %4702 = vmatprep.subr.bf16.mxu0 %v5024_v28  ;;  %4727 = vmatprep.subr.bf16.mxu1 %v5024_v28 }
 0x2c1   : > { %4703 = vmatpush3.bf16.msra.mxu0 %v5024_v28  ;;  %4735 = vmatpush3.bf16.msra.mxu1 %v5024_v28 }
 0x2f5   : > { %v4300_v38 = vpop.f32.mrb[16].mxu1 }
 0x2f6   : > { %v4301_v44 = vpop.f32.mrb[17].mxu1 }
 0x2f7   : > { %v4302_v49 = vadd.f32 %v4301_v44, %v4300_v38  ;;  %v4303_v59 = vpop.f32.mrb[18].mxu1 }
 0x2f8   : > { %v4304_v35 = vpop.f32.mrb[19].mxu1 }
 0x2f9   : > { %v4305_v17 = vadd.f32 %v4304_v35, %v4303_v59  ;;  %v3147_v7 = vadd.f32 %v4302_v49, %v6595_v63  ;;  %v4364_v21 = vpop.f32.mrb[20].mxu0 }
 0x2fa   : > { %v4365_v56 = vpop.f32.mrb[21].mxu0 }
 0x2fb   : > { %v4366_v37 = vadd.f32 %v4365_v56, %v4364_v21  ;;  %v3150_v32 = vadd.f32 %v4305_v17, %v6595_v63  ;;  %v4367_v18 = vpop.f32.mrb[22].mxu0 }
 0x2fc   : > { %v4368_v13 = vpop.f32.mrb[23].mxu0 }
 0x2fd   : > { %v4306_v46 = vpop.f32.mrb[20].mxu1  ;;  %v6599_v43 = vadd.f32 %v4366_v37, %v3147_v7  ;;  %v4369_v54 = vadd.f32 %v4368_v13, %v4367_v18 }
 0x2fe   : > { %v4307_v3 = vpop.f32.mrb[21].mxu1 }
 0x2ff   : > { %v4308_v6 = vadd.f32 %v4307_v3, %v4306_v46  ;;  %v4309_v31 = vpop.f32.mrb[22].mxu1  ;;  %v6601_v0 = vadd.f32 %v4369_v54, %v3150_v32 }
 0x300   : > { %v4310_v47 = vpop.f32.mrb[23].mxu1 }
 0x301   : > { %v4311_v12 = vadd.f32 %v4310_v47, %v4309_v31  ;;  %v3155_v9 = vadd.f32 %v4308_v6, %v6595_v63  ;;  %v4370_v42 = vpop.f32.mrb[24].mxu0 }
 0x302   : > { %v4371_v48 = vpop.f32.mrb[25].mxu0 }
 0x303   : > { %v4372_v34 = vadd.f32 %v4371_v48, %v4370_v42  ;;  %v3158_v24 = vadd.f32 %v4311_v12, %v6595_v63  ;;  %v4373_v39 = vpop.f32.mrb[26].mxu0 }
 0x304   : > { %v4374_v55 = vpop.f32.mrb[27].mxu0 }
 0x305   : > { %v4312_v25 = vpop.f32.mrb[24].mxu1  ;;  %v6605_v11 = vadd.f32 %v4372_v34, %v3155_v9  ;;  %v4375_v20 = vadd.f32 %v4374_v55, %v4373_v39 }
 0x306   : > { %v4313_v5 = vpop.f32.mrb[25].mxu1 }
 0x307   : > { %v4314_v23 = vadd.f32 %v4313_v5, %v4312_v25  ;;  %v4315_v33 = vpop.f32.mrb[26].mxu1  ;;  %v6607_v4 = vadd.f32 %v4375_v20, %v3158_v24 }
 0x308   : > { %v4316_v61 = vpop.f32.mrb[27].mxu1 }
 0x309   : > { %v4317_v14 = vadd.f32 %v4316_v61, %v4315_v33  ;;  %v3163_v26 = vadd.f32 %v4314_v23, %v6595_v63  ;;  %v4376_v2 = vpop.f32.mrb[28].mxu0 }
 0x30a   : > { %v4377_v60 = vpop.f32.mrb[29].mxu0 }
 0x30b   : > { %v4378_v27 = vadd.f32 %v4377_v60, %v4376_v2  ;;  %v3166_v51 = vadd.f32 %v4317_v14, %v6595_v63  ;;  %v4379_v40 = vpop.f32.mrb[30].mxu0 }
 0x30c   : > { %v4380_v1 = vpop.f32.mrb[31].mxu0 }
 0x30d   : > { %v4318_v10 = vpop.f32.mrb[28].mxu1  ;;  %v6611_v19 = vadd.f32 %v4378_v27, %v3163_v26  ;;  %v4381_v45 = vadd.f32 %v4380_v1, %v4379_v40 }
 0x30e   : > { %v4319_v29 = vpop.f32.mrb[29].mxu1 }
 0x30f   : > { %v4320_v15 = vadd.f32 %v4319_v29, %v4318_v10  ;;  %v4321_v36 = vpop.f32.mrb[30].mxu1  ;;  %v6613_v53 = vadd.f32 %v4381_v45, %v3166_v51 }
 0x310   : > { %v4322_v38 = vpop.f32.mrb[31].mxu1 }
 0x311   : > { %v4323_v44 = vadd.f32 %v4322_v38, %v4321_v36  ;;  %v3171_v58 = vadd.f32 %v4320_v15, %v6595_v63  ;;  %v4382_v49 = vpop.f32.mrb[32].mxu0 }
 0x312   : > { %v4383_v59 = vpop.f32.mrb[33].mxu0 }
 0x313   : > { %v4384_v35 = vadd.f32 %v4383_v59, %v4382_v49  ;;  %v3174_v17 = vadd.f32 %v4323_v44, %v6595_v63  ;;  %v4385_v7 = vpop.f32.mrb[34].mxu0 }
 0x314   : > { %v4386_v21 = vpop.f32.mrb[35].mxu0 }
 0x315   : > { %v4324_v56 = vpop.f32.mrb[32].mxu1  ;;  %v6617_v37 = vadd.f32 %v4384_v35, %v3171_v58  ;;  %v4387_v32 = vadd.f32 %v4386_v21, %v4385_v7 }
 0x316   : > { %v4325_v18 = vpop.f32.mrb[33].mxu1 }
 0x317   : > { %v4326_v13 = vadd.f32 %v4325_v18, %v4324_v56  ;;  %v4327_v46 = vpop.f32.mrb[34].mxu1  ;;  %v6619_v57 = vadd.f32 %v4387_v32, %v3174_v17 }
 0x318   : > { %v4328_v28 = vpop.f32.mrb[35].mxu1 }
 0x319   : > { %v4329_v54 = vadd.f32 %v4328_v28, %v4327_v46  ;;  %v3179_v3 = vadd.f32 %v4326_v13, %v6595_v63  ;;  %v4388_v6 = vpop.f32.mrb[36].mxu0 }
 0x31a   : > { %v4389_v31 = vpop.f32.mrb[37].mxu0 }
 0x31b   : > { %v4390_v47 = vadd.f32 %v4389_v31, %v4388_v6  ;;  %v3182_v12 = vadd.f32 %v4329_v54, %v6595_v63  ;;  %v4391_v9 = vpop.f32.mrb[38].mxu0 }
 0x31c   : > { %v4392_v42 = vpop.f32.mrb[39].mxu0 }
 0x31d   : > { %v4330_v48 = vpop.f32.mrb[36].mxu1  ;;  %v6623_v34 = vadd.f32 %v4390_v47, %v3179_v3  ;;  %v4393_v24 = vadd.f32 %v4392_v42, %v4391_v9 }
 0x31e   : > { %v4331_v39 = vpop.f32.mrb[37].mxu1 }
 0x31f   : > { %v4332_v55 = vadd.f32 %v4331_v39, %v4330_v48  ;;  %v4333_v25 = vpop.f32.mrb[38].mxu1  ;;  %v6625_v20 = vadd.f32 %v4393_v24, %v3182_v12 }
 0x320   : > { %v4334_v5 = vpop.f32.mrb[39].mxu1 }
 0x321   : > { %v4335_v23 = vadd.f32 %v4334_v5, %v4333_v25  ;;  %v3187_v33 = vadd.f32 %v4332_v55, %v6595_v63  ;;  %v4394_v61 = vpop.f32.mrb[40].mxu0 }
 0x322   : > { %v4395_v14 = vpop.f32.mrb[41].mxu0 }
 0x323   : > { %v4396_v26 = vadd.f32 %v4395_v14, %v4394_v61  ;;  %v3190_v2 = vadd.f32 %v4335_v23, %v6595_v63  ;;  %v4397_v60 = vpop.f32.mrb[42].mxu0 }
 0x324   : > { %v4398_v27 = vpop.f32.mrb[43].mxu0 }
 0x325   : > { %v4336_v51 = vpop.f32.mrb[40].mxu1  ;;  %v6629_v40 = vadd.f32 %v4396_v26, %v3187_v33  ;;  %v4399_v1 = vadd.f32 %v4398_v27, %v4397_v60 }
 0x326   : > { %v4337_v10 = vpop.f32.mrb[41].mxu1 }
 0x327   : > { %v4338_v45 = vadd.f32 %v4337_v10, %v4336_v51  ;;  %v4339_v29 = vpop.f32.mrb[42].mxu1  ;;  %v6631_v15 = vadd.f32 %v4399_v1, %v3190_v2 }
 0x328   : > { %v4340_v36 = vpop.f32.mrb[43].mxu1 }
 0x329   : > { %v4341_v38 = vadd.f32 %v4340_v36, %v4339_v29  ;;  %v3195_v44 = vadd.f32 %v4338_v45, %v6595_v63  ;;  %v4400_v58 = vpop.f32.mrb[44].mxu0 }
 0x32a   : > { %v4401_v49 = vpop.f32.mrb[45].mxu0 }
 0x32b   : > { %v4402_v59 = vadd.f32 %v4401_v49, %v4400_v58  ;;  %v3198_v35 = vadd.f32 %v4341_v38, %v6595_v63  ;;  %v4403_v17 = vpop.f32.mrb[46].mxu0 }
 0x32c   : > { %v4404_v7 = vpop.f32.mrb[47].mxu0 }
 0x32d   : > { %v4342_v21 = vpop.f32.mrb[44].mxu1  ;;  %v6635_v56 = vadd.f32 %v4402_v59, %v3195_v44  ;;  %v4405_v32 = vadd.f32 %v4404_v7, %v4403_v17 }
 0x32e   : > { %v4343_v18 = vpop.f32.mrb[45].mxu1 }
 0x32f   : > { %v4344_v13 = vadd.f32 %v4343_v18, %v4342_v21  ;;  %v4345_v46 = vpop.f32.mrb[46].mxu1  ;;  %v6637_v28 = vadd.f32 %v4405_v32, %v3198_v35 }
 0x330   : > { %v4346_v54 = vpop.f32.mrb[47].mxu1 }
 0x331   : > { %v4347_v3 = vadd.f32 %v4346_v54, %v4345_v46  ;;  %v3203_v6 = vadd.f32 %v4344_v13, %v6595_v63  ;;  %v4406_v31 = vpop.f32.mrb[48].mxu0 }
 0x332   : > { %v4407_v47 = vpop.f32.mrb[49].mxu0 }
 0x333   : > { %v4408_v12 = vadd.f32 %v4407_v47, %v4406_v31  ;;  %v3206_v9 = vadd.f32 %v4347_v3, %v6595_v63  ;;  %v4409_v42 = vpop.f32.mrb[50].mxu0 }
 0x334   : > { %v4410_v48 = vpop.f32.mrb[51].mxu0 }
 0x335   : > { %v4428_v24 = vpop.f32.mrb[48].mxu1  ;;  %v6641_v39 = vadd.f32 %v4408_v12, %v3203_v6  ;;  %v4411_v55 = vadd.f32 %v4410_v48, %v4409_v42 }
 0x336   : > { %v4429_v25 = vpop.f32.mrb[49].mxu1 }
 0x337   : > { %v4430_v5 = vadd.f32 %v4429_v25, %v4428_v24  ;;  %v4431_v23 = vpop.f32.mrb[50].mxu1  ;;  %v6643_v33 = vadd.f32 %v4411_v55, %v3206_v9 }
 0x338   : > { %v4432_v61 = vpop.f32.mrb[51].mxu1 }
 0x339   : > { %v3341_v14 = vadd.f32 %v4430_v5, %v6599_v43  ;;  %v4433_v26 = vadd.f32 %v4432_v61, %v4431_v23  ;;  %v4492_v2 = vpop.f32.mrb[52].mxu0 }
 0x33a   : > { %v4493_v60 = vpop.f32.mrb[53].mxu0 }
 0x33b   : > { %v3344_v27 = vadd.f32 %v4433_v26, %v6601_v0  ;;  %v4494_v63 = vadd.f32 %v4493_v60, %v4492_v2  ;;  %v4495_v51 = vpop.f32.mrb[54].mxu0 }
 0x33c   : > { %v4496_v1 = vpop.f32.mrb[55].mxu0 }
 0x33d   : > { %v4434_v10 = vpop.f32.mrb[52].mxu1  ;;  %v4497_v45 = vadd.f32 %v4496_v1, %v4495_v51  ;;  %v6647_v36 = vadd.f32 %v4494_v63, %v3341_v14 }
 0x33e   : > { %v4435_v29 = vpop.f32.mrb[53].mxu1 }
 0x33f   : > { %v4436_v38 = vadd.f32 %v4435_v29, %v4434_v10  ;;  %v4437_v44 = vpop.f32.mrb[54].mxu1  ;;  %v6649_v49 = vadd.f32 %v4497_v45, %v3344_v27 }
 0x340   : > { %v4438_v58 = vpop.f32.mrb[55].mxu1 }
 0x341   : > { %v3349_v43 = vadd.f32 %v4436_v38, %v6605_v11  ;;  %v4439_v59 = vadd.f32 %v4438_v58, %v4437_v44  ;;  %v4498_v35 = vpop.f32.mrb[56].mxu0 }
 0x342   : > { %v4499_v17 = vpop.f32.mrb[57].mxu0 }
 0x343   : > { %v3352_v0 = vadd.f32 %v4439_v59, %v6607_v4  ;;  %v4500_v7 = vadd.f32 %v4499_v17, %v4498_v35  ;;  %v4501_v21 = vpop.f32.mrb[58].mxu0 }
 0x344   : > { %v4502_v32 = vpop.f32.mrb[59].mxu0 }
 0x345   : > { %v4440_v18 = vpop.f32.mrb[56].mxu1  ;;  %v4503_v13 = vadd.f32 %v4502_v32, %v4501_v21  ;;  %v6653_v54 = vadd.f32 %v4500_v7, %v3349_v43 }
 0x346   : > { %v4441_v46 = vpop.f32.mrb[57].mxu1 }
 0x347   : > { %v4442_v3 = vadd.f32 %v4441_v46, %v4440_v18  ;;  %v4443_v6 = vpop.f32.mrb[58].mxu1  ;;  %v6655_v47 = vadd.f32 %v4503_v13, %v3352_v0 }
 0x348   : > { %v4444_v31 = vpop.f32.mrb[59].mxu1 }
 0x349   : > { %v3357_v11 = vadd.f32 %v4442_v3, %v6611_v19  ;;  %v4445_v12 = vadd.f32 %v4444_v31, %v4443_v6  ;;  %v4504_v9 = vpop.f32.mrb[60].mxu0 }
 0x34a   : > { %v4505_v42 = vpop.f32.mrb[61].mxu0 }
 0x34b   : > { %v3360_v4 = vadd.f32 %v4445_v12, %v6613_v53  ;;  %v4506_v48 = vadd.f32 %v4505_v42, %v4504_v9  ;;  %v4507_v24 = vpop.f32.mrb[62].mxu0 }
 0x34c   : > { %v4508_v55 = vpop.f32.mrb[63].mxu0 }
 0x34d   : > { %v4446_v25 = vpop.f32.mrb[60].mxu1  ;;  %v4509_v5 = vadd.f32 %v4508_v55, %v4507_v24  ;;  %v6659_v61 = vadd.f32 %v4506_v48, %v3357_v11 }
 0x34e   : > { %v4447_v23 = vpop.f32.mrb[61].mxu1 }
 0x34f   : > { %v4448_v14 = vadd.f32 %v4447_v23, %v4446_v25  ;;  %v4449_v26 = vpop.f32.mrb[62].mxu1  ;;  %v6661_v60 = vadd.f32 %v4509_v5, %v3360_v4 }
 0x350   : > { %v4450_v2 = vpop.f32.mrb[63].mxu1 }
 0x351   : > { %v3365_v19 = vadd.f32 %v4448_v14, %v6617_v37  ;;  %v4451_v27 = vadd.f32 %v4450_v2, %v4449_v26  ;;  %v4510_v63 = vpop.f32.mrb[64].mxu0 }
 0x352   : > { %v4511_v51 = vpop.f32.mrb[65].mxu0 }
 0x353   : > { %v3368_v53 = vadd.f32 %v4451_v27, %v6619_v57  ;;  %v4512_v1 = vadd.f32 %v4511_v51, %v4510_v63  ;;  %v4513_v10 = vpop.f32.mrb[66].mxu0 }
 0x354   : > { %v4514_v45 = vpop.f32.mrb[67].mxu0 }
 0x355   : > { %v4452_v29 = vpop.f32.mrb[64].mxu1  ;;  %v4515_v38 = vadd.f32 %v4514_v45, %v4513_v10  ;;  %v6665_v58 = vadd.f32 %v4512_v1, %v3365_v19 }
 0x356   : > { %v4453_v44 = vpop.f32.mrb[65].mxu1 }
 0x357   : > { %v4454_v43 = vadd.f32 %v4453_v44, %v4452_v29  ;;  %v4455_v59 = vpop.f32.mrb[66].mxu1  ;;  %v6667_v17 = vadd.f32 %v4515_v38, %v3368_v53 }
 0x358   : > { %v4456_v35 = vpop.f32.mrb[67].mxu1 }
 0x359   : > { %v3373_v37 = vadd.f32 %v4454_v43, %v6623_v34  ;;  %v4457_v0 = vadd.f32 %v4456_v35, %v4455_v59  ;;  %v4516_v7 = vpop.f32.mrb[68].mxu0 }
 0x35a   : > { %v4517_v21 = vpop.f32.mrb[69].mxu0 }
 0x35b   : > { %v3376_v57 = vadd.f32 %v4457_v0, %v6625_v20  ;;  %v4518_v32 = vadd.f32 %v4517_v21, %v4516_v7  ;;  %v4519_v18 = vpop.f32.mrb[70].mxu0 }
 0x35c   : > { %v4520_v13 = vpop.f32.mrb[71].mxu0 }
 0x35d   : > { %v4458_v46 = vpop.f32.mrb[68].mxu1  ;;  %v4521_v3 = vadd.f32 %v4520_v13, %v4519_v18  ;;  %v6671_v31 = vadd.f32 %v4518_v32, %v3373_v37 }
 0x35e   : > { %v4459_v6 = vpop.f32.mrb[69].mxu1 }
 0x35f   : > { %v4460_v11 = vadd.f32 %v4459_v6, %v4458_v46  ;;  %v4461_v12 = vpop.f32.mrb[70].mxu1  ;;  %v6673_v42 = vadd.f32 %v4521_v3, %v3376_v57 }
 0x360   : > { %v4462_v9 = vpop.f32.mrb[71].mxu1 }
 0x361   : > { %v3381_v34 = vadd.f32 %v4460_v11, %v6629_v40  ;;  %v4463_v4 = vadd.f32 %v4462_v9, %v4461_v12  ;;  %v4522_v48 = vpop.f32.mrb[72].mxu0 }
 0x362   : > { %v4523_v24 = vpop.f32.mrb[73].mxu0 }
 0x363   : > { %v3384_v20 = vadd.f32 %v4463_v4, %v6631_v15  ;;  %v4524_v55 = vadd.f32 %v4523_v24, %v4522_v48  ;;  %v4525_v25 = vpop.f32.mrb[74].mxu0 }
 0x364   : > { %v4526_v5 = vpop.f32.mrb[75].mxu0 }
 0x365   : > { %v4464_v23 = vpop.f32.mrb[72].mxu1  ;;  %v4527_v14 = vadd.f32 %v4526_v5, %v4525_v25  ;;  %v6677_v2 = vadd.f32 %v4524_v55, %v3381_v34 }
 0x366   : > { %v4465_v26 = vpop.f32.mrb[73].mxu1 }
 0x367   : > { %v4466_v19 = vadd.f32 %v4465_v26, %v4464_v23  ;;  %v4467_v27 = vpop.f32.mrb[74].mxu1  ;;  %v6679_v51 = vadd.f32 %v4527_v14, %v3384_v20 }
 0x368   : > { %v4468_v63 = vpop.f32.mrb[75].mxu1 }
 0x369   : > { %v3389_v40 = vadd.f32 %v4466_v19, %v6635_v56  ;;  %v4469_v53 = vadd.f32 %v4468_v63, %v4467_v27  ;;  %v4528_v1 = vpop.f32.mrb[76].mxu0 }
 0x36a   : > { %v4529_v10 = vpop.f32.mrb[77].mxu0 }
 0x36b   : > { %v3392_v15 = vadd.f32 %v4469_v53, %v6637_v28  ;;  %v4530_v45 = vadd.f32 %v4529_v10, %v4528_v1  ;;  %v4531_v29 = vpop.f32.mrb[78].mxu0 }
 0x36c   : > { %v4532_v38 = vpop.f32.mrb[79].mxu0 }
 0x36d   : > { %v4470_v44 = vpop.f32.mrb[76].mxu1  ;;  %v4533_v43 = vadd.f32 %v4532_v38, %v4531_v29  ;;  %v6683_v35 = vadd.f32 %v4530_v45, %v3389_v40 }
 0x36e   : > { %v4471_v59 = vpop.f32.mrb[77].mxu1 }
 0x36f   : > { %v4472_v37 = vadd.f32 %v4471_v59, %v4470_v44  ;;  %v4473_v0 = vpop.f32.mrb[78].mxu1  ;;  %v6685_v21 = vadd.f32 %v4533_v43, %v3392_v15 }
 0x370   : > { %v4474_v7 = vpop.f32.mrb[79].mxu1 }
 0x371   : > { %v3397_v56 = vadd.f32 %v4472_v37, %v6641_v39  ;;  %v4475_v57 = vadd.f32 %v4474_v7, %v4473_v0  ;;  %v4534_v32 = vpop.f32.mrb[80].mxu0 }
 0x372   : > { %v4535_v18 = vpop.f32.mrb[81].mxu0 }
 0x373   : > { %v3400_v28 = vadd.f32 %v4475_v57, %v6643_v33  ;;  %v4536_v13 = vadd.f32 %v4535_v18, %v4534_v32  ;;  %v4537_v46 = vpop.f32.mrb[82].mxu0 }
 0x374   : > { %v4538_v3 = vpop.f32.mrb[83].mxu0 }
 0x375   : > { %v4674_v6 = vpop.f32.mrb[80].mxu1  ;;  %v4539_v11 = vadd.f32 %v4538_v3, %v4537_v46  ;;  %v3494_v34 = vadd.f32 %v4536_v13, %v3397_v56 }
 0x376   : > { %v3543_v12 = vadd.f32 %v4674_v6, %v6653_v54  ;;  %v3534_v9 = vpop.f32.mrb[81].mxu1 }
 0x377   : > { %v3535_v4 = vadd.f32 %v3534_v9, %v6647_v36  ;;  %v4675_v48 = vpop.f32.mrb[82].mxu1  ;;  %v3497_v55 = vadd.f32 %v4539_v11, %v3400_v28 }
 0x378   : > { %v3599_v39 = vmax.f32 %v3543_v12, 0.0  ;;  %v3546_v24 = vadd.f32 %v4675_v48, %v6655_v47  ;;  %v3537_v20 = vpop.f32.mrb[83].mxu1 }
 0x379   : > { %v3597_v33 = vmax.f32 %v3535_v4, 0.0  ;;  %v3538_v25 = vadd.f32 %v3537_v20, %v6649_v49 }
 0x37a   : > { %3615 = vst [vmem:[%s6696_s12 + $0x10] sm:$0xff] %v3599_v39  ;;  %v3600_v54 = vmax.f32 %v3546_v24, 0.0 }
 0x37b   : > { %3613 = vst [vmem:[%s6696_s12] sm:$0xff] %v3597_v33  ;;  %v3598_v36 = vmax.f32 %v3538_v25, 0.0 }
 0x37c   : > { %3616 = vst [vmem:[%s6696_s12 + $0x18] sm:$0xff] %v3600_v54  ;;  %v3630_v5 = vpack.c.bf16 %v3600_v54, %v3599_v39 }
 0x37d   : > { %3614 = vst [vmem:[%s6696_s12 + $0x8] sm:$0xff] %v3598_v36  ;;  %v3629_v47 = vpack.c.bf16 %v3598_v36, %v3597_v33  ;;  %v4678_v23 = vpop.f32.mrb[84].mxu1 }
 0x37e   : > { %v3559_v49 = vadd.f32 %v4678_v23, %v6665_v58  ;;  %v3550_v14 = vpop.f32.mrb[85].mxu1 }
 0x37f   : > { %v3551_v26 = vadd.f32 %v3550_v14, %v6659_v61  ;;  %v4679_v19 = vpop.f32.mrb[86].mxu1  ;;  %4704 = vmatprep.mubr.bf16.mxu0 %v3629_v47 }
 0x380   : > { %v3603_v27 = vmax.f32 %v3559_v49, 0.0  ;;  %v3562_v63 = vadd.f32 %v4679_v19, %v6667_v17  ;;  %v3553_v40 = vpop.f32.mrb[87].mxu1  ;;  %4705 = vmatmul.mubr.bf16.vlgmr.msra.gmra.mrb[84].mxu0 %v3630_v5 }
 0x381   : > { %v3601_v53 = vmax.f32 %v3551_v26, 0.0  ;;  %v3554_v1 = vadd.f32 %v3553_v40, %v6661_v60 }
 0x382   : > { %3619 = vst [vmem:[%s6696_s12 + $0x30] sm:$0xff] %v3603_v27  ;;  %v3604_v10 = vmax.f32 %v3562_v63, 0.0 }
 0x383   : > { %3617 = vst [vmem:[%s6696_s12 + $0x20] sm:$0xff] %v3601_v53  ;;  %v3602_v15 = vmax.f32 %v3554_v1, 0.0 }
 0x384   : > { %3620 = vst [vmem:[%s6696_s12 + $0x38] sm:$0xff] %v3604_v10  ;;  %v3632_v58 = vpack.c.bf16 %v3604_v10, %v3603_v27 }
 0x385   : > { %3618 = vst [vmem:[%s6696_s12 + $0x28] sm:$0xff] %v3602_v15  ;;  %v3631_v61 = vpack.c.bf16 %v3602_v15, %v3601_v53  ;;  %v4682_v45 = vpop.f32.mrb[88].mxu1 }
 0x386   : > { %v3575_v29 = vadd.f32 %v4682_v45, %v6677_v2  ;;  %v3566_v17 = vpop.f32.mrb[89].mxu1 }
 0x387   : > { %v3567_v38 = vadd.f32 %v3566_v17, %v6671_v31  ;;  %v4683_v44 = vpop.f32.mrb[90].mxu1  ;;  %4708 = vmatprep.mubr.bf16.mxu0 %v3631_v61 }
 0x388   : > { %v3607_v60 = vmax.f32 %v3575_v29, 0.0  ;;  %v3578_v43 = vadd.f32 %v4683_v44, %v6679_v51  ;;  %v3569_v59 = vpop.f32.mrb[91].mxu1  ;;  %4709 = vmatmul.mubr.bf16.gmra.mrb[88].mxu0 %v3632_v58 }
 0x389   : > { %v3605_v37 = vmax.f32 %v3567_v38, 0.0  ;;  %v3570_v0 = vadd.f32 %v3569_v59, %v6673_v42 }
 0x38a   : > { %3623 = vst [vmem:[%s6696_s12 + $0x50] sm:$0xff] %v3607_v60  ;;  %v3608_v7 = vmax.f32 %v3578_v43, 0.0 }
 0x38b   : > { %3621 = vst [vmem:[%s6696_s12 + $0x40] sm:$0xff] %v3605_v37  ;;  %v3606_v56 = vmax.f32 %v3570_v0, 0.0 }
 0x38c   : > { %3624 = vst [vmem:[%s6696_s12 + $0x58] sm:$0xff] %v3608_v7  ;;  %v3634_v2 = vpack.c.bf16 %v3608_v7, %v3607_v60 }
 0x38d   : > { %3622 = vst [vmem:[%s6696_s12 + $0x48] sm:$0xff] %v3606_v56  ;;  %v3633_v31 = vpack.c.bf16 %v3606_v56, %v3605_v37  ;;  %v4686_v57 = vpop.f32.mrb[92].mxu1 }
 0x38e   : > { %v3591_v32 = vadd.f32 %v4686_v57, %v3494_v34  ;;  %v3582_v18 = vpop.f32.mrb[93].mxu1 }
 0x38f   : > { %v3583_v51 = vadd.f32 %v3582_v18, %v6683_v35  ;;  %v4687_v28 = vpop.f32.mrb[94].mxu1  ;;  %4712 = vmatprep.mubr.bf16.mxu1 %v3633_v31 }
 0x390   : > { %v3611_v42 = vmax.f32 %v3591_v32, 0.0  ;;  %v3594_v13 = vadd.f32 %v4687_v28, %v3497_v55  ;;  %v3585_v46 = vpop.f32.mrb[95].mxu1  ;;  %4713 = vmatmul.mubr.bf16.vlgmr.msra.gmra.mrb[8].mxu1 %v3634_v2 }
 0x391   : > { %v3609_v3 = vmax.f32 %v3583_v51, 0.0  ;;  %v3586_v6 = vadd.f32 %v3585_v46, %v6685_v21 }
 0x392   : > { %3627 = vst [vmem:[%s6696_s12 + $0x70] sm:$0xff] %v3611_v42  ;;  %v3612_v11 = vmax.f32 %v3594_v13, 0.0 }
 0x393   : > { %3625 = vst [vmem:[%s6696_s12 + $0x60] sm:$0xff] %v3609_v3  ;;  %v3610_v12 = vmax.f32 %v3586_v6, 0.0 }
 0x394   : > { %3628 = vst [vmem:[%s6696_s12 + $0x78] sm:$0xff] %v3612_v11  ;;  %v3636_v35 = vpack.c.bf16 %v3612_v11, %v3611_v42 }
 0x395   : > { %3626 = vst [vmem:[%s6696_s12 + $0x68] sm:$0xff] %v3610_v12  ;;  %v3635_v9 = vpack.c.bf16 %v3610_v12, %v3609_v3 }
 0x397   : > { %4716 = vmatprep.mubr.bf16.mxu1 %v3635_v9 }
 0x398   : > { %4717 = vmatmul.mubr.bf16.gmra.mrb[12].mxu1 %v3636_v35 }
 0x399   : > { %5210 = shalt.err (!%p5207_p11)
}
 0x39a   : > { %s5211_s16 = scalar_lea.hbm %s6734_s25, 2048  ;;  %s5215_s13 = scalar_lea.hbm %s6996_s7, 8192 }
 0x39b   : > { %p5212_p1 = scmp.ne.s32.totalorder %s6734_s25, %s5211_s16  ;;  %p5216_p8 = scmp.lt.u32.totalorder %s6734_s25, %s6996_s7 }
 0x39c   : > { %p5217_p2 = scmp.lt.u32.totalorder %s5215_s13, %s5211_s16  ;;  %p5219_p0 = scmp.lt.u32.totalorder %s5211_s16, %s6734_s25 }
 0x39d   : > { %p5213_p12 = pnand %p5212_p1, %p5615_p3 }
 0x39e   : > { %p5218_p6 = por %p5217_p2, %p5216_p8 }
 0x39f   : > { %p5214_p4 = pneg %p5213_p12 }
 0x3a0   : > { %p5220_p5 = por %p5219_p0, %p5218_p6 }
 0x3a2   : > { %p5221_p7 = pnand %p5220_p5, %p5214_p4 }
 0x3a4   : > { %5224 = shalt.err (!%p5221_p7)
}
 0x3a5   : > { %s5356_s2 = smov 128   ;;  %s5357_s10 = smov 8  }
 0x3a6   : > { %4805 = dma.vmem_to_hbm [thread:$0]  (%p5615_p3), %s6737_s27, 2048, %s6734_s25, %s3859_s4, %s5356_s2, %s5356_s2, %s5357_s10  }
 0x3a7   : > { %s6997_s20 = sld [smem:[#allocation40_spill]]  ;;  %s6998_s14 = sld [smem:[#allocation38_spill]] }
 0x3a8   : > { %s6782_s25 = scalar_lea.vmem [#allocation15], %s4104_s28  ;;  %s6999_s16 = sld [smem:[#allocation41_spill]] }
 0x3a9   : > { %s3874_s28 = sshll.u32 %s6782_s25, 4  ;;  %s3854_s6 = scalar_lea.sflag [#allocation6], %s5726_s3  ;;  %s6806_s28 = int_to_ptr.vmem [resolvable:$true] %s3874_s28 }
 0x3aa   : > { %s5225_s13 = scalar_lea.vmem %s6806_s28, 2048  ;;  %s5358_s12 = smov [#allocation15]  }
 0x3ab   : > { %p5226_p13 = scmp.ne.s32.totalorder %s6806_s28, %s5225_s13  ;;  %s5229_s30 = sshll.u32 %s5358_s12, 4  ;;  %s5230_s30 = int_to_ptr.vmem [resolvable:$false] %s5229_s30 }
 0x3ac   : > { %s5231_s15 = scalar_lea.vmem %s5230_s30, 4096  ;;  %p5232_p11 = scmp.lt.s32.totalorder %s6806_s28, %s5230_s30 }
 0x3ad   : > { %v4123_v21 = vld [vmem:[%s6997_s20] ss:$0 sm:$0xff]  ;;  %p5227_p10 = pnand %p5226_p13, %p5615_p3  ;;  %p5233_p1 = scmp.lt.s32.totalorder %s5231_s15, %s5225_s13 }
 0x3ae   : > { %v913_v34 = vadd.f32 %v6448_v30, %v4123_v21  ;;  %v905_v4 = vadd.f32 %v4123_v21, %v6450_v50  ;;  %v4223_v48 = vld [vmem:[%s6998_s14] ss:$0 sm:$0xff]  ;;  %v910_v39 = vadd.f32 %v6438_v52, %v4123_v21  ;;  %v902_v24 = vadd.f32 %v4123_v21, %v6443_v41  ;;  %s6804_s5 = scalar_lea.hbm %s6999_s16, %s4236_s0 }
 0x3af   : > { %v926_v30 = vadd.f32 %v6479_v62, %v4123_v21  ;;  %v918_v49 = vadd.f32 %v4123_v21, %v6491_v22  ;;  %v929_v52 = vadd.f32 %v6496_v8, %v4123_v21  ;;  %v921_v27 = vadd.f32 %v4123_v21, %v6504_v16  ;;  %p5228_p9 = pneg %p5227_p10  ;;  %p5234_p12 = por %p5233_p1, %p5232_p11 }
 0x3b0   : > { %v4743_v25 = vadd.f32 %v4223_v48, %v913_v34  ;;  %v4746_v5 = vadd.f32 %v4223_v48, %v905_v4  ;;  %v4762_v60 = vadd.f32 %v4223_v48, %v4123_v21 }
 0x3b1   : > { %v4749_v62 = vadd.f32 %v4223_v48, %v926_v30  ;;  %v4752_v8 = vadd.f32 %v4223_v48, %v918_v49  ;;  %v4755_v1 = vadd.f32 %v4223_v48, %v929_v52  ;;  %v4758_v58 = vadd.f32 %v4223_v48, %v921_v27  ;;  %p5235_p4 = pnand %p5234_p12, %p5228_p9 }
 0x453   : > { %v4706_v20 = vpop.f32.mrb[84].mxu0 }
 0x454   : > { %v4737_v55 = vadd.f32 %v4706_v20, %v910_v39  ;;  %v3742_v33 = vpop.f32.mrb[85].mxu0 }
 0x455   : > { %v4740_v54 = vadd.f32 %v3742_v33, %v902_v24  ;;  %v4707_v36 = vpop.f32.mrb[86].mxu0 }
 0x456   : > { %v4738_v47 = vadd.f32 %v4737_v55, %v4223_v48  ;;  %v4744_v50 = vadd.f32 %v4743_v25, %v4707_v36  ;;  %v3745_v23 = vpop.f32.mrb[87].mxu0 }
 0x457   : > { %v4741_v14 = vadd.f32 %v4740_v54, %v4223_v48  ;;  %v4747_v26 = vadd.f32 %v4746_v5, %v3745_v23 }
 0x458   : > { %v3823_v41 = vmax.f32 %v4738_v47, 0.0  ;;  %v3824_v19 = vmax.f32 %v4744_v50, 0.0 }
 0x459   : > { %v3821_v63 = vmax.f32 %v4741_v14, 0.0  ;;  %v3822_v40 = vmax.f32 %v4747_v26, 0.0 }
 0x45a   : > { %3839 = vst [vmem:[%s6782_s25 + $0x10] sm:$0xff] %v3823_v41  ;;  %3840 = vst [vmem:[%s6782_s25 + $0x18] sm:$0xff] %v3824_v19 }
 0x45b   : > { %3837 = vst [vmem:[%s6782_s25] sm:$0xff] %v3821_v63  ;;  %3838 = vst [vmem:[%s6782_s25 + $0x8] sm:$0xff] %v3822_v40  ;;  %v4710_v22 = vpop.f32.mrb[88].mxu0 }
 0x45c   : > { %v4750_v53 = vadd.f32 %v4749_v62, %v4710_v22  ;;  %v3758_v16 = vpop.f32.mrb[89].mxu0 }
 0x45d   : > { %v4753_v10 = vadd.f32 %v4752_v8, %v3758_v16  ;;  %v4711_v15 = vpop.f32.mrb[90].mxu0 }
 0x45e   : > { %v3827_v61 = vmax.f32 %v4750_v53, 0.0  ;;  %v4756_v45 = vadd.f32 %v4755_v1, %v4711_v15  ;;  %v3761_v29 = vpop.f32.mrb[91].mxu0 }
 0x45f   : > { %v3825_v17 = vmax.f32 %v4753_v10, 0.0  ;;  %v4759_v38 = vadd.f32 %v4758_v58, %v3761_v29 }
 0x460   : > { %3843 = vst [vmem:[%s6782_s25 + $0x30] sm:$0xff] %v3827_v61  ;;  %v3828_v44 = vmax.f32 %v4756_v45, 0.0 }
 0x461   : > { %3841 = vst [vmem:[%s6782_s25 + $0x20] sm:$0xff] %v3825_v17  ;;  %v3826_v43 = vmax.f32 %v4759_v38, 0.0 }
 0x462   : > { %3844 = vst [vmem:[%s6782_s25 + $0x38] sm:$0xff] %v3828_v44 }
 0x463   : > { %3842 = vst [vmem:[%s6782_s25 + $0x28] sm:$0xff] %v3826_v43  ;;  %v4714_v59 = vpop.f32.mrb[8].mxu1 }
 0x464   : > { %v4761_v37 = vadd.f32 %v4762_v60, %v4714_v59  ;;  %v3774_v0 = vpop.f32.mrb[9].mxu1 }
 0x465   : > { %v4763_v7 = vadd.f32 %v4762_v60, %v3774_v0  ;;  %v4715_v56 = vpop.f32.mrb[10].mxu1 }
 0x466   : > { %v3831_v2 = vmax.f32 %v4761_v37, 0.0  ;;  %v4765_v31 = vadd.f32 %v4762_v60, %v4715_v56  ;;  %v3777_v57 = vpop.f32.mrb[11].mxu1 }
 0x467   : > { %v3829_v32 = vmax.f32 %v4763_v7, 0.0  ;;  %v4767_v18 = vadd.f32 %v4762_v60, %v3777_v57 }
 0x468   : > { %3847 = vst [vmem:[%s6782_s25 + $0x50] sm:$0xff] %v3831_v2  ;;  %v3832_v51 = vmax.f32 %v4765_v31, 0.0 }
 0x469   : > { %3845 = vst [vmem:[%s6782_s25 + $0x40] sm:$0xff] %v3829_v32  ;;  %v3830_v28 = vmax.f32 %v4767_v18, 0.0 }
 0x46a   : > { %3848 = vst [vmem:[%s6782_s25 + $0x58] sm:$0xff] %v3832_v51 }
 0x46b   : > { %3846 = vst [vmem:[%s6782_s25 + $0x48] sm:$0xff] %v3830_v28  ;;  %v4718_v42 = vpop.f32.mrb[12].mxu1 }
 0x46c   : > { %v4769_v13 = vadd.f32 %v4762_v60, %v4718_v42  ;;  %v3790_v46 = vpop.f32.mrb[13].mxu1 }
 0x46d   : > { %v4771_v3 = vadd.f32 %v4762_v60, %v3790_v46  ;;  %v4719_v6 = vpop.f32.mrb[14].mxu1 }
 0x46e   : > { %v3835_v11 = vmax.f32 %v4769_v13, 0.0  ;;  %v4773_v12 = vadd.f32 %v4762_v60, %v4719_v6  ;;  %v3793_v35 = vpop.f32.mrb[15].mxu1 }
 0x46f   : > { %v3833_v9 = vmax.f32 %v4771_v3, 0.0  ;;  %v4775_v21 = vadd.f32 %v4762_v60, %v3793_v35 }
 0x470   : > { %3851 = vst [vmem:[%s6782_s25 + $0x70] sm:$0xff] %v3835_v11  ;;  %v3836_v34 = vmax.f32 %v4773_v12, 0.0 }
 0x471   : > { %3849 = vst [vmem:[%s6782_s25 + $0x60] sm:$0xff] %v3833_v9  ;;  %v3834_v4 = vmax.f32 %v4775_v21, 0.0 }
 0x472   : > { %3852 = vst [vmem:[%s6782_s25 + $0x78] sm:$0xff] %v3836_v34 }
 0x473   : > { %3850 = vst [vmem:[%s6782_s25 + $0x68] sm:$0xff] %v3834_v4 }
 0x474   : > { %5238 = shalt.err (!%p5235_p4)
}
 0x475   : > { %s5239_s0 = scalar_lea.hbm %s6804_s5, 2048  ;;  %s5243_s20 = scalar_lea.hbm %s6999_s16, 8192 }
 0x476   : > { %p5240_p8 = scmp.ne.s32.totalorder %s6804_s5, %s5239_s0  ;;  %p5244_p0 = scmp.lt.u32.totalorder %s6804_s5, %s6999_s16 }
 0x477   : > { %p5245_p5 = scmp.lt.u32.totalorder %s5243_s20, %s5239_s0  ;;  %p5247_p13 = scmp.lt.u32.totalorder %s5239_s0, %s6804_s5 }
 0x478   : > { %p5241_p2 = pnand %p5240_p8, %p5615_p3 }
 0x479   : > { %p5246_p7 = por %p5245_p5, %p5244_p0 }
 0x47a   : > { %p5242_p6 = pneg %p5241_p2 }
 0x47b   : > { %p5248_p10 = por %p5247_p13, %p5246_p7 }
 0x47d   : > { %p5249_p9 = pnand %p5248_p10, %p5242_p6 }
 0x47f   : > { %5252 = shalt.err (!%p5249_p9)
}
 0x480   : > { %4804 = dma.vmem_to_hbm [thread:$0]  (%p5615_p3), %s6806_s28, 2048, %s6804_s5, %s3854_s6, %s5356_s2, %s5356_s2, %s5357_s10  }
 0x481 PF: > { %s7000_s14 = sld [smem:[#allocation25_spill]]  ;;  %s7001_s25 = sld [smem:[#allocation27_spill]] }
 0x482   : > { %p4844_p11 = scmp.ge.s32.totalorder %s5343_s24, 2 }
 0x487   : > { %s3907_s27 = sand.u32 1, %s7000_s14   ;;  %p7002_p1 = scmp.ne.s32.totalorder %s7001_s25, 0 }
 0x488   : > { %s3908_s4 = scalar_lea.sflag [#allocation6], %s3907_s27 }
 0x489   : > { %p4829_p12 = pnand %p4844_p11, %p7002_p1 }
 0x48b   : > { %5306 = dma.done.wait (!%p4829_p12), %s3908_s4, 2048  }
 0x48c   : > { %5308 = vsyncadd (!%p4829_p12), %s3908_s4, 4294965248  ;;  %s3917_s11 = scalar_lea.sflag [#allocation17], %s3907_s27 }
 0x48d   : > { %5310 = dma.done.wait (!%p4829_p12), %s3917_s11, 2048  }
 0x48e   : > { %5312 = vsyncadd (!%p4829_p12), %s3917_s11, 4294965248  ;;  %s36_s24 = sadd.s32 1, %s5343_s24   ;;  %s7003_s3 = smov %s5631_s17 }
 0x48f   : > { %p33_p4 = scmp.ge.s32.totalorder %s36_s24, 6   ;;  %s7004_s2 = sld [smem:[#allocation28_spill]] }
 0x490   : > { %s7005_s17 = smov %s5319_s18  ;;  %s7006_s18 = smov %s5323_s19 }
 0x491   : > { %s7007_s19 = smov %s7003_s3  ;;  %s7008_s20 = smov %s5335_s22 }
 0x492   : > { %s7009_s21 = smov %s5339_s23  ;;  %s7010_s22 = smov %s7013_s9 }
 0x493   :  { %35 = sbr.rel (!%p33_p4) target bundleno = 25 (0x19), region = 151 }
 0x495   : > { %s7011_s23 = smov %s7004_s2 }
 0x49a   :  { %3922 = vsyncpa [#allocation5], 1 }
 0x49b   :  { %3924 = vsyncpa [#allocation5 + $0x1], 1 }
 0x49c   :  { %3925 = vsyncpa [#allocation8], 1 }
 0x49d   :  { %3927 = vsyncpa [#allocation8 + $0x1], 1 }
 0x49e   :  { %3928 = vsyncpa [#allocation11], 1 }
 0x49f   :  { %3929 = vsyncpa [#allocation14], 1 }
 0x4a0   :  { %3930 = vsyncpa [#allocation6], 1 }
 0x4a1   :  { %3932 = vsyncpa [#allocation6 + $0x1], 1 }
 0x4a2   :  { %3933 = vsyncpa [#allocation17], 1 }
 0x4a3   :  { %3935 = vsyncpa [#allocation17 + $0x1], 1 }

</bundles_post_ra>
